<compile_context>
chip_gen: v6e
topology: v6e:2x2x1
jax: 0.10.0
libtpu: 0.0.40
codegen_flags: <defaults>
</compile_context>

<pallas_src>
import functools
import math

import jax
import jax.numpy as jnp
from jax import lax
from jax.experimental import pallas as pl
from jax.experimental.pallas import tpu as pltpu


_VEC_ORDER = ('bo', 'g1', 'be1', 'b2', 'g2', 'be2')   # packed (6, H) rows


def _layer_norm(x, gamma, beta, eps=1e-5):
    mu = jnp.mean(x, axis=-1, keepdims=True)
    var = jnp.mean((x - mu) ** 2, axis=-1, keepdims=True)
    return (x - mu) * lax.rsqrt(var + eps) * gamma + beta


# ----------------------------------------------------------------------------- kernel

def fused_pooling_encoder_kernel(x_ref, bias_ref, wh_ref, bh_ref, woh_ref,
                                 w1_ref, b1_ref, w2_ref, vecs_ref,
                                 out_ref, buf_ref, *,
                                 num_heads, num_layers, hidden_blocks,
                                 block_lens, pool_flags, pooling_type, bs):
    """Whole PoolingEncoder forward for `bs` batch elements per grid step."""
    H = x_ref.shape[-1]
    hd = H // num_heads
    scale = 1.0 / math.sqrt(float(hd))

    def layer(x, bias):
        # Per-head attention; weights/biases read from VMEM refs at point of use
        # (pre-split per head on the host, so no lane-offset slicing of activations).
        proj = None
        for h in range(num_heads):                              # static unroll over heads
            qh = jnp.dot(x, wh_ref[h], preferred_element_type=jnp.float32) + bh_ref[h]
            kh = (jnp.dot(x, wh_ref[num_heads + h], preferred_element_type=jnp.float32)
                  + bh_ref[num_heads + h])
            vh = (jnp.dot(x, wh_ref[2 * num_heads + h], preferred_element_type=jnp.float32)
                  + bh_ref[2 * num_heads + h])
            # QK^T without materializing a transpose: contract dim 1 of both operands.
            s = lax.dot_general(qh, kh, (((1,), (1,)), ((), ())),
                                preferred_element_type=jnp.float32) * scale + bias
            m = jnp.max(s, axis=-1, keepdims=True)
            e = jnp.exp(s - m)
            denom = jnp.sum(e, axis=-1, keepdims=True)
            p = e * pl.reciprocal(denom, approx=True)           # EUP vrcp, off VPU path
            ctx_h = jnp.dot(p, vh, preferred_element_type=jnp.float32)
            c = jnp.dot(ctx_h, woh_ref[h], preferred_element_type=jnp.float32)
            proj = c if proj is None else proj + c              # folds the head concat
        attn = proj + vecs_ref[0:1, :]                          # + bo
        y = _layer_norm(attn + x, vecs_ref[1:2, :], vecs_ref[2:3, :])      # post-LN 1
        ff = jnp.maximum(
            jnp.dot(y, w1_ref[...], preferred_element_type=jnp.float32) + b1_ref[...],
            0.0)
        ff = jnp.dot(ff, w2_ref[...], preferred_element_type=jnp.float32) + vecs_ref[3:4, :]
        return _layer_norm(ff + y, vecs_ref[4:5, :], vecs_ref[5:6, :])     # post-LN 2

    for bb in range(bs):                                        # static batch fold
        x = x_ref[bb]                                           # (L, H) value in vregs
        bias_all = bias_ref[bb]                                 # (hidden_blocks, L)
        for blk in range(hidden_blocks):                        # static: seq len changes
            l_cur = block_lens[blk]
            bias = bias_all[blk:blk + 1, 0:l_cur]               # (1, l_cur) 2-D slice
            residual = x

            def body(_, xc):
                return layer(xc, bias)
            # layers are deepcopies -> identical params; visible loop, fully unrolled
            x = lax.fori_loop(0, num_layers, body, x, unroll=True)
            x = x + residual

            if pool_flags[blk]:                                 # Pool1d(kernel=2, stride=2)
                l_half = l_cur // 2
                # Stage through VMEM scratch and read back with stride-2 sublane windows.
                # Exact (no MXU rounding) and known to lower; in-register variant TODO.
                buf_ref[0:l_cur, :] = x
                even = buf_ref[pl.ds(0, l_half, stride=2), :]
                odd = buf_ref[pl.ds(1, l_half, stride=2), :]
                x = jnp.maximum(even, odd) if pooling_type == 'max' else (even + odd) * 0.5
        out_ref[bb] = x


# ----------------------------------------------------------------------------- wrapper

def pool_mask(mask, pooling_type):
    # tiny (B, L) glue; equivalent of MaxPool1d/AvgPool1d(kernel=2, stride=2) on the mask.
    B, L = mask.shape
    Lh = L // 2
    mr = mask[:, :Lh * 2].reshape(B, Lh, 2)
    return jnp.max(mr, axis=-1) if pooling_type == 'max' else jnp.mean(mr, axis=-1)


def _num_parallel_steps(batch):
    """v7x has 2 TensorCores/chip -> keep a size-B parallel grid there; otherwise fold."""
    try:
        kind = jax.devices()[0].device_kind.lower()
    except Exception:
        kind = ''
    n_tc = 2 if ('v7' in kind or 'tpu7' in kind) else 1
    return n_tc if (n_tc > 1 and batch % n_tc == 0) else 1


def pooling_encoder_forward(encoder_states, encoder_mask, layer_params, *,
                            hidden_blocks, num_layers, num_heads, hidden_steps,
                            pooling_type):
    x = encoder_states.astype(jnp.float32)
    mask = encoder_mask.astype(jnp.float32)
    B, L, H = x.shape
    hd = H // num_heads
    I = layer_params['w1'].shape[1]

    # Per-block additive attention biases + pooled masks (NeMo form_attention_mask,
    # mask_future=False: bias = (1 - mask) * -10000).  Pooled masks are needed host-side
    # anyway (module output), so packing all block biases into one array is free.
    bias_packed = jnp.zeros((B, hidden_blocks, L), jnp.float32)
    block_lens, pool_flags = [], []
    cur_mask, cur_len = mask, L
    for blk in range(hidden_blocks):
        block_lens.append(cur_len)
        bias_packed = bias_packed.at[:, blk, :cur_len].set((1.0 - cur_mask) * -10000.0)
        do_pool = cur_len >= hidden_steps
        pool_flags.append(do_pool)
        if do_pool:
            cur_mask = pool_mask(cur_mask, pooling_type)
            cur_len = cur_len // 2
    out_len, out_mask = cur_len, cur_mask

    p = layer_params
    # Pre-split per-head weight / bias slabs once (lane-0 aligned inside the kernel).
    def cols(w):   # (H, H) -> (nh, H, hd)
        return jnp.stack([w[:, h * hd:(h + 1) * hd] for h in range(num_heads)], axis=0)

    def bcols(b):  # (1, H) -> (nh, 1, hd)
        return jnp.stack([b[:, h * hd:(h + 1) * hd] for h in range(num_heads)], axis=0)

    w_heads = jnp.concatenate([cols(p['wq']), cols(p['wk']), cols(p['wv'])], axis=0)
    b_heads = jnp.concatenate([bcols(p['bq']), bcols(p['bk']), bcols(p['bv'])], axis=0)
    wo_heads = jnp.stack([p['wo'][h * hd:(h + 1) * hd, :] for h in range(num_heads)], axis=0)
    vecs = jnp.concatenate([p[k] for k in _VEC_ORDER], axis=0)   # (6, H)

    # Batch-fold on single-TC chips; 2-way parallel grid on v7x.
    G = _num_parallel_steps(B)
    bs = B // G

    in_specs = [
        pl.BlockSpec((bs, L, H), lambda g: (g, 0, 0)),                  # states
        pl.BlockSpec((bs, hidden_blocks, L), lambda g: (g, 0, 0)),      # packed biases
        pl.BlockSpec(w_heads.shape, lambda g: (0, 0, 0)),               # qkv per-head W
        pl.BlockSpec(b_heads.shape, lambda g: (0, 0, 0)),               # qkv per-head b
        pl.BlockSpec(wo_heads.shape, lambda g: (0, 0, 0)),              # out-proj per-head
        pl.BlockSpec(p['w1'].shape, lambda g: (0, 0)),
        pl.BlockSpec(p['b1'].shape, lambda g: (0, 0)),
        pl.BlockSpec(p['w2'].shape, lambda g: (0, 0)),
        pl.BlockSpec(vecs.shape, lambda g: (0, 0)),
    ]
    # TODO(synk): for large H/I/L re-derive the "all weights + whole slab resident" VMEM
    # budget for v7x (64 MiB) and switch to a tiled weight-streaming path if needed.

    kernel = functools.partial(
        fused_pooling_encoder_kernel,
        num_heads=num_heads, num_layers=num_layers, hidden_blocks=hidden_blocks,
        block_lens=tuple(block_lens), pool_flags=tuple(pool_flags),
        pooling_type=pooling_type, bs=bs)

    out_states = pl.pallas_call(
        kernel,
        out_shape=jax.ShapeDtypeStruct((B, out_len, H), jnp.float32),
        grid=(G,),
        in_specs=in_specs,
        out_specs=pl.BlockSpec((bs, out_len, H), lambda g: (g, 0, 0)),
        scratch_shapes=[pltpu.VMEM((L, H), jnp.float32)],
        compiler_params=pltpu.CompilerParams(dimension_semantics=("parallel",)),
    )(x, bias_packed, w_heads, b_heads, wo_heads, p['w1'], p['b1'], p['w2'], vecs)
    return out_states, out_mask


# ----------------------------------------------------------------------------- reference (pure JAX)

def _ref_layer(x, bias, p, num_heads):
    H = x.shape[-1]
    hd = H // num_heads
    q = x @ p['wq'] + p['bq'][0]
    k = x @ p['wk'] + p['bk'][0]
    v = x @ p['wv'] + p['bv'][0]
    B, L, _ = x.shape

    def heads(t):
        return t.reshape(B, L, num_heads, hd).transpose(0, 2, 1, 3)
    qh, kh, vh = heads(q), heads(k), heads(v)
    scores = jnp.einsum('bhqd,bhkd->bhqk', qh, kh) / jnp.sqrt(jnp.float32(hd))
    scores = scores + bias[:, None, :, :]
    probs = jax.nn.softmax(scores, axis=-1)
    ctx = jnp.einsum('bhqk,bhkd->bhqd', probs, vh).transpose(0, 2, 1, 3).reshape(B, L, H)
    attn = ctx @ p['wo'] + p['bo'][0]
    y = _layer_norm(attn + x, p['g1'][0], p['be1'][0])
    ff = jnp.maximum(y @ p['w1'] + p['b1'][0], 0.0) @ p['w2'] + p['b2'][0]
    return _layer_norm(ff + y, p['g2'][0], p['be2'][0])


def _ref_forward(states, mask, p, *, hidden_blocks, num_layers, num_heads,
                 hidden_steps, pooling_type):
    h = states.astype(jnp.float32)
    m = mask.astype(jnp.float32)
    for _ in range(hidden_blocks):
        res = h
        bias = ((1.0 - m) * -10000.0)[:, None, :]
        x = h
        for _l in range(num_layers):
            x = _ref_layer(x, bias, p, num_heads)
        h = x + res
        if h.shape[1] >= hidden_steps:
            B, L, H = h.shape
            hr = h[:, :(L // 2) * 2, :].reshape(B, L // 2, 2, H)
            h = jnp.max(hr, axis=2) if pooling_type == 'max' else jnp.mean(hr, axis=2)
            m = pool_mask(m, pooling_type)
    return h, m


# ----------------------------------------------------------------------------- main

def init_layer_params(key, H, I):
    ks = jax.random.split(key, 12)
    s = 0.02
    n = lambda k, shape: (jax.random.normal(k, shape, jnp.float32) * s)
    return {
        'wq': n(ks[0], (H, H)), 'bq': n(ks[1], (1, H)),
        'wk': n(ks[2], (H, H)), 'bk': n(ks[3], (1, H)),
        'wv': n(ks[4], (H, H)), 'bv': n(ks[5], (1, H)),
        'wo': n(ks[6], (H, H)), 'bo': n(ks[7], (1, H)),
        'g1': jnp.ones((1, H), jnp.float32), 'be1': jnp.zeros((1, H), jnp.float32),
        'w1': n(ks[8], (H, I)), 'b1': n(ks[9], (1, I)),
        'w2': n(ks[10], (I, H)), 'b2': n(ks[11], (1, H)),
        'g2': jnp.ones((1, H), jnp.float32), 'be2': jnp.zeros((1, H), jnp.float32),
    }


if __name__ == "__main__":
    # PoolingEncoder config (small, consistent with the module defaults):
    num_layers = 1
    hidden_size = 32
    inner_size = 64
    num_attention_heads = 2
    hidden_steps = 4
    hidden_blocks = 2
    pooling_type = 'max'

    B, L = 2, 8
    key = jax.random.PRNGKey(0)
    k_x, k_p = jax.random.split(key)

    encoder_states = jax.random.normal(k_x, (B, L, hidden_size), jnp.float32)
    # mask: batch 0 fully valid, batch 1 has 2 padded positions at the end
    encoder_mask = jnp.array([[1] * 8, [1] * 6 + [0] * 2], jnp.float32)

    params = init_layer_params(k_p, hidden_size, inner_size)

    fwd = jax.jit(functools.partial(
        pooling_encoder_forward,
        hidden_blocks=hidden_blocks, num_layers=num_layers,
        num_heads=num_attention_heads, hidden_steps=hidden_steps,
        pooling_type=pooling_type))
    out_states, out_mask = fwd(encoder_states, encoder_mask, params)
    jax.block_until_ready(out_states)
    jax.block_until_ready(out_mask)

    ref_states, ref_mask = _ref_forward(
        encoder_states, encoder_mask, params,
        hidden_blocks=hidden_blocks, num_layers=num_layers,
        num_heads=num_attention_heads, hidden_steps=hidden_steps,
        pooling_type=pooling_type)

    assert out_states.shape == (B, L // 4, hidden_size), out_states.shape
    assert out_mask.shape == (B, L // 4), out_mask.shape
    assert jnp.allclose(out_states, ref_states, atol=1e-4, rtol=1e-4)
    assert jnp.allclose(out_mask, ref_mask)

    print("KERNEL_OK")
</pallas_src>

<mosaic_0001>
module attributes {stable_mosaic.version = 11 : i64} {
  func.func @fused_pooling_encoder_kernel(%arg0: i32, %arg1: memref<2x8x32xf32, #tpu.memory_space<vmem>>, %arg2: memref<2x2x8xf32, #tpu.memory_space<vmem>>, %arg3: memref<6x32x16xf32, #tpu.memory_space<vmem>>, %arg4: memref<6x1x16xf32, #tpu.memory_space<vmem>>, %arg5: memref<2x16x32xf32, #tpu.memory_space<vmem>>, %arg6: memref<32x64xf32, #tpu.memory_space<vmem>>, %arg7: memref<1x64xf32, #tpu.memory_space<vmem>>, %arg8: memref<64x32xf32, #tpu.memory_space<vmem>>, %arg9: memref<6x32xf32, #tpu.memory_space<vmem>>, %arg10: memref<2x2x32xf32, #tpu.memory_space<vmem>>, %arg11: memref<8x32xf32, #tpu.memory_space<vmem>>) attributes {dimension_semantics = [#tpu.dimension_semantics<parallel>], iteration_bounds = array<i64: 1>, scalar_prefetch = 0 : i64, scratch_operands = 1 : i64, tpu.core_type = #tpu.core_type<tc>, window_params = [{transform_indices = @transform_0, window_bounds = array<i64: 2, 8, 32>}, {transform_indices = @transform_1, window_bounds = array<i64: 2, 2, 8>}, {pipeline_mode = #tpu.pipeline_mode<synchronous>, transform_indices = @transform_2, window_bounds = array<i64: 6, 32, 16>}, {pipeline_mode = #tpu.pipeline_mode<synchronous>, transform_indices = @transform_3, window_bounds = array<i64: 6, 1, 16>}, {pipeline_mode = #tpu.pipeline_mode<synchronous>, transform_indices = @transform_4, window_bounds = array<i64: 2, 16, 32>}, {pipeline_mode = #tpu.pipeline_mode<synchronous>, transform_indices = @transform_5, window_bounds = array<i64: 32, 64>}, {pipeline_mode = #tpu.pipeline_mode<synchronous>, transform_indices = @transform_6, window_bounds = array<i64: 1, 64>}, {pipeline_mode = #tpu.pipeline_mode<synchronous>, transform_indices = @transform_7, window_bounds = array<i64: 64, 32>}, {pipeline_mode = #tpu.pipeline_mode<synchronous>, transform_indices = @transform_8, window_bounds = array<i64: 6, 32>}, {transform_indices = @transform_9, window_bounds = array<i64: 2, 2, 32>}]} {
    %c0 = arith.constant 0 : index
    %c0_0 = arith.constant 0 : index
    %c0_1 = arith.constant 0 : index
    %0 = vector.load %arg1[%c0, %c0_0, %c0_1] : memref<2x8x32xf32, #tpu.memory_space<vmem>>, vector<1x8x32xf32>
    %1 = vector.shape_cast %0 : vector<1x8x32xf32> to vector<8x32xf32>
    %c0_2 = arith.constant 0 : index
    %c0_3 = arith.constant 0 : index
    %c0_4 = arith.constant 0 : index
    %2 = vector.load %arg2[%c0_2, %c0_3, %c0_4] : memref<2x2x8xf32, #tpu.memory_space<vmem>>, vector<1x2x8xf32>
    %3 = vector.shape_cast %2 : vector<1x2x8xf32> to vector<2x8xf32>
    %4 = vector.extract_strided_slice %3 {offsets = [0, 0], sizes = [1, 8], strides = [1, 1]} : vector<2x8xf32> to vector<1x8xf32>
    %c0_i32 = arith.constant 0 : i32
    %c0_5 = arith.constant 0 : index
    %c0_6 = arith.constant 0 : index
    %c0_7 = arith.constant 0 : index
    %5 = vector.load %arg3[%c0_5, %c0_6, %c0_7] : memref<6x32x16xf32, #tpu.memory_space<vmem>>, vector<1x32x16xf32>
    %6 = vector.shape_cast %5 : vector<1x32x16xf32> to vector<32x16xf32>
    %cst = arith.constant dense<0.000000e+00> : vector<8x16xf32>
    %7 = tpu.matmul %1, %6, %cst {dimension_numbers = #tpu.dot_dimension_numbers<[1], [0], [0], [1], [0, 0, 1, 1], [], []>} : vector<8x32xf32>, vector<32x16xf32>, vector<8x16xf32> -> vector<8x16xf32>
    %c0_8 = arith.constant 0 : index
    %c0_9 = arith.constant 0 : index
    %c0_10 = arith.constant 0 : index
    %8 = vector.load %arg4[%c0_8, %c0_9, %c0_10] : memref<6x1x16xf32, #tpu.memory_space<vmem>>, vector<1x1x16xf32>
    %9 = vector.shape_cast %8 : vector<1x1x16xf32> to vector<1x16xf32>
    %10 = vector.broadcast %9 : vector<1x16xf32> to vector<8x16xf32>
    %11 = arith.addf %7, %10 : vector<8x16xf32>
    %c2 = arith.constant 2 : index
    %c0_11 = arith.constant 0 : index
    %c0_12 = arith.constant 0 : index
    %12 = vector.load %arg3[%c2, %c0_11, %c0_12] : memref<6x32x16xf32, #tpu.memory_space<vmem>>, vector<1x32x16xf32>
    %13 = vector.shape_cast %12 : vector<1x32x16xf32> to vector<32x16xf32>
    %cst_13 = arith.constant dense<0.000000e+00> : vector<8x16xf32>
    %14 = tpu.matmul %1, %13, %cst_13 {dimension_numbers = #tpu.dot_dimension_numbers<[1], [0], [0], [1], [0, 0, 1, 1], [], []>} : vector<8x32xf32>, vector<32x16xf32>, vector<8x16xf32> -> vector<8x16xf32>
    %c2_14 = arith.constant 2 : index
    %c0_15 = arith.constant 0 : index
    %c0_16 = arith.constant 0 : index
    %15 = vector.load %arg4[%c2_14, %c0_15, %c0_16] : memref<6x1x16xf32, #tpu.memory_space<vmem>>, vector<1x1x16xf32>
    %16 = vector.shape_cast %15 : vector<1x1x16xf32> to vector<1x16xf32>
    %17 = vector.broadcast %16 : vector<1x16xf32> to vector<8x16xf32>
    %18 = arith.addf %14, %17 : vector<8x16xf32>
    %c4 = arith.constant 4 : index
    %c0_17 = arith.constant 0 : index
    %c0_18 = arith.constant 0 : index
    %19 = vector.load %arg3[%c4, %c0_17, %c0_18] : memref<6x32x16xf32, #tpu.memory_space<vmem>>, vector<1x32x16xf32>
    %20 = vector.shape_cast %19 : vector<1x32x16xf32> to vector<32x16xf32>
    %cst_19 = arith.constant dense<0.000000e+00> : vector<8x16xf32>
    %21 = tpu.matmul %1, %20, %cst_19 {dimension_numbers = #tpu.dot_dimension_numbers<[1], [0], [0], [1], [0, 0, 1, 1], [], []>} : vector<8x32xf32>, vector<32x16xf32>, vector<8x16xf32> -> vector<8x16xf32>
    %c4_20 = arith.constant 4 : index
    %c0_21 = arith.constant 0 : index
    %c0_22 = arith.constant 0 : index
    %22 = vector.load %arg4[%c4_20, %c0_21, %c0_22] : memref<6x1x16xf32, #tpu.memory_space<vmem>>, vector<1x1x16xf32>
    %23 = vector.shape_cast %22 : vector<1x1x16xf32> to vector<1x16xf32>
    %24 = vector.broadcast %23 : vector<1x16xf32> to vector<8x16xf32>
    %25 = arith.addf %21, %24 : vector<8x16xf32>
    %cst_23 = arith.constant dense<0.000000e+00> : vector<8x8xf32>
    %26 = tpu.matmul %11, %18, %cst_23 {dimension_numbers = #tpu.dot_dimension_numbers<[1], [1], [0], [0], [0, 0, 1, 0], [], []>} : vector<8x16xf32>, vector<8x16xf32>, vector<8x8xf32> -> vector<8x8xf32>
    %cst_24 = arith.constant 2.500000e-01 : f32
    %27 = vector.broadcast %cst_24 : f32 to vector<8x8xf32>
    %28 = arith.mulf %26, %27 : vector<8x8xf32>
    %29 = vector.broadcast %4 : vector<1x8xf32> to vector<8x8xf32>
    %30 = arith.addf %28, %29 : vector<8x8xf32>
    %cst_25 = arith.constant dense<0xFF800000> : vector<8xf32>
    %31 = vector.multi_reduction <maximumf>, %30, %cst_25 [1] : vector<8x8xf32> to vector<8xf32>
    %32 = vector.shape_cast %31 : vector<8xf32> to vector<8x1xf32>
    %33 = vector.broadcast %32 : vector<8x1xf32> to vector<8x8xf32>
    %34 = arith.subf %30, %33 : vector<8x8xf32>
    %35 = math.exp %34 : vector<8x8xf32>
    %cst_26 = arith.constant dense<0.000000e+00> : vector<8xf32>
    %36 = vector.multi_reduction <add>, %35, %cst_26 [1] : vector<8x8xf32> to vector<8xf32>
    %37 = vector.shape_cast %36 : vector<8xf32> to vector<8x1xf32>
    %38 = tpu.reciprocal %37 {approx = true} : vector<8x1xf32> -> vector<8x1xf32>
    %39 = vector.broadcast %38 : vector<8x1xf32> to vector<8x8xf32>
    %40 = arith.mulf %35, %39 : vector<8x8xf32>
    %cst_27 = arith.constant dense<0.000000e+00> : vector<8x16xf32>
    %41 = tpu.matmul %40, %25, %cst_27 {dimension_numbers = #tpu.dot_dimension_numbers<[1], [0], [0], [1], [0, 0, 1, 1], [], []>} : vector<8x8xf32>, vector<8x16xf32>, vector<8x16xf32> -> vector<8x16xf32>
    %c0_28 = arith.constant 0 : index
    %c0_29 = arith.constant 0 : index
    %c0_30 = arith.constant 0 : index
    %42 = vector.load %arg5[%c0_28, %c0_29, %c0_30] : memref<2x16x32xf32, #tpu.memory_space<vmem>>, vector<1x16x32xf32>
    %43 = vector.shape_cast %42 : vector<1x16x32xf32> to vector<16x32xf32>
    %cst_31 = arith.constant dense<0.000000e+00> : vector<8x32xf32>
    %44 = tpu.matmul %41, %43, %cst_31 {dimension_numbers = #tpu.dot_dimension_numbers<[1], [0], [0], [1], [0, 0, 1, 1], [], []>} : vector<8x16xf32>, vector<16x32xf32>, vector<8x32xf32> -> vector<8x32xf32>
    %c1 = arith.constant 1 : index
    %c0_32 = arith.constant 0 : index
    %c0_33 = arith.constant 0 : index
    %45 = vector.load %arg3[%c1, %c0_32, %c0_33] : memref<6x32x16xf32, #tpu.memory_space<vmem>>, vector<1x32x16xf32>
    %46 = vector.shape_cast %45 : vector<1x32x16xf32> to vector<32x16xf32>
    %cst_34 = arith.constant dense<0.000000e+00> : vector<8x16xf32>
    %47 = tpu.matmul %1, %46, %cst_34 {dimension_numbers = #tpu.dot_dimension_numbers<[1], [0], [0], [1], [0, 0, 1, 1], [], []>} : vector<8x32xf32>, vector<32x16xf32>, vector<8x16xf32> -> vector<8x16xf32>
    %c1_35 = arith.constant 1 : index
    %c0_36 = arith.constant 0 : index
    %c0_37 = arith.constant 0 : index
    %48 = vector.load %arg4[%c1_35, %c0_36, %c0_37] : memref<6x1x16xf32, #tpu.memory_space<vmem>>, vector<1x1x16xf32>
    %49 = vector.shape_cast %48 : vector<1x1x16xf32> to vector<1x16xf32>
    %50 = vector.broadcast %49 : vector<1x16xf32> to vector<8x16xf32>
    %51 = arith.addf %47, %50 : vector<8x16xf32>
    %c3 = arith.constant 3 : index
    %c0_38 = arith.constant 0 : index
    %c0_39 = arith.constant 0 : index
    %52 = vector.load %arg3[%c3, %c0_38, %c0_39] : memref<6x32x16xf32, #tpu.memory_space<vmem>>, vector<1x32x16xf32>
    %53 = vector.shape_cast %52 : vector<1x32x16xf32> to vector<32x16xf32>
    %cst_40 = arith.constant dense<0.000000e+00> : vector<8x16xf32>
    %54 = tpu.matmul %1, %53, %cst_40 {dimension_numbers = #tpu.dot_dimension_numbers<[1], [0], [0], [1], [0, 0, 1, 1], [], []>} : vector<8x32xf32>, vector<32x16xf32>, vector<8x16xf32> -> vector<8x16xf32>
    %c3_41 = arith.constant 3 : index
    %c0_42 = arith.constant 0 : index
    %c0_43 = arith.constant 0 : index
    %55 = vector.load %arg4[%c3_41, %c0_42, %c0_43] : memref<6x1x16xf32, #tpu.memory_space<vmem>>, vector<1x1x16xf32>
    %56 = vector.shape_cast %55 : vector<1x1x16xf32> to vector<1x16xf32>
    %57 = vector.broadcast %56 : vector<1x16xf32> to vector<8x16xf32>
    %58 = arith.addf %54, %57 : vector<8x16xf32>
    %c5 = arith.constant 5 : index
    %c0_44 = arith.constant 0 : index
    %c0_45 = arith.constant 0 : index
    %59 = vector.load %arg3[%c5, %c0_44, %c0_45] : memref<6x32x16xf32, #tpu.memory_space<vmem>>, vector<1x32x16xf32>
    %60 = vector.shape_cast %59 : vector<1x32x16xf32> to vector<32x16xf32>
    %cst_46 = arith.constant dense<0.000000e+00> : vector<8x16xf32>
    %61 = tpu.matmul %1, %60, %cst_46 {dimension_numbers = #tpu.dot_dimension_numbers<[1], [0], [0], [1], [0, 0, 1, 1], [], []>} : vector<8x32xf32>, vector<32x16xf32>, vector<8x16xf32> -> vector<8x16xf32>
    %c5_47 = arith.constant 5 : index
    %c0_48 = arith.constant 0 : index
    %c0_49 = arith.constant 0 : index
    %62 = vector.load %arg4[%c5_47, %c0_48, %c0_49] : memref<6x1x16xf32, #tpu.memory_space<vmem>>, vector<1x1x16xf32>
    %63 = vector.shape_cast %62 : vector<1x1x16xf32> to vector<1x16xf32>
    %64 = vector.broadcast %63 : vector<1x16xf32> to vector<8x16xf32>
    %65 = arith.addf %61, %64 : vector<8x16xf32>
    %cst_50 = arith.constant dense<0.000000e+00> : vector<8x8xf32>
    %66 = tpu.matmul %51, %58, %cst_50 {dimension_numbers = #tpu.dot_dimension_numbers<[1], [1], [0], [0], [0, 0, 1, 0], [], []>} : vector<8x16xf32>, vector<8x16xf32>, vector<8x8xf32> -> vector<8x8xf32>
    %cst_51 = arith.constant 2.500000e-01 : f32
    %67 = vector.broadcast %cst_51 : f32 to vector<8x8xf32>
    %68 = arith.mulf %66, %67 : vector<8x8xf32>
    %69 = vector.broadcast %4 : vector<1x8xf32> to vector<8x8xf32>
    %70 = arith.addf %68, %69 : vector<8x8xf32>
    %cst_52 = arith.constant dense<0xFF800000> : vector<8xf32>
    %71 = vector.multi_reduction <maximumf>, %70, %cst_52 [1] : vector<8x8xf32> to vector<8xf32>
    %72 = vector.shape_cast %71 : vector<8xf32> to vector<8x1xf32>
    %73 = vector.broadcast %72 : vector<8x1xf32> to vector<8x8xf32>
    %74 = arith.subf %70, %73 : vector<8x8xf32>
    %75 = math.exp %74 : vector<8x8xf32>
    %cst_53 = arith.constant dense<0.000000e+00> : vector<8xf32>
    %76 = vector.multi_reduction <add>, %75, %cst_53 [1] : vector<8x8xf32> to vector<8xf32>
    %77 = vector.shape_cast %76 : vector<8xf32> to vector<8x1xf32>
    %78 = tpu.reciprocal %77 {approx = true} : vector<8x1xf32> -> vector<8x1xf32>
    %79 = vector.broadcast %78 : vector<8x1xf32> to vector<8x8xf32>
    %80 = arith.mulf %75, %79 : vector<8x8xf32>
    %cst_54 = arith.constant dense<0.000000e+00> : vector<8x16xf32>
    %81 = tpu.matmul %80, %65, %cst_54 {dimension_numbers = #tpu.dot_dimension_numbers<[1], [0], [0], [1], [0, 0, 1, 1], [], []>} : vector<8x8xf32>, vector<8x16xf32>, vector<8x16xf32> -> vector<8x16xf32>
    %c1_55 = arith.constant 1 : index
    %c0_56 = arith.constant 0 : index
    %c0_57 = arith.constant 0 : index
    %82 = vector.load %arg5[%c1_55, %c0_56, %c0_57] : memref<2x16x32xf32, #tpu.memory_space<vmem>>, vector<1x16x32xf32>
    %83 = vector.shape_cast %82 : vector<1x16x32xf32> to vector<16x32xf32>
    %cst_58 = arith.constant dense<0.000000e+00> : vector<8x32xf32>
    %84 = tpu.matmul %81, %83, %cst_58 {dimension_numbers = #tpu.dot_dimension_numbers<[1], [0], [0], [1], [0, 0, 1, 1], [], []>} : vector<8x16xf32>, vector<16x32xf32>, vector<8x32xf32> -> vector<8x32xf32>
    %85 = arith.addf %44, %84 : vector<8x32xf32>
    %c0_59 = arith.constant 0 : index
    %c0_60 = arith.constant 0 : index
    %86 = vector.load %arg9[%c0_59, %c0_60] : memref<6x32xf32, #tpu.memory_space<vmem>>, vector<1x32xf32>
    %87 = vector.broadcast %86 : vector<1x32xf32> to vector<8x32xf32>
    %88 = arith.addf %85, %87 : vector<8x32xf32>
    %89 = arith.addf %88, %1 : vector<8x32xf32>
    %c1_61 = arith.constant 1 : index
    %c0_62 = arith.constant 0 : index
    %90 = vector.load %arg9[%c1_61, %c0_62] : memref<6x32xf32, #tpu.memory_space<vmem>>, vector<1x32xf32>
    %c2_63 = arith.constant 2 : index
    %c0_64 = arith.constant 0 : index
    %91 = vector.load %arg9[%c2_63, %c0_64] : memref<6x32xf32, #tpu.memory_space<vmem>>, vector<1x32xf32>
    %cst_65 = arith.constant dense<0.000000e+00> : vector<8xf32>
    %92 = vector.multi_reduction <add>, %89, %cst_65 [1] : vector<8x32xf32> to vector<8xf32>
    %93 = vector.shape_cast %92 : vector<8xf32> to vector<8x1xf32>
    %cst_66 = arith.constant 3.200000e+01 : f32
    %94 = vector.broadcast %cst_66 : f32 to vector<8x1xf32>
    %95 = arith.divf %93, %94 : vector<8x1xf32>
    %96 = vector.broadcast %95 : vector<8x1xf32> to vector<8x32xf32>
    %97 = arith.subf %89, %96 : vector<8x32xf32>
    %98 = arith.mulf %97, %97 : vector<8x32xf32>
    %cst_67 = arith.constant dense<0.000000e+00> : vector<8xf32>
    %99 = vector.multi_reduction <add>, %98, %cst_67 [1] : vector<8x32xf32> to vector<8xf32>
    %100 = vector.shape_cast %99 : vector<8xf32> to vector<8x1xf32>
    %cst_68 = arith.constant 3.200000e+01 : f32
    %101 = vector.broadcast %cst_68 : f32 to vector<8x1xf32>
    %102 = arith.divf %100, %101 : vector<8x1xf32>
    %103 = vector.broadcast %95 : vector<8x1xf32> to vector<8x32xf32>
    %104 = arith.subf %89, %103 : vector<8x32xf32>
    %cst_69 = arith.constant 9.99999974E-6 : f32
    %105 = vector.broadcast %cst_69 : f32 to vector<8x1xf32>
    %106 = arith.addf %102, %105 : vector<8x1xf32>
    %107 = math.rsqrt %106 : vector<8x1xf32>
    %108 = vector.broadcast %107 : vector<8x1xf32> to vector<8x32xf32>
    %109 = arith.mulf %104, %108 : vector<8x32xf32>
    %110 = vector.broadcast %90 : vector<1x32xf32> to vector<8x32xf32>
    %111 = arith.mulf %109, %110 : vector<8x32xf32>
    %112 = vector.broadcast %91 : vector<1x32xf32> to vector<8x32xf32>
    %113 = arith.addf %111, %112 : vector<8x32xf32>
    %c0_70 = arith.constant 0 : index
    %c0_71 = arith.constant 0 : index
    %114 = vector.load %arg6[%c0_70, %c0_71] : memref<32x64xf32, #tpu.memory_space<vmem>>, vector<32x64xf32>
    %cst_72 = arith.constant dense<0.000000e+00> : vector<8x64xf32>
    %115 = tpu.matmul %113, %114, %cst_72 {dimension_numbers = #tpu.dot_dimension_numbers<[1], [0], [0], [1], [0, 0, 1, 1], [], []>} : vector<8x32xf32>, vector<32x64xf32>, vector<8x64xf32> -> vector<8x64xf32>
    %c0_73 = arith.constant 0 : index
    %c0_74 = arith.constant 0 : index
    %116 = vector.load %arg7[%c0_73, %c0_74] : memref<1x64xf32, #tpu.memory_space<vmem>>, vector<1x64xf32>
    %117 = vector.broadcast %116 : vector<1x64xf32> to vector<8x64xf32>
    %118 = arith.addf %115, %117 : vector<8x64xf32>
    %cst_75 = arith.constant 0.000000e+00 : f32
    %119 = vector.broadcast %cst_75 : f32 to vector<8x64xf32>
    %120 = arith.maximumf %118, %119 : vector<8x64xf32>
    %c0_76 = arith.constant 0 : index
    %c0_77 = arith.constant 0 : index
    %121 = vector.load %arg8[%c0_76, %c0_77] : memref<64x32xf32, #tpu.memory_space<vmem>>, vector<64x32xf32>
    %cst_78 = arith.constant dense<0.000000e+00> : vector<8x32xf32>
    %122 = tpu.matmul %120, %121, %cst_78 {dimension_numbers = #tpu.dot_dimension_numbers<[1], [0], [0], [1], [0, 0, 1, 1], [], []>} : vector<8x64xf32>, vector<64x32xf32>, vector<8x32xf32> -> vector<8x32xf32>
    %c3_79 = arith.constant 3 : index
    %c0_80 = arith.constant 0 : index
    %123 = vector.load %arg9[%c3_79, %c0_80] : memref<6x32xf32, #tpu.memory_space<vmem>>, vector<1x32xf32>
    %124 = vector.broadcast %123 : vector<1x32xf32> to vector<8x32xf32>
    %125 = arith.addf %122, %124 : vector<8x32xf32>
    %126 = arith.addf %125, %113 : vector<8x32xf32>
    %c4_81 = arith.constant 4 : index
    %c0_82 = arith.constant 0 : index
    %127 = vector.load %arg9[%c4_81, %c0_82] : memref<6x32xf32, #tpu.memory_space<vmem>>, vector<1x32xf32>
    %c5_83 = arith.constant 5 : index
    %c0_84 = arith.constant 0 : index
    %128 = vector.load %arg9[%c5_83, %c0_84] : memref<6x32xf32, #tpu.memory_space<vmem>>, vector<1x32xf32>
    %cst_85 = arith.constant dense<0.000000e+00> : vector<8xf32>
    %129 = vector.multi_reduction <add>, %126, %cst_85 [1] : vector<8x32xf32> to vector<8xf32>
    %130 = vector.shape_cast %129 : vector<8xf32> to vector<8x1xf32>
    %cst_86 = arith.constant 3.200000e+01 : f32
    %131 = vector.broadcast %cst_86 : f32 to vector<8x1xf32>
    %132 = arith.divf %130, %131 : vector<8x1xf32>
    %133 = vector.broadcast %132 : vector<8x1xf32> to vector<8x32xf32>
    %134 = arith.subf %126, %133 : vector<8x32xf32>
    %135 = arith.mulf %134, %134 : vector<8x32xf32>
    %cst_87 = arith.constant dense<0.000000e+00> : vector<8xf32>
    %136 = vector.multi_reduction <add>, %135, %cst_87 [1] : vector<8x32xf32> to vector<8xf32>
    %137 = vector.shape_cast %136 : vector<8xf32> to vector<8x1xf32>
    %cst_88 = arith.constant 3.200000e+01 : f32
    %138 = vector.broadcast %cst_88 : f32 to vector<8x1xf32>
    %139 = arith.divf %137, %138 : vector<8x1xf32>
    %140 = vector.broadcast %132 : vector<8x1xf32> to vector<8x32xf32>
    %141 = arith.subf %126, %140 : vector<8x32xf32>
    %cst_89 = arith.constant 9.99999974E-6 : f32
    %142 = vector.broadcast %cst_89 : f32 to vector<8x1xf32>
    %143 = arith.addf %139, %142 : vector<8x1xf32>
    %144 = math.rsqrt %143 : vector<8x1xf32>
    %145 = vector.broadcast %144 : vector<8x1xf32> to vector<8x32xf32>
    %146 = arith.mulf %141, %145 : vector<8x32xf32>
    %147 = vector.broadcast %127 : vector<1x32xf32> to vector<8x32xf32>
    %148 = arith.mulf %146, %147 : vector<8x32xf32>
    %149 = vector.broadcast %128 : vector<1x32xf32> to vector<8x32xf32>
    %150 = arith.addf %148, %149 : vector<8x32xf32>
    %151 = arith.addf %150, %1 : vector<8x32xf32>
    %c0_90 = arith.constant 0 : index
    %c0_91 = arith.constant 0 : index
    %152 = vector.load %arg11[%c0_90, %c0_91] : memref<8x32xf32, #tpu.memory_space<vmem>>, vector<8x32xf32>
    tpu.vector_store %arg11[%c0_90, %c0_91], %151 {strides = array<i32>} : memref<8x32xf32, #tpu.memory_space<vmem>>, vector<8x32xf32>,
    %c0_92 = arith.constant 0 : index
    %c0_93 = arith.constant 0 : index
    %153 = tpu.strided_load %arg11[%c0_92, %c0_93] {strides = array<i32: 2, 1>} : memref<8x32xf32, #tpu.memory_space<vmem>>, vector<4x32xf32>
    %c1_94 = arith.constant 1 : index
    %c0_95 = arith.constant 0 : index
    %154 = tpu.strided_load %arg11[%c1_94, %c0_95] {strides = array<i32: 2, 1>} : memref<8x32xf32, #tpu.memory_space<vmem>>, vector<4x32xf32>
    %155 = arith.maximumf %153, %154 : vector<4x32xf32>
    %156 = vector.extract_strided_slice %3 {offsets = [1, 0], sizes = [1, 4], strides = [1, 1]} : vector<2x8xf32> to vector<1x4xf32>
    %c0_i32_96 = arith.constant 0 : i32
    %c0_97 = arith.constant 0 : index
    %c0_98 = arith.constant 0 : index
    %c0_99 = arith.constant 0 : index
    %157 = vector.load %arg3[%c0_97, %c0_98, %c0_99] : memref<6x32x16xf32, #tpu.memory_space<vmem>>, vector<1x32x16xf32>
    %158 = vector.shape_cast %157 : vector<1x32x16xf32> to vector<32x16xf32>
    %cst_100 = arith.constant dense<0.000000e+00> : vector<4x16xf32>
    %159 = tpu.matmul %155, %158, %cst_100 {dimension_numbers = #tpu.dot_dimension_numbers<[1], [0], [0], [1], [0, 0, 1, 1], [], []>} : vector<4x32xf32>, vector<32x16xf32>, vector<4x16xf32> -> vector<4x16xf32>
    %c0_101 = arith.constant 0 : index
    %c0_102 = arith.constant 0 : index
    %c0_103 = arith.constant 0 : index
    %160 = vector.load %arg4[%c0_101, %c0_102, %c0_103] : memref<6x1x16xf32, #tpu.memory_space<vmem>>, vector<1x1x16xf32>
    %161 = vector.shape_cast %160 : vector<1x1x16xf32> to vector<1x16xf32>
    %162 = vector.broadcast %161 : vector<1x16xf32> to vector<4x16xf32>
    %163 = arith.addf %159, %162 : vector<4x16xf32>
    %c2_104 = arith.constant 2 : index
    %c0_105 = arith.constant 0 : index
    %c0_106 = arith.constant 0 : index
    %164 = vector.load %arg3[%c2_104, %c0_105, %c0_106] : memref<6x32x16xf32, #tpu.memory_space<vmem>>, vector<1x32x16xf32>
    %165 = vector.shape_cast %164 : vector<1x32x16xf32> to vector<32x16xf32>
    %cst_107 = arith.constant dense<0.000000e+00> : vector<4x16xf32>
    %166 = tpu.matmul %155, %165, %cst_107 {dimension_numbers = #tpu.dot_dimension_numbers<[1], [0], [0], [1], [0, 0, 1, 1], [], []>} : vector<4x32xf32>, vector<32x16xf32>, vector<4x16xf32> -> vector<4x16xf32>
    %c2_108 = arith.constant 2 : index
    %c0_109 = arith.constant 0 : index
    %c0_110 = arith.constant 0 : index
    %167 = vector.load %arg4[%c2_108, %c0_109, %c0_110] : memref<6x1x16xf32, #tpu.memory_space<vmem>>, vector<1x1x16xf32>
    %168 = vector.shape_cast %167 : vector<1x1x16xf32> to vector<1x16xf32>
    %169 = vector.broadcast %168 : vector<1x16xf32> to vector<4x16xf32>
    %170 = arith.addf %166, %169 : vector<4x16xf32>
    %c4_111 = arith.constant 4 : index
    %c0_112 = arith.constant 0 : index
    %c0_113 = arith.constant 0 : index
    %171 = vector.load %arg3[%c4_111, %c0_112, %c0_113] : memref<6x32x16xf32, #tpu.memory_space<vmem>>, vector<1x32x16xf32>
    %172 = vector.shape_cast %171 : vector<1x32x16xf32> to vector<32x16xf32>
    %cst_114 = arith.constant dense<0.000000e+00> : vector<4x16xf32>
    %173 = tpu.matmul %155, %172, %cst_114 {dimension_numbers = #tpu.dot_dimension_numbers<[1], [0], [0], [1], [0, 0, 1, 1], [], []>} : vector<4x32xf32>, vector<32x16xf32>, vector<4x16xf32> -> vector<4x16xf32>
    %c4_115 = arith.constant 4 : index
    %c0_116 = arith.constant 0 : index
    %c0_117 = arith.constant 0 : index
    %174 = vector.load %arg4[%c4_115, %c0_116, %c0_117] : memref<6x1x16xf32, #tpu.memory_space<vmem>>, vector<1x1x16xf32>
    %175 = vector.shape_cast %174 : vector<1x1x16xf32> to vector<1x16xf32>
    %176 = vector.broadcast %175 : vector<1x16xf32> to vector<4x16xf32>
    %177 = arith.addf %173, %176 : vector<4x16xf32>
    %cst_118 = arith.constant dense<0.000000e+00> : vector<4x4xf32>
    %178 = tpu.matmul %163, %170, %cst_118 {dimension_numbers = #tpu.dot_dimension_numbers<[1], [1], [0], [0], [0, 0, 1, 0], [], []>} : vector<4x16xf32>, vector<4x16xf32>, vector<4x4xf32> -> vector<4x4xf32>
    %cst_119 = arith.constant 2.500000e-01 : f32
    %179 = vector.broadcast %cst_119 : f32 to vector<4x4xf32>
    %180 = arith.mulf %178, %179 : vector<4x4xf32>
    %181 = vector.broadcast %156 : vector<1x4xf32> to vector<4x4xf32>
    %182 = arith.addf %180, %181 : vector<4x4xf32>
    %cst_120 = arith.constant dense<0xFF800000> : vector<4xf32>
    %183 = vector.multi_reduction <maximumf>, %182, %cst_120 [1] : vector<4x4xf32> to vector<4xf32>
    %184 = vector.shape_cast %183 : vector<4xf32> to vector<4x1xf32>
    %185 = vector.broadcast %184 : vector<4x1xf32> to vector<4x4xf32>
    %186 = arith.subf %182, %185 : vector<4x4xf32>
    %187 = math.exp %186 : vector<4x4xf32>
    %cst_121 = arith.constant dense<0.000000e+00> : vector<4xf32>
    %188 = vector.multi_reduction <add>, %187, %cst_121 [1] : vector<4x4xf32> to vector<4xf32>
    %189 = vector.shape_cast %188 : vector<4xf32> to vector<4x1xf32>
    %190 = tpu.reciprocal %189 {approx = true} : vector<4x1xf32> -> vector<4x1xf32>
    %191 = vector.broadcast %190 : vector<4x1xf32> to vector<4x4xf32>
    %192 = arith.mulf %187, %191 : vector<4x4xf32>
    %cst_122 = arith.constant dense<0.000000e+00> : vector<4x16xf32>
    %193 = tpu.matmul %192, %177, %cst_122 {dimension_numbers = #tpu.dot_dimension_numbers<[1], [0], [0], [1], [0, 0, 1, 1], [], []>} : vector<4x4xf32>, vector<4x16xf32>, vector<4x16xf32> -> vector<4x16xf32>
    %c0_123 = arith.constant 0 : index
    %c0_124 = arith.constant 0 : index
    %c0_125 = arith.constant 0 : index
    %194 = vector.load %arg5[%c0_123, %c0_124, %c0_125] : memref<2x16x32xf32, #tpu.memory_space<vmem>>, vector<1x16x32xf32>
    %195 = vector.shape_cast %194 : vector<1x16x32xf32> to vector<16x32xf32>
    %cst_126 = arith.constant dense<0.000000e+00> : vector<4x32xf32>
    %196 = tpu.matmul %193, %195, %cst_126 {dimension_numbers = #tpu.dot_dimension_numbers<[1], [0], [0], [1], [0, 0, 1, 1], [], []>} : vector<4x16xf32>, vector<16x32xf32>, vector<4x32xf32> -> vector<4x32xf32>
    %c1_127 = arith.constant 1 : index
    %c0_128 = arith.constant 0 : index
    %c0_129 = arith.constant 0 : index
    %197 = vector.load %arg3[%c1_127, %c0_128, %c0_129] : memref<6x32x16xf32, #tpu.memory_space<vmem>>, vector<1x32x16xf32>
    %198 = vector.shape_cast %197 : vector<1x32x16xf32> to vector<32x16xf32>
    %cst_130 = arith.constant dense<0.000000e+00> : vector<4x16xf32>
    %199 = tpu.matmul %155, %198, %cst_130 {dimension_numbers = #tpu.dot_dimension_numbers<[1], [0], [0], [1], [0, 0, 1, 1], [], []>} : vector<4x32xf32>, vector<32x16xf32>, vector<4x16xf32> -> vector<4x16xf32>
    %c1_131 = arith.constant 1 : index
    %c0_132 = arith.constant 0 : index
    %c0_133 = arith.constant 0 : index
    %200 = vector.load %arg4[%c1_131, %c0_132, %c0_133] : memref<6x1x16xf32, #tpu.memory_space<vmem>>, vector<1x1x16xf32>
    %201 = vector.shape_cast %200 : vector<1x1x16xf32> to vector<1x16xf32>
    %202 = vector.broadcast %201 : vector<1x16xf32> to vector<4x16xf32>
    %203 = arith.addf %199, %202 : vector<4x16xf32>
    %c3_134 = arith.constant 3 : index
    %c0_135 = arith.constant 0 : index
    %c0_136 = arith.constant 0 : index
    %204 = vector.load %arg3[%c3_134, %c0_135, %c0_136] : memref<6x32x16xf32, #tpu.memory_space<vmem>>, vector<1x32x16xf32>
    %205 = vector.shape_cast %204 : vector<1x32x16xf32> to vector<32x16xf32>
    %cst_137 = arith.constant dense<0.000000e+00> : vector<4x16xf32>
    %206 = tpu.matmul %155, %205, %cst_137 {dimension_numbers = #tpu.dot_dimension_numbers<[1], [0], [0], [1], [0, 0, 1, 1], [], []>} : vector<4x32xf32>, vector<32x16xf32>, vector<4x16xf32> -> vector<4x16xf32>
    %c3_138 = arith.constant 3 : index
    %c0_139 = arith.constant 0 : index
    %c0_140 = arith.constant 0 : index
    %207 = vector.load %arg4[%c3_138, %c0_139, %c0_140] : memref<6x1x16xf32, #tpu.memory_space<vmem>>, vector<1x1x16xf32>
    %208 = vector.shape_cast %207 : vector<1x1x16xf32> to vector<1x16xf32>
    %209 = vector.broadcast %208 : vector<1x16xf32> to vector<4x16xf32>
    %210 = arith.addf %206, %209 : vector<4x16xf32>
    %c5_141 = arith.constant 5 : index
    %c0_142 = arith.constant 0 : index
    %c0_143 = arith.constant 0 : index
    %211 = vector.load %arg3[%c5_141, %c0_142, %c0_143] : memref<6x32x16xf32, #tpu.memory_space<vmem>>, vector<1x32x16xf32>
    %212 = vector.shape_cast %211 : vector<1x32x16xf32> to vector<32x16xf32>
    %cst_144 = arith.constant dense<0.000000e+00> : vector<4x16xf32>
    %213 = tpu.matmul %155, %212, %cst_144 {dimension_numbers = #tpu.dot_dimension_numbers<[1], [0], [0], [1], [0, 0, 1, 1], [], []>} : vector<4x32xf32>, vector<32x16xf32>, vector<4x16xf32> -> vector<4x16xf32>
    %c5_145 = arith.constant 5 : index
    %c0_146 = arith.constant 0 : index
    %c0_147 = arith.constant 0 : index
    %214 = vector.load %arg4[%c5_145, %c0_146, %c0_147] : memref<6x1x16xf32, #tpu.memory_space<vmem>>, vector<1x1x16xf32>
    %215 = vector.shape_cast %214 : vector<1x1x16xf32> to vector<1x16xf32>
    %216 = vector.broadcast %215 : vector<1x16xf32> to vector<4x16xf32>
    %217 = arith.addf %213, %216 : vector<4x16xf32>
    %cst_148 = arith.constant dense<0.000000e+00> : vector<4x4xf32>
    %218 = tpu.matmul %203, %210, %cst_148 {dimension_numbers = #tpu.dot_dimension_numbers<[1], [1], [0], [0], [0, 0, 1, 0], [], []>} : vector<4x16xf32>, vector<4x16xf32>, vector<4x4xf32> -> vector<4x4xf32>
    %cst_149 = arith.constant 2.500000e-01 : f32
    %219 = vector.broadcast %cst_149 : f32 to vector<4x4xf32>
    %220 = arith.mulf %218, %219 : vector<4x4xf32>
    %221 = vector.broadcast %156 : vector<1x4xf32> to vector<4x4xf32>
    %222 = arith.addf %220, %221 : vector<4x4xf32>
    %cst_150 = arith.constant dense<0xFF800000> : vector<4xf32>
    %223 = vector.multi_reduction <maximumf>, %222, %cst_150 [1] : vector<4x4xf32> to vector<4xf32>
    %224 = vector.shape_cast %223 : vector<4xf32> to vector<4x1xf32>
    %225 = vector.broadcast %224 : vector<4x1xf32> to vector<4x4xf32>
    %226 = arith.subf %222, %225 : vector<4x4xf32>
    %227 = math.exp %226 : vector<4x4xf32>
    %cst_151 = arith.constant dense<0.000000e+00> : vector<4xf32>
    %228 = vector.multi_reduction <add>, %227, %cst_151 [1] : vector<4x4xf32> to vector<4xf32>
    %229 = vector.shape_cast %228 : vector<4xf32> to vector<4x1xf32>
    %230 = tpu.reciprocal %229 {approx = true} : vector<4x1xf32> -> vector<4x1xf32>
    %231 = vector.broadcast %230 : vector<4x1xf32> to vector<4x4xf32>
    %232 = arith.mulf %227, %231 : vector<4x4xf32>
    %cst_152 = arith.constant dense<0.000000e+00> : vector<4x16xf32>
    %233 = tpu.matmul %232, %217, %cst_152 {dimension_numbers = #tpu.dot_dimension_numbers<[1], [0], [0], [1], [0, 0, 1, 1], [], []>} : vector<4x4xf32>, vector<4x16xf32>, vector<4x16xf32> -> vector<4x16xf32>
    %c1_153 = arith.constant 1 : index
    %c0_154 = arith.constant 0 : index
    %c0_155 = arith.constant 0 : index
    %234 = vector.load %arg5[%c1_153, %c0_154, %c0_155] : memref<2x16x32xf32, #tpu.memory_space<vmem>>, vector<1x16x32xf32>
    %235 = vector.shape_cast %234 : vector<1x16x32xf32> to vector<16x32xf32>
    %cst_156 = arith.constant dense<0.000000e+00> : vector<4x32xf32>
    %236 = tpu.matmul %233, %235, %cst_156 {dimension_numbers = #tpu.dot_dimension_numbers<[1], [0], [0], [1], [0, 0, 1, 1], [], []>} : vector<4x16xf32>, vector<16x32xf32>, vector<4x32xf32> -> vector<4x32xf32>
    %237 = arith.addf %196, %236 : vector<4x32xf32>
    %c0_157 = arith.constant 0 : index
    %c0_158 = arith.constant 0 : index
    %238 = vector.load %arg9[%c0_157, %c0_158] : memref<6x32xf32, #tpu.memory_space<vmem>>, vector<1x32xf32>
    %239 = vector.broadcast %238 : vector<1x32xf32> to vector<4x32xf32>
    %240 = arith.addf %237, %239 : vector<4x32xf32>
    %241 = arith.addf %240, %155 : vector<4x32xf32>
    %c1_159 = arith.constant 1 : index
    %c0_160 = arith.constant 0 : index
    %242 = vector.load %arg9[%c1_159, %c0_160] : memref<6x32xf32, #tpu.memory_space<vmem>>, vector<1x32xf32>
    %c2_161 = arith.constant 2 : index
    %c0_162 = arith.constant 0 : index
    %243 = vector.load %arg9[%c2_161, %c0_162] : memref<6x32xf32, #tpu.memory_space<vmem>>, vector<1x32xf32>
    %cst_163 = arith.constant dense<0.000000e+00> : vector<4xf32>
    %244 = vector.multi_reduction <add>, %241, %cst_163 [1] : vector<4x32xf32> to vector<4xf32>
    %245 = vector.shape_cast %244 : vector<4xf32> to vector<4x1xf32>
    %cst_164 = arith.constant 3.200000e+01 : f32
    %246 = vector.broadcast %cst_164 : f32 to vector<4x1xf32>
    %247 = arith.divf %245, %246 : vector<4x1xf32>
    %248 = vector.broadcast %247 : vector<4x1xf32> to vector<4x32xf32>
    %249 = arith.subf %241, %248 : vector<4x32xf32>
    %250 = arith.mulf %249, %249 : vector<4x32xf32>
    %cst_165 = arith.constant dense<0.000000e+00> : vector<4xf32>
    %251 = vector.multi_reduction <add>, %250, %cst_165 [1] : vector<4x32xf32> to vector<4xf32>
    %252 = vector.shape_cast %251 : vector<4xf32> to vector<4x1xf32>
    %cst_166 = arith.constant 3.200000e+01 : f32
    %253 = vector.broadcast %cst_166 : f32 to vector<4x1xf32>
    %254 = arith.divf %252, %253 : vector<4x1xf32>
    %255 = vector.broadcast %247 : vector<4x1xf32> to vector<4x32xf32>
    %256 = arith.subf %241, %255 : vector<4x32xf32>
    %cst_167 = arith.constant 9.99999974E-6 : f32
    %257 = vector.broadcast %cst_167 : f32 to vector<4x1xf32>
    %258 = arith.addf %254, %257 : vector<4x1xf32>
    %259 = math.rsqrt %258 : vector<4x1xf32>
    %260 = vector.broadcast %259 : vector<4x1xf32> to vector<4x32xf32>
    %261 = arith.mulf %256, %260 : vector<4x32xf32>
    %262 = vector.broadcast %242 : vector<1x32xf32> to vector<4x32xf32>
    %263 = arith.mulf %261, %262 : vector<4x32xf32>
    %264 = vector.broadcast %243 : vector<1x32xf32> to vector<4x32xf32>
    %265 = arith.addf %263, %264 : vector<4x32xf32>
    %c0_168 = arith.constant 0 : index
    %c0_169 = arith.constant 0 : index
    %266 = vector.load %arg6[%c0_168, %c0_169] : memref<32x64xf32, #tpu.memory_space<vmem>>, vector<32x64xf32>
    %cst_170 = arith.constant dense<0.000000e+00> : vector<4x64xf32>
    %267 = tpu.matmul %265, %266, %cst_170 {dimension_numbers = #tpu.dot_dimension_numbers<[1], [0], [0], [1], [0, 0, 1, 1], [], []>} : vector<4x32xf32>, vector<32x64xf32>, vector<4x64xf32> -> vector<4x64xf32>
    %c0_171 = arith.constant 0 : index
    %c0_172 = arith.constant 0 : index
    %268 = vector.load %arg7[%c0_171, %c0_172] : memref<1x64xf32, #tpu.memory_space<vmem>>, vector<1x64xf32>
    %269 = vector.broadcast %268 : vector<1x64xf32> to vector<4x64xf32>
    %270 = arith.addf %267, %269 : vector<4x64xf32>
    %cst_173 = arith.constant 0.000000e+00 : f32
    %271 = vector.broadcast %cst_173 : f32 to vector<4x64xf32>
    %272 = arith.maximumf %270, %271 : vector<4x64xf32>
    %c0_174 = arith.constant 0 : index
    %c0_175 = arith.constant 0 : index
    %273 = vector.load %arg8[%c0_174, %c0_175] : memref<64x32xf32, #tpu.memory_space<vmem>>, vector<64x32xf32>
    %cst_176 = arith.constant dense<0.000000e+00> : vector<4x32xf32>
    %274 = tpu.matmul %272, %273, %cst_176 {dimension_numbers = #tpu.dot_dimension_numbers<[1], [0], [0], [1], [0, 0, 1, 1], [], []>} : vector<4x64xf32>, vector<64x32xf32>, vector<4x32xf32> -> vector<4x32xf32>
    %c3_177 = arith.constant 3 : index
    %c0_178 = arith.constant 0 : index
    %275 = vector.load %arg9[%c3_177, %c0_178] : memref<6x32xf32, #tpu.memory_space<vmem>>, vector<1x32xf32>
    %276 = vector.broadcast %275 : vector<1x32xf32> to vector<4x32xf32>
    %277 = arith.addf %274, %276 : vector<4x32xf32>
    %278 = arith.addf %277, %265 : vector<4x32xf32>
    %c4_179 = arith.constant 4 : index
    %c0_180 = arith.constant 0 : index
    %279 = vector.load %arg9[%c4_179, %c0_180] : memref<6x32xf32, #tpu.memory_space<vmem>>, vector<1x32xf32>
    %c5_181 = arith.constant 5 : index
    %c0_182 = arith.constant 0 : index
    %280 = vector.load %arg9[%c5_181, %c0_182] : memref<6x32xf32, #tpu.memory_space<vmem>>, vector<1x32xf32>
    %cst_183 = arith.constant dense<0.000000e+00> : vector<4xf32>
    %281 = vector.multi_reduction <add>, %278, %cst_183 [1] : vector<4x32xf32> to vector<4xf32>
    %282 = vector.shape_cast %281 : vector<4xf32> to vector<4x1xf32>
    %cst_184 = arith.constant 3.200000e+01 : f32
    %283 = vector.broadcast %cst_184 : f32 to vector<4x1xf32>
    %284 = arith.divf %282, %283 : vector<4x1xf32>
    %285 = vector.broadcast %284 : vector<4x1xf32> to vector<4x32xf32>
    %286 = arith.subf %278, %285 : vector<4x32xf32>
    %287 = arith.mulf %286, %286 : vector<4x32xf32>
    %cst_185 = arith.constant dense<0.000000e+00> : vector<4xf32>
    %288 = vector.multi_reduction <add>, %287, %cst_185 [1] : vector<4x32xf32> to vector<4xf32>
    %289 = vector.shape_cast %288 : vector<4xf32> to vector<4x1xf32>
    %cst_186 = arith.constant 3.200000e+01 : f32
    %290 = vector.broadcast %cst_186 : f32 to vector<4x1xf32>
    %291 = arith.divf %289, %290 : vector<4x1xf32>
    %292 = vector.broadcast %284 : vector<4x1xf32> to vector<4x32xf32>
    %293 = arith.subf %278, %292 : vector<4x32xf32>
    %cst_187 = arith.constant 9.99999974E-6 : f32
    %294 = vector.broadcast %cst_187 : f32 to vector<4x1xf32>
    %295 = arith.addf %291, %294 : vector<4x1xf32>
    %296 = math.rsqrt %295 : vector<4x1xf32>
    %297 = vector.broadcast %296 : vector<4x1xf32> to vector<4x32xf32>
    %298 = arith.mulf %293, %297 : vector<4x32xf32>
    %299 = vector.broadcast %279 : vector<1x32xf32> to vector<4x32xf32>
    %300 = arith.mulf %298, %299 : vector<4x32xf32>
    %301 = vector.broadcast %280 : vector<1x32xf32> to vector<4x32xf32>
    %302 = arith.addf %300, %301 : vector<4x32xf32>
    %303 = arith.addf %302, %155 : vector<4x32xf32>
    %c0_188 = arith.constant 0 : index
    %c0_189 = arith.constant 0 : index
    %304 = vector.load %arg11[%c0_188, %c0_189] : memref<8x32xf32, #tpu.memory_space<vmem>>, vector<4x32xf32>
    tpu.vector_store %arg11[%c0_188, %c0_189], %303 {strides = array<i32>} : memref<8x32xf32, #tpu.memory_space<vmem>>, vector<4x32xf32>,
    %c0_190 = arith.constant 0 : index
    %c0_191 = arith.constant 0 : index
    %305 = tpu.strided_load %arg11[%c0_190, %c0_191] {strides = array<i32: 2, 1>} : memref<8x32xf32, #tpu.memory_space<vmem>>, vector<2x32xf32>
    %c1_192 = arith.constant 1 : index
    %c0_193 = arith.constant 0 : index
    %306 = tpu.strided_load %arg11[%c1_192, %c0_193] {strides = array<i32: 2, 1>} : memref<8x32xf32, #tpu.memory_space<vmem>>, vector<2x32xf32>
    %307 = arith.maximumf %305, %306 : vector<2x32xf32>
    %c0_194 = arith.constant 0 : index
    %c0_195 = arith.constant 0 : index
    %c0_196 = arith.constant 0 : index
    %308 = vector.load %arg10[%c0_194, %c0_195, %c0_196] : memref<2x2x32xf32, #tpu.memory_space<vmem>>, vector<1x2x32xf32>
    %309 = vector.shape_cast %308 : vector<1x2x32xf32> to vector<2x32xf32>
    %310 = vector.shape_cast %307 : vector<2x32xf32> to vector<1x2x32xf32>
    tpu.vector_store %arg10[%c0_194, %c0_195, %c0_196], %310 {strides = array<i32>} : memref<2x2x32xf32, #tpu.memory_space<vmem>>, vector<1x2x32xf32>,
    %c1_197 = arith.constant 1 : index
    %c0_198 = arith.constant 0 : index
    %c0_199 = arith.constant 0 : index
    %311 = vector.load %arg1[%c1_197, %c0_198, %c0_199] : memref<2x8x32xf32, #tpu.memory_space<vmem>>, vector<1x8x32xf32>
    %312 = vector.shape_cast %311 : vector<1x8x32xf32> to vector<8x32xf32>
    %c1_200 = arith.constant 1 : index
    %c0_201 = arith.constant 0 : index
    %c0_202 = arith.constant 0 : index
    %313 = vector.load %arg2[%c1_200, %c0_201, %c0_202] : memref<2x2x8xf32, #tpu.memory_space<vmem>>, vector<1x2x8xf32>
    %314 = vector.shape_cast %313 : vector<1x2x8xf32> to vector<2x8xf32>
    %315 = vector.extract_strided_slice %314 {offsets = [0, 0], sizes = [1, 8], strides = [1, 1]} : vector<2x8xf32> to vector<1x8xf32>
    %c0_i32_203 = arith.constant 0 : i32
    %c0_204 = arith.constant 0 : index
    %c0_205 = arith.constant 0 : index
    %c0_206 = arith.constant 0 : index
    %316 = vector.load %arg3[%c0_204, %c0_205, %c0_206] : memref<6x32x16xf32, #tpu.memory_space<vmem>>, vector<1x32x16xf32>
    %317 = vector.shape_cast %316 : vector<1x32x16xf32> to vector<32x16xf32>
    %cst_207 = arith.constant dense<0.000000e+00> : vector<8x16xf32>
    %318 = tpu.matmul %312, %317, %cst_207 {dimension_numbers = #tpu.dot_dimension_numbers<[1], [0], [0], [1], [0, 0, 1, 1], [], []>} : vector<8x32xf32>, vector<32x16xf32>, vector<8x16xf32> -> vector<8x16xf32>
    %c0_208 = arith.constant 0 : index
    %c0_209 = arith.constant 0 : index
    %c0_210 = arith.constant 0 : index
    %319 = vector.load %arg4[%c0_208, %c0_209, %c0_210] : memref<6x1x16xf32, #tpu.memory_space<vmem>>, vector<1x1x16xf32>
    %320 = vector.shape_cast %319 : vector<1x1x16xf32> to vector<1x16xf32>
    %321 = vector.broadcast %320 : vector<1x16xf32> to vector<8x16xf32>
    %322 = arith.addf %318, %321 : vector<8x16xf32>
    %c2_211 = arith.constant 2 : index
    %c0_212 = arith.constant 0 : index
    %c0_213 = arith.constant 0 : index
    %323 = vector.load %arg3[%c2_211, %c0_212, %c0_213] : memref<6x32x16xf32, #tpu.memory_space<vmem>>, vector<1x32x16xf32>
    %324 = vector.shape_cast %323 : vector<1x32x16xf32> to vector<32x16xf32>
    %cst_214 = arith.constant dense<0.000000e+00> : vector<8x16xf32>
    %325 = tpu.matmul %312, %324, %cst_214 {dimension_numbers = #tpu.dot_dimension_numbers<[1], [0], [0], [1], [0, 0, 1, 1], [], []>} : vector<8x32xf32>, vector<32x16xf32>, vector<8x16xf32> -> vector<8x16xf32>
    %c2_215 = arith.constant 2 : index
    %c0_216 = arith.constant 0 : index
    %c0_217 = arith.constant 0 : index
    %326 = vector.load %arg4[%c2_215, %c0_216, %c0_217] : memref<6x1x16xf32, #tpu.memory_space<vmem>>, vector<1x1x16xf32>
    %327 = vector.shape_cast %326 : vector<1x1x16xf32> to vector<1x16xf32>
    %328 = vector.broadcast %327 : vector<1x16xf32> to vector<8x16xf32>
    %329 = arith.addf %325, %328 : vector<8x16xf32>
    %c4_218 = arith.constant 4 : index
    %c0_219 = arith.constant 0 : index
    %c0_220 = arith.constant 0 : index
    %330 = vector.load %arg3[%c4_218, %c0_219, %c0_220] : memref<6x32x16xf32, #tpu.memory_space<vmem>>, vector<1x32x16xf32>
    %331 = vector.shape_cast %330 : vector<1x32x16xf32> to vector<32x16xf32>
    %cst_221 = arith.constant dense<0.000000e+00> : vector<8x16xf32>
    %332 = tpu.matmul %312, %331, %cst_221 {dimension_numbers = #tpu.dot_dimension_numbers<[1], [0], [0], [1], [0, 0, 1, 1], [], []>} : vector<8x32xf32>, vector<32x16xf32>, vector<8x16xf32> -> vector<8x16xf32>
    %c4_222 = arith.constant 4 : index
    %c0_223 = arith.constant 0 : index
    %c0_224 = arith.constant 0 : index
    %333 = vector.load %arg4[%c4_222, %c0_223, %c0_224] : memref<6x1x16xf32, #tpu.memory_space<vmem>>, vector<1x1x16xf32>
    %334 = vector.shape_cast %333 : vector<1x1x16xf32> to vector<1x16xf32>
    %335 = vector.broadcast %334 : vector<1x16xf32> to vector<8x16xf32>
    %336 = arith.addf %332, %335 : vector<8x16xf32>
    %cst_225 = arith.constant dense<0.000000e+00> : vector<8x8xf32>
    %337 = tpu.matmul %322, %329, %cst_225 {dimension_numbers = #tpu.dot_dimension_numbers<[1], [1], [0], [0], [0, 0, 1, 0], [], []>} : vector<8x16xf32>, vector<8x16xf32>, vector<8x8xf32> -> vector<8x8xf32>
    %cst_226 = arith.constant 2.500000e-01 : f32
    %338 = vector.broadcast %cst_226 : f32 to vector<8x8xf32>
    %339 = arith.mulf %337, %338 : vector<8x8xf32>
    %340 = vector.broadcast %315 : vector<1x8xf32> to vector<8x8xf32>
    %341 = arith.addf %339, %340 : vector<8x8xf32>
    %cst_227 = arith.constant dense<0xFF800000> : vector<8xf32>
    %342 = vector.multi_reduction <maximumf>, %341, %cst_227 [1] : vector<8x8xf32> to vector<8xf32>
    %343 = vector.shape_cast %342 : vector<8xf32> to vector<8x1xf32>
    %344 = vector.broadcast %343 : vector<8x1xf32> to vector<8x8xf32>
    %345 = arith.subf %341, %344 : vector<8x8xf32>
    %346 = math.exp %345 : vector<8x8xf32>
    %cst_228 = arith.constant dense<0.000000e+00> : vector<8xf32>
    %347 = vector.multi_reduction <add>, %346, %cst_228 [1] : vector<8x8xf32> to vector<8xf32>
    %348 = vector.shape_cast %347 : vector<8xf32> to vector<8x1xf32>
    %349 = tpu.reciprocal %348 {approx = true} : vector<8x1xf32> -> vector<8x1xf32>
    %350 = vector.broadcast %349 : vector<8x1xf32> to vector<8x8xf32>
    %351 = arith.mulf %346, %350 : vector<8x8xf32>
    %cst_229 = arith.constant dense<0.000000e+00> : vector<8x16xf32>
    %352 = tpu.matmul %351, %336, %cst_229 {dimension_numbers = #tpu.dot_dimension_numbers<[1], [0], [0], [1], [0, 0, 1, 1], [], []>} : vector<8x8xf32>, vector<8x16xf32>, vector<8x16xf32> -> vector<8x16xf32>
    %c0_230 = arith.constant 0 : index
    %c0_231 = arith.constant 0 : index
    %c0_232 = arith.constant 0 : index
    %353 = vector.load %arg5[%c0_230, %c0_231, %c0_232] : memref<2x16x32xf32, #tpu.memory_space<vmem>>, vector<1x16x32xf32>
    %354 = vector.shape_cast %353 : vector<1x16x32xf32> to vector<16x32xf32>
    %cst_233 = arith.constant dense<0.000000e+00> : vector<8x32xf32>
    %355 = tpu.matmul %352, %354, %cst_233 {dimension_numbers = #tpu.dot_dimension_numbers<[1], [0], [0], [1], [0, 0, 1, 1], [], []>} : vector<8x16xf32>, vector<16x32xf32>, vector<8x32xf32> -> vector<8x32xf32>
    %c1_234 = arith.constant 1 : index
    %c0_235 = arith.constant 0 : index
    %c0_236 = arith.constant 0 : index
    %356 = vector.load %arg3[%c1_234, %c0_235, %c0_236] : memref<6x32x16xf32, #tpu.memory_space<vmem>>, vector<1x32x16xf32>
    %357 = vector.shape_cast %356 : vector<1x32x16xf32> to vector<32x16xf32>
    %cst_237 = arith.constant dense<0.000000e+00> : vector<8x16xf32>
    %358 = tpu.matmul %312, %357, %cst_237 {dimension_numbers = #tpu.dot_dimension_numbers<[1], [0], [0], [1], [0, 0, 1, 1], [], []>} : vector<8x32xf32>, vector<32x16xf32>, vector<8x16xf32> -> vector<8x16xf32>
    %c1_238 = arith.constant 1 : index
    %c0_239 = arith.constant 0 : index
    %c0_240 = arith.constant 0 : index
    %359 = vector.load %arg4[%c1_238, %c0_239, %c0_240] : memref<6x1x16xf32, #tpu.memory_space<vmem>>, vector<1x1x16xf32>
    %360 = vector.shape_cast %359 : vector<1x1x16xf32> to vector<1x16xf32>
    %361 = vector.broadcast %360 : vector<1x16xf32> to vector<8x16xf32>
    %362 = arith.addf %358, %361 : vector<8x16xf32>
    %c3_241 = arith.constant 3 : index
    %c0_242 = arith.constant 0 : index
    %c0_243 = arith.constant 0 : index
    %363 = vector.load %arg3[%c3_241, %c0_242, %c0_243] : memref<6x32x16xf32, #tpu.memory_space<vmem>>, vector<1x32x16xf32>
    %364 = vector.shape_cast %363 : vector<1x32x16xf32> to vector<32x16xf32>
    %cst_244 = arith.constant dense<0.000000e+00> : vector<8x16xf32>
    %365 = tpu.matmul %312, %364, %cst_244 {dimension_numbers = #tpu.dot_dimension_numbers<[1], [0], [0], [1], [0, 0, 1, 1], [], []>} : vector<8x32xf32>, vector<32x16xf32>, vector<8x16xf32> -> vector<8x16xf32>
    %c3_245 = arith.constant 3 : index
    %c0_246 = arith.constant 0 : index
    %c0_247 = arith.constant 0 : index
    %366 = vector.load %arg4[%c3_245, %c0_246, %c0_247] : memref<6x1x16xf32, #tpu.memory_space<vmem>>, vector<1x1x16xf32>
    %367 = vector.shape_cast %366 : vector<1x1x16xf32> to vector<1x16xf32>
    %368 = vector.broadcast %367 : vector<1x16xf32> to vector<8x16xf32>
    %369 = arith.addf %365, %368 : vector<8x16xf32>
    %c5_248 = arith.constant 5 : index
    %c0_249 = arith.constant 0 : index
    %c0_250 = arith.constant 0 : index
    %370 = vector.load %arg3[%c5_248, %c0_249, %c0_250] : memref<6x32x16xf32, #tpu.memory_space<vmem>>, vector<1x32x16xf32>
    %371 = vector.shape_cast %370 : vector<1x32x16xf32> to vector<32x16xf32>
    %cst_251 = arith.constant dense<0.000000e+00> : vector<8x16xf32>
    %372 = tpu.matmul %312, %371, %cst_251 {dimension_numbers = #tpu.dot_dimension_numbers<[1], [0], [0], [1], [0, 0, 1, 1], [], []>} : vector<8x32xf32>, vector<32x16xf32>, vector<8x16xf32> -> vector<8x16xf32>
    %c5_252 = arith.constant 5 : index
    %c0_253 = arith.constant 0 : index
    %c0_254 = arith.constant 0 : index
    %373 = vector.load %arg4[%c5_252, %c0_253, %c0_254] : memref<6x1x16xf32, #tpu.memory_space<vmem>>, vector<1x1x16xf32>
    %374 = vector.shape_cast %373 : vector<1x1x16xf32> to vector<1x16xf32>
    %375 = vector.broadcast %374 : vector<1x16xf32> to vector<8x16xf32>
    %376 = arith.addf %372, %375 : vector<8x16xf32>
    %cst_255 = arith.constant dense<0.000000e+00> : vector<8x8xf32>
    %377 = tpu.matmul %362, %369, %cst_255 {dimension_numbers = #tpu.dot_dimension_numbers<[1], [1], [0], [0], [0, 0, 1, 0], [], []>} : vector<8x16xf32>, vector<8x16xf32>, vector<8x8xf32> -> vector<8x8xf32>
    %cst_256 = arith.constant 2.500000e-01 : f32
    %378 = vector.broadcast %cst_256 : f32 to vector<8x8xf32>
    %379 = arith.mulf %377, %378 : vector<8x8xf32>
    %380 = vector.broadcast %315 : vector<1x8xf32> to vector<8x8xf32>
    %381 = arith.addf %379, %380 : vector<8x8xf32>
    %cst_257 = arith.constant dense<0xFF800000> : vector<8xf32>
    %382 = vector.multi_reduction <maximumf>, %381, %cst_257 [1] : vector<8x8xf32> to vector<8xf32>
    %383 = vector.shape_cast %382 : vector<8xf32> to vector<8x1xf32>
    %384 = vector.broadcast %383 : vector<8x1xf32> to vector<8x8xf32>
    %385 = arith.subf %381, %384 : vector<8x8xf32>
    %386 = math.exp %385 : vector<8x8xf32>
    %cst_258 = arith.constant dense<0.000000e+00> : vector<8xf32>
    %387 = vector.multi_reduction <add>, %386, %cst_258 [1] : vector<8x8xf32> to vector<8xf32>
    %388 = vector.shape_cast %387 : vector<8xf32> to vector<8x1xf32>
    %389 = tpu.reciprocal %388 {approx = true} : vector<8x1xf32> -> vector<8x1xf32>
    %390 = vector.broadcast %389 : vector<8x1xf32> to vector<8x8xf32>
    %391 = arith.mulf %386, %390 : vector<8x8xf32>
    %cst_259 = arith.constant dense<0.000000e+00> : vector<8x16xf32>
    %392 = tpu.matmul %391, %376, %cst_259 {dimension_numbers = #tpu.dot_dimension_numbers<[1], [0], [0], [1], [0, 0, 1, 1], [], []>} : vector<8x8xf32>, vector<8x16xf32>, vector<8x16xf32> -> vector<8x16xf32>
    %c1_260 = arith.constant 1 : index
    %c0_261 = arith.constant 0 : index
    %c0_262 = arith.constant 0 : index
    %393 = vector.load %arg5[%c1_260, %c0_261, %c0_262] : memref<2x16x32xf32, #tpu.memory_space<vmem>>, vector<1x16x32xf32>
    %394 = vector.shape_cast %393 : vector<1x16x32xf32> to vector<16x32xf32>
    %cst_263 = arith.constant dense<0.000000e+00> : vector<8x32xf32>
    %395 = tpu.matmul %392, %394, %cst_263 {dimension_numbers = #tpu.dot_dimension_numbers<[1], [0], [0], [1], [0, 0, 1, 1], [], []>} : vector<8x16xf32>, vector<16x32xf32>, vector<8x32xf32> -> vector<8x32xf32>
    %396 = arith.addf %355, %395 : vector<8x32xf32>
    %c0_264 = arith.constant 0 : index
    %c0_265 = arith.constant 0 : index
    %397 = vector.load %arg9[%c0_264, %c0_265] : memref<6x32xf32, #tpu.memory_space<vmem>>, vector<1x32xf32>
    %398 = vector.broadcast %397 : vector<1x32xf32> to vector<8x32xf32>
    %399 = arith.addf %396, %398 : vector<8x32xf32>
    %400 = arith.addf %399, %312 : vector<8x32xf32>
    %c1_266 = arith.constant 1 : index
    %c0_267 = arith.constant 0 : index
    %401 = vector.load %arg9[%c1_266, %c0_267] : memref<6x32xf32, #tpu.memory_space<vmem>>, vector<1x32xf32>
    %c2_268 = arith.constant 2 : index
    %c0_269 = arith.constant 0 : index
    %402 = vector.load %arg9[%c2_268, %c0_269] : memref<6x32xf32, #tpu.memory_space<vmem>>, vector<1x32xf32>
    %cst_270 = arith.constant dense<0.000000e+00> : vector<8xf32>
    %403 = vector.multi_reduction <add>, %400, %cst_270 [1] : vector<8x32xf32> to vector<8xf32>
    %404 = vector.shape_cast %403 : vector<8xf32> to vector<8x1xf32>
    %cst_271 = arith.constant 3.200000e+01 : f32
    %405 = vector.broadcast %cst_271 : f32 to vector<8x1xf32>
    %406 = arith.divf %404, %405 : vector<8x1xf32>
    %407 = vector.broadcast %406 : vector<8x1xf32> to vector<8x32xf32>
    %408 = arith.subf %400, %407 : vector<8x32xf32>
    %409 = arith.mulf %408, %408 : vector<8x32xf32>
    %cst_272 = arith.constant dense<0.000000e+00> : vector<8xf32>
    %410 = vector.multi_reduction <add>, %409, %cst_272 [1] : vector<8x32xf32> to vector<8xf32>
    %411 = vector.shape_cast %410 : vector<8xf32> to vector<8x1xf32>
    %cst_273 = arith.constant 3.200000e+01 : f32
    %412 = vector.broadcast %cst_273 : f32 to vector<8x1xf32>
    %413 = arith.divf %411, %412 : vector<8x1xf32>
    %414 = vector.broadcast %406 : vector<8x1xf32> to vector<8x32xf32>
    %415 = arith.subf %400, %414 : vector<8x32xf32>
    %cst_274 = arith.constant 9.99999974E-6 : f32
    %416 = vector.broadcast %cst_274 : f32 to vector<8x1xf32>
    %417 = arith.addf %413, %416 : vector<8x1xf32>
    %418 = math.rsqrt %417 : vector<8x1xf32>
    %419 = vector.broadcast %418 : vector<8x1xf32> to vector<8x32xf32>
    %420 = arith.mulf %415, %419 : vector<8x32xf32>
    %421 = vector.broadcast %401 : vector<1x32xf32> to vector<8x32xf32>
    %422 = arith.mulf %420, %421 : vector<8x32xf32>
    %423 = vector.broadcast %402 : vector<1x32xf32> to vector<8x32xf32>
    %424 = arith.addf %422, %423 : vector<8x32xf32>
    %c0_275 = arith.constant 0 : index
    %c0_276 = arith.constant 0 : index
    %425 = vector.load %arg6[%c0_275, %c0_276] : memref<32x64xf32, #tpu.memory_space<vmem>>, vector<32x64xf32>
    %cst_277 = arith.constant dense<0.000000e+00> : vector<8x64xf32>
    %426 = tpu.matmul %424, %425, %cst_277 {dimension_numbers = #tpu.dot_dimension_numbers<[1], [0], [0], [1], [0, 0, 1, 1], [], []>} : vector<8x32xf32>, vector<32x64xf32>, vector<8x64xf32> -> vector<8x64xf32>
    %c0_278 = arith.constant 0 : index
    %c0_279 = arith.constant 0 : index
    %427 = vector.load %arg7[%c0_278, %c0_279] : memref<1x64xf32, #tpu.memory_space<vmem>>, vector<1x64xf32>
    %428 = vector.broadcast %427 : vector<1x64xf32> to vector<8x64xf32>
    %429 = arith.addf %426, %428 : vector<8x64xf32>
    %cst_280 = arith.constant 0.000000e+00 : f32
    %430 = vector.broadcast %cst_280 : f32 to vector<8x64xf32>
    %431 = arith.maximumf %429, %430 : vector<8x64xf32>
    %c0_281 = arith.constant 0 : index
    %c0_282 = arith.constant 0 : index
    %432 = vector.load %arg8[%c0_281, %c0_282] : memref<64x32xf32, #tpu.memory_space<vmem>>, vector<64x32xf32>
    %cst_283 = arith.constant dense<0.000000e+00> : vector<8x32xf32>
    %433 = tpu.matmul %431, %432, %cst_283 {dimension_numbers = #tpu.dot_dimension_numbers<[1], [0], [0], [1], [0, 0, 1, 1], [], []>} : vector<8x64xf32>, vector<64x32xf32>, vector<8x32xf32> -> vector<8x32xf32>
    %c3_284 = arith.constant 3 : index
    %c0_285 = arith.constant 0 : index
    %434 = vector.load %arg9[%c3_284, %c0_285] : memref<6x32xf32, #tpu.memory_space<vmem>>, vector<1x32xf32>
    %435 = vector.broadcast %434 : vector<1x32xf32> to vector<8x32xf32>
    %436 = arith.addf %433, %435 : vector<8x32xf32>
    %437 = arith.addf %436, %424 : vector<8x32xf32>
    %c4_286 = arith.constant 4 : index
    %c0_287 = arith.constant 0 : index
    %438 = vector.load %arg9[%c4_286, %c0_287] : memref<6x32xf32, #tpu.memory_space<vmem>>, vector<1x32xf32>
    %c5_288 = arith.constant 5 : index
    %c0_289 = arith.constant 0 : index
    %439 = vector.load %arg9[%c5_288, %c0_289] : memref<6x32xf32, #tpu.memory_space<vmem>>, vector<1x32xf32>
    %cst_290 = arith.constant dense<0.000000e+00> : vector<8xf32>
    %440 = vector.multi_reduction <add>, %437, %cst_290 [1] : vector<8x32xf32> to vector<8xf32>
    %441 = vector.shape_cast %440 : vector<8xf32> to vector<8x1xf32>
    %cst_291 = arith.constant 3.200000e+01 : f32
    %442 = vector.broadcast %cst_291 : f32 to vector<8x1xf32>
    %443 = arith.divf %441, %442 : vector<8x1xf32>
    %444 = vector.broadcast %443 : vector<8x1xf32> to vector<8x32xf32>
    %445 = arith.subf %437, %444 : vector<8x32xf32>
    %446 = arith.mulf %445, %445 : vector<8x32xf32>
    %cst_292 = arith.constant dense<0.000000e+00> : vector<8xf32>
    %447 = vector.multi_reduction <add>, %446, %cst_292 [1] : vector<8x32xf32> to vector<8xf32>
    %448 = vector.shape_cast %447 : vector<8xf32> to vector<8x1xf32>
    %cst_293 = arith.constant 3.200000e+01 : f32
    %449 = vector.broadcast %cst_293 : f32 to vector<8x1xf32>
    %450 = arith.divf %448, %449 : vector<8x1xf32>
    %451 = vector.broadcast %443 : vector<8x1xf32> to vector<8x32xf32>
    %452 = arith.subf %437, %451 : vector<8x32xf32>
    %cst_294 = arith.constant 9.99999974E-6 : f32
    %453 = vector.broadcast %cst_294 : f32 to vector<8x1xf32>
    %454 = arith.addf %450, %453 : vector<8x1xf32>
    %455 = math.rsqrt %454 : vector<8x1xf32>
    %456 = vector.broadcast %455 : vector<8x1xf32> to vector<8x32xf32>
    %457 = arith.mulf %452, %456 : vector<8x32xf32>
    %458 = vector.broadcast %438 : vector<1x32xf32> to vector<8x32xf32>
    %459 = arith.mulf %457, %458 : vector<8x32xf32>
    %460 = vector.broadcast %439 : vector<1x32xf32> to vector<8x32xf32>
    %461 = arith.addf %459, %460 : vector<8x32xf32>
    %462 = arith.addf %461, %312 : vector<8x32xf32>
    %c0_295 = arith.constant 0 : index
    %c0_296 = arith.constant 0 : index
    %463 = vector.load %arg11[%c0_295, %c0_296] : memref<8x32xf32, #tpu.memory_space<vmem>>, vector<8x32xf32>
    tpu.vector_store %arg11[%c0_295, %c0_296], %462 {strides = array<i32>} : memref<8x32xf32, #tpu.memory_space<vmem>>, vector<8x32xf32>,
    %c0_297 = arith.constant 0 : index
    %c0_298 = arith.constant 0 : index
    %464 = tpu.strided_load %arg11[%c0_297, %c0_298] {strides = array<i32: 2, 1>} : memref<8x32xf32, #tpu.memory_space<vmem>>, vector<4x32xf32>
    %c1_299 = arith.constant 1 : index
    %c0_300 = arith.constant 0 : index
    %465 = tpu.strided_load %arg11[%c1_299, %c0_300] {strides = array<i32: 2, 1>} : memref<8x32xf32, #tpu.memory_space<vmem>>, vector<4x32xf32>
    %466 = arith.maximumf %464, %465 : vector<4x32xf32>
    %467 = vector.extract_strided_slice %314 {offsets = [1, 0], sizes = [1, 4], strides = [1, 1]} : vector<2x8xf32> to vector<1x4xf32>
    %c0_i32_301 = arith.constant 0 : i32
    %c0_302 = arith.constant 0 : index
    %c0_303 = arith.constant 0 : index
    %c0_304 = arith.constant 0 : index
    %468 = vector.load %arg3[%c0_302, %c0_303, %c0_304] : memref<6x32x16xf32, #tpu.memory_space<vmem>>, vector<1x32x16xf32>
    %469 = vector.shape_cast %468 : vector<1x32x16xf32> to vector<32x16xf32>
    %cst_305 = arith.constant dense<0.000000e+00> : vector<4x16xf32>
    %470 = tpu.matmul %466, %469, %cst_305 {dimension_numbers = #tpu.dot_dimension_numbers<[1], [0], [0], [1], [0, 0, 1, 1], [], []>} : vector<4x32xf32>, vector<32x16xf32>, vector<4x16xf32> -> vector<4x16xf32>
    %c0_306 = arith.constant 0 : index
    %c0_307 = arith.constant 0 : index
    %c0_308 = arith.constant 0 : index
    %471 = vector.load %arg4[%c0_306, %c0_307, %c0_308] : memref<6x1x16xf32, #tpu.memory_space<vmem>>, vector<1x1x16xf32>
    %472 = vector.shape_cast %471 : vector<1x1x16xf32> to vector<1x16xf32>
    %473 = vector.broadcast %472 : vector<1x16xf32> to vector<4x16xf32>
    %474 = arith.addf %470, %473 : vector<4x16xf32>
    %c2_309 = arith.constant 2 : index
    %c0_310 = arith.constant 0 : index
    %c0_311 = arith.constant 0 : index
    %475 = vector.load %arg3[%c2_309, %c0_310, %c0_311] : memref<6x32x16xf32, #tpu.memory_space<vmem>>, vector<1x32x16xf32>
    %476 = vector.shape_cast %475 : vector<1x32x16xf32> to vector<32x16xf32>
    %cst_312 = arith.constant dense<0.000000e+00> : vector<4x16xf32>
    %477 = tpu.matmul %466, %476, %cst_312 {dimension_numbers = #tpu.dot_dimension_numbers<[1], [0], [0], [1], [0, 0, 1, 1], [], []>} : vector<4x32xf32>, vector<32x16xf32>, vector<4x16xf32> -> vector<4x16xf32>
    %c2_313 = arith.constant 2 : index
    %c0_314 = arith.constant 0 : index
    %c0_315 = arith.constant 0 : index
    %478 = vector.load %arg4[%c2_313, %c0_314, %c0_315] : memref<6x1x16xf32, #tpu.memory_space<vmem>>, vector<1x1x16xf32>
    %479 = vector.shape_cast %478 : vector<1x1x16xf32> to vector<1x16xf32>
    %480 = vector.broadcast %479 : vector<1x16xf32> to vector<4x16xf32>
    %481 = arith.addf %477, %480 : vector<4x16xf32>
    %c4_316 = arith.constant 4 : index
    %c0_317 = arith.constant 0 : index
    %c0_318 = arith.constant 0 : index
    %482 = vector.load %arg3[%c4_316, %c0_317, %c0_318] : memref<6x32x16xf32, #tpu.memory_space<vmem>>, vector<1x32x16xf32>
    %483 = vector.shape_cast %482 : vector<1x32x16xf32> to vector<32x16xf32>
    %cst_319 = arith.constant dense<0.000000e+00> : vector<4x16xf32>
    %484 = tpu.matmul %466, %483, %cst_319 {dimension_numbers = #tpu.dot_dimension_numbers<[1], [0], [0], [1], [0, 0, 1, 1], [], []>} : vector<4x32xf32>, vector<32x16xf32>, vector<4x16xf32> -> vector<4x16xf32>
    %c4_320 = arith.constant 4 : index
    %c0_321 = arith.constant 0 : index
    %c0_322 = arith.constant 0 : index
    %485 = vector.load %arg4[%c4_320, %c0_321, %c0_322] : memref<6x1x16xf32, #tpu.memory_space<vmem>>, vector<1x1x16xf32>
    %486 = vector.shape_cast %485 : vector<1x1x16xf32> to vector<1x16xf32>
    %487 = vector.broadcast %486 : vector<1x16xf32> to vector<4x16xf32>
    %488 = arith.addf %484, %487 : vector<4x16xf32>
    %cst_323 = arith.constant dense<0.000000e+00> : vector<4x4xf32>
    %489 = tpu.matmul %474, %481, %cst_323 {dimension_numbers = #tpu.dot_dimension_numbers<[1], [1], [0], [0], [0, 0, 1, 0], [], []>} : vector<4x16xf32>, vector<4x16xf32>, vector<4x4xf32> -> vector<4x4xf32>
    %cst_324 = arith.constant 2.500000e-01 : f32
    %490 = vector.broadcast %cst_324 : f32 to vector<4x4xf32>
    %491 = arith.mulf %489, %490 : vector<4x4xf32>
    %492 = vector.broadcast %467 : vector<1x4xf32> to vector<4x4xf32>
    %493 = arith.addf %491, %492 : vector<4x4xf32>
    %cst_325 = arith.constant dense<0xFF800000> : vector<4xf32>
    %494 = vector.multi_reduction <maximumf>, %493, %cst_325 [1] : vector<4x4xf32> to vector<4xf32>
    %495 = vector.shape_cast %494 : vector<4xf32> to vector<4x1xf32>
    %496 = vector.broadcast %495 : vector<4x1xf32> to vector<4x4xf32>
    %497 = arith.subf %493, %496 : vector<4x4xf32>
    %498 = math.exp %497 : vector<4x4xf32>
    %cst_326 = arith.constant dense<0.000000e+00> : vector<4xf32>
    %499 = vector.multi_reduction <add>, %498, %cst_326 [1] : vector<4x4xf32> to vector<4xf32>
    %500 = vector.shape_cast %499 : vector<4xf32> to vector<4x1xf32>
    %501 = tpu.reciprocal %500 {approx = true} : vector<4x1xf32> -> vector<4x1xf32>
    %502 = vector.broadcast %501 : vector<4x1xf32> to vector<4x4xf32>
    %503 = arith.mulf %498, %502 : vector<4x4xf32>
    %cst_327 = arith.constant dense<0.000000e+00> : vector<4x16xf32>
    %504 = tpu.matmul %503, %488, %cst_327 {dimension_numbers = #tpu.dot_dimension_numbers<[1], [0], [0], [1], [0, 0, 1, 1], [], []>} : vector<4x4xf32>, vector<4x16xf32>, vector<4x16xf32> -> vector<4x16xf32>
    %c0_328 = arith.constant 0 : index
    %c0_329 = arith.constant 0 : index
    %c0_330 = arith.constant 0 : index
    %505 = vector.load %arg5[%c0_328, %c0_329, %c0_330] : memref<2x16x32xf32, #tpu.memory_space<vmem>>, vector<1x16x32xf32>
    %506 = vector.shape_cast %505 : vector<1x16x32xf32> to vector<16x32xf32>
    %cst_331 = arith.constant dense<0.000000e+00> : vector<4x32xf32>
    %507 = tpu.matmul %504, %506, %cst_331 {dimension_numbers = #tpu.dot_dimension_numbers<[1], [0], [0], [1], [0, 0, 1, 1], [], []>} : vector<4x16xf32>, vector<16x32xf32>, vector<4x32xf32> -> vector<4x32xf32>
    %c1_332 = arith.constant 1 : index
    %c0_333 = arith.constant 0 : index
    %c0_334 = arith.constant 0 : index
    %508 = vector.load %arg3[%c1_332, %c0_333, %c0_334] : memref<6x32x16xf32, #tpu.memory_space<vmem>>, vector<1x32x16xf32>
    %509 = vector.shape_cast %508 : vector<1x32x16xf32> to vector<32x16xf32>
    %cst_335 = arith.constant dense<0.000000e+00> : vector<4x16xf32>
    %510 = tpu.matmul %466, %509, %cst_335 {dimension_numbers = #tpu.dot_dimension_numbers<[1], [0], [0], [1], [0, 0, 1, 1], [], []>} : vector<4x32xf32>, vector<32x16xf32>, vector<4x16xf32> -> vector<4x16xf32>
    %c1_336 = arith.constant 1 : index
    %c0_337 = arith.constant 0 : index
    %c0_338 = arith.constant 0 : index
    %511 = vector.load %arg4[%c1_336, %c0_337, %c0_338] : memref<6x1x16xf32, #tpu.memory_space<vmem>>, vector<1x1x16xf32>
    %512 = vector.shape_cast %511 : vector<1x1x16xf32> to vector<1x16xf32>
    %513 = vector.broadcast %512 : vector<1x16xf32> to vector<4x16xf32>
    %514 = arith.addf %510, %513 : vector<4x16xf32>
    %c3_339 = arith.constant 3 : index
    %c0_340 = arith.constant 0 : index
    %c0_341 = arith.constant 0 : index
    %515 = vector.load %arg3[%c3_339, %c0_340, %c0_341] : memref<6x32x16xf32, #tpu.memory_space<vmem>>, vector<1x32x16xf32>
    %516 = vector.shape_cast %515 : vector<1x32x16xf32> to vector<32x16xf32>
    %cst_342 = arith.constant dense<0.000000e+00> : vector<4x16xf32>
    %517 = tpu.matmul %466, %516, %cst_342 {dimension_numbers = #tpu.dot_dimension_numbers<[1], [0], [0], [1], [0, 0, 1, 1], [], []>} : vector<4x32xf32>, vector<32x16xf32>, vector<4x16xf32> -> vector<4x16xf32>
    %c3_343 = arith.constant 3 : index
    %c0_344 = arith.constant 0 : index
    %c0_345 = arith.constant 0 : index
    %518 = vector.load %arg4[%c3_343, %c0_344, %c0_345] : memref<6x1x16xf32, #tpu.memory_space<vmem>>, vector<1x1x16xf32>
    %519 = vector.shape_cast %518 : vector<1x1x16xf32> to vector<1x16xf32>
    %520 = vector.broadcast %519 : vector<1x16xf32> to vector<4x16xf32>
    %521 = arith.addf %517, %520 : vector<4x16xf32>
    %c5_346 = arith.constant 5 : index
    %c0_347 = arith.constant 0 : index
    %c0_348 = arith.constant 0 : index
    %522 = vector.load %arg3[%c5_346, %c0_347, %c0_348] : memref<6x32x16xf32, #tpu.memory_space<vmem>>, vector<1x32x16xf32>
    %523 = vector.shape_cast %522 : vector<1x32x16xf32> to vector<32x16xf32>
    %cst_349 = arith.constant dense<0.000000e+00> : vector<4x16xf32>
    %524 = tpu.matmul %466, %523, %cst_349 {dimension_numbers = #tpu.dot_dimension_numbers<[1], [0], [0], [1], [0, 0, 1, 1], [], []>} : vector<4x32xf32>, vector<32x16xf32>, vector<4x16xf32> -> vector<4x16xf32>
    %c5_350 = arith.constant 5 : index
    %c0_351 = arith.constant 0 : index
    %c0_352 = arith.constant 0 : index
    %525 = vector.load %arg4[%c5_350, %c0_351, %c0_352] : memref<6x1x16xf32, #tpu.memory_space<vmem>>, vector<1x1x16xf32>
    %526 = vector.shape_cast %525 : vector<1x1x16xf32> to vector<1x16xf32>
    %527 = vector.broadcast %526 : vector<1x16xf32> to vector<4x16xf32>
    %528 = arith.addf %524, %527 : vector<4x16xf32>
    %cst_353 = arith.constant dense<0.000000e+00> : vector<4x4xf32>
    %529 = tpu.matmul %514, %521, %cst_353 {dimension_numbers = #tpu.dot_dimension_numbers<[1], [1], [0], [0], [0, 0, 1, 0], [], []>} : vector<4x16xf32>, vector<4x16xf32>, vector<4x4xf32> -> vector<4x4xf32>
    %cst_354 = arith.constant 2.500000e-01 : f32
    %530 = vector.broadcast %cst_354 : f32 to vector<4x4xf32>
    %531 = arith.mulf %529, %530 : vector<4x4xf32>
    %532 = vector.broadcast %467 : vector<1x4xf32> to vector<4x4xf32>
    %533 = arith.addf %531, %532 : vector<4x4xf32>
    %cst_355 = arith.constant dense<0xFF800000> : vector<4xf32>
    %534 = vector.multi_reduction <maximumf>, %533, %cst_355 [1] : vector<4x4xf32> to vector<4xf32>
    %535 = vector.shape_cast %534 : vector<4xf32> to vector<4x1xf32>
    %536 = vector.broadcast %535 : vector<4x1xf32> to vector<4x4xf32>
    %537 = arith.subf %533, %536 : vector<4x4xf32>
    %538 = math.exp %537 : vector<4x4xf32>
    %cst_356 = arith.constant dense<0.000000e+00> : vector<4xf32>
    %539 = vector.multi_reduction <add>, %538, %cst_356 [1] : vector<4x4xf32> to vector<4xf32>
    %540 = vector.shape_cast %539 : vector<4xf32> to vector<4x1xf32>
    %541 = tpu.reciprocal %540 {approx = true} : vector<4x1xf32> -> vector<4x1xf32>
    %542 = vector.broadcast %541 : vector<4x1xf32> to vector<4x4xf32>
    %543 = arith.mulf %538, %542 : vector<4x4xf32>
    %cst_357 = arith.constant dense<0.000000e+00> : vector<4x16xf32>
    %544 = tpu.matmul %543, %528, %cst_357 {dimension_numbers = #tpu.dot_dimension_numbers<[1], [0], [0], [1], [0, 0, 1, 1], [], []>} : vector<4x4xf32>, vector<4x16xf32>, vector<4x16xf32> -> vector<4x16xf32>
    %c1_358 = arith.constant 1 : index
    %c0_359 = arith.constant 0 : index
    %c0_360 = arith.constant 0 : index
    %545 = vector.load %arg5[%c1_358, %c0_359, %c0_360] : memref<2x16x32xf32, #tpu.memory_space<vmem>>, vector<1x16x32xf32>
    %546 = vector.shape_cast %545 : vector<1x16x32xf32> to vector<16x32xf32>
    %cst_361 = arith.constant dense<0.000000e+00> : vector<4x32xf32>
    %547 = tpu.matmul %544, %546, %cst_361 {dimension_numbers = #tpu.dot_dimension_numbers<[1], [0], [0], [1], [0, 0, 1, 1], [], []>} : vector<4x16xf32>, vector<16x32xf32>, vector<4x32xf32> -> vector<4x32xf32>
    %548 = arith.addf %507, %547 : vector<4x32xf32>
    %c0_362 = arith.constant 0 : index
    %c0_363 = arith.constant 0 : index
    %549 = vector.load %arg9[%c0_362, %c0_363] : memref<6x32xf32, #tpu.memory_space<vmem>>, vector<1x32xf32>
    %550 = vector.broadcast %549 : vector<1x32xf32> to vector<4x32xf32>
    %551 = arith.addf %548, %550 : vector<4x32xf32>
    %552 = arith.addf %551, %466 : vector<4x32xf32>
    %c1_364 = arith.constant 1 : index
    %c0_365 = arith.constant 0 : index
    %553 = vector.load %arg9[%c1_364, %c0_365] : memref<6x32xf32, #tpu.memory_space<vmem>>, vector<1x32xf32>
    %c2_366 = arith.constant 2 : index
    %c0_367 = arith.constant 0 : index
    %554 = vector.load %arg9[%c2_366, %c0_367] : memref<6x32xf32, #tpu.memory_space<vmem>>, vector<1x32xf32>
    %cst_368 = arith.constant dense<0.000000e+00> : vector<4xf32>
    %555 = vector.multi_reduction <add>, %552, %cst_368 [1] : vector<4x32xf32> to vector<4xf32>
    %556 = vector.shape_cast %555 : vector<4xf32> to vector<4x1xf32>
    %cst_369 = arith.constant 3.200000e+01 : f32
    %557 = vector.broadcast %cst_369 : f32 to vector<4x1xf32>
    %558 = arith.divf %556, %557 : vector<4x1xf32>
    %559 = vector.broadcast %558 : vector<4x1xf32> to vector<4x32xf32>
    %560 = arith.subf %552, %559 : vector<4x32xf32>
    %561 = arith.mulf %560, %560 : vector<4x32xf32>
    %cst_370 = arith.constant dense<0.000000e+00> : vector<4xf32>
    %562 = vector.multi_reduction <add>, %561, %cst_370 [1] : vector<4x32xf32> to vector<4xf32>
    %563 = vector.shape_cast %562 : vector<4xf32> to vector<4x1xf32>
    %cst_371 = arith.constant 3.200000e+01 : f32
    %564 = vector.broadcast %cst_371 : f32 to vector<4x1xf32>
    %565 = arith.divf %563, %564 : vector<4x1xf32>
    %566 = vector.broadcast %558 : vector<4x1xf32> to vector<4x32xf32>
    %567 = arith.subf %552, %566 : vector<4x32xf32>
    %cst_372 = arith.constant 9.99999974E-6 : f32
    %568 = vector.broadcast %cst_372 : f32 to vector<4x1xf32>
    %569 = arith.addf %565, %568 : vector<4x1xf32>
    %570 = math.rsqrt %569 : vector<4x1xf32>
    %571 = vector.broadcast %570 : vector<4x1xf32> to vector<4x32xf32>
    %572 = arith.mulf %567, %571 : vector<4x32xf32>
    %573 = vector.broadcast %553 : vector<1x32xf32> to vector<4x32xf32>
    %574 = arith.mulf %572, %573 : vector<4x32xf32>
    %575 = vector.broadcast %554 : vector<1x32xf32> to vector<4x32xf32>
    %576 = arith.addf %574, %575 : vector<4x32xf32>
    %c0_373 = arith.constant 0 : index
    %c0_374 = arith.constant 0 : index
    %577 = vector.load %arg6[%c0_373, %c0_374] : memref<32x64xf32, #tpu.memory_space<vmem>>, vector<32x64xf32>
    %cst_375 = arith.constant dense<0.000000e+00> : vector<4x64xf32>
    %578 = tpu.matmul %576, %577, %cst_375 {dimension_numbers = #tpu.dot_dimension_numbers<[1], [0], [0], [1], [0, 0, 1, 1], [], []>} : vector<4x32xf32>, vector<32x64xf32>, vector<4x64xf32> -> vector<4x64xf32>
    %c0_376 = arith.constant 0 : index
    %c0_377 = arith.constant 0 : index
    %579 = vector.load %arg7[%c0_376, %c0_377] : memref<1x64xf32, #tpu.memory_space<vmem>>, vector<1x64xf32>
    %580 = vector.broadcast %579 : vector<1x64xf32> to vector<4x64xf32>
    %581 = arith.addf %578, %580 : vector<4x64xf32>
    %cst_378 = arith.constant 0.000000e+00 : f32
    %582 = vector.broadcast %cst_378 : f32 to vector<4x64xf32>
    %583 = arith.maximumf %581, %582 : vector<4x64xf32>
    %c0_379 = arith.constant 0 : index
    %c0_380 = arith.constant 0 : index
    %584 = vector.load %arg8[%c0_379, %c0_380] : memref<64x32xf32, #tpu.memory_space<vmem>>, vector<64x32xf32>
    %cst_381 = arith.constant dense<0.000000e+00> : vector<4x32xf32>
    %585 = tpu.matmul %583, %584, %cst_381 {dimension_numbers = #tpu.dot_dimension_numbers<[1], [0], [0], [1], [0, 0, 1, 1], [], []>} : vector<4x64xf32>, vector<64x32xf32>, vector<4x32xf32> -> vector<4x32xf32>
    %c3_382 = arith.constant 3 : index
    %c0_383 = arith.constant 0 : index
    %586 = vector.load %arg9[%c3_382, %c0_383] : memref<6x32xf32, #tpu.memory_space<vmem>>, vector<1x32xf32>
    %587 = vector.broadcast %586 : vector<1x32xf32> to vector<4x32xf32>
    %588 = arith.addf %585, %587 : vector<4x32xf32>
    %589 = arith.addf %588, %576 : vector<4x32xf32>
    %c4_384 = arith.constant 4 : index
    %c0_385 = arith.constant 0 : index
    %590 = vector.load %arg9[%c4_384, %c0_385] : memref<6x32xf32, #tpu.memory_space<vmem>>, vector<1x32xf32>
    %c5_386 = arith.constant 5 : index
    %c0_387 = arith.constant 0 : index
    %591 = vector.load %arg9[%c5_386, %c0_387] : memref<6x32xf32, #tpu.memory_space<vmem>>, vector<1x32xf32>
    %cst_388 = arith.constant dense<0.000000e+00> : vector<4xf32>
    %592 = vector.multi_reduction <add>, %589, %cst_388 [1] : vector<4x32xf32> to vector<4xf32>
    %593 = vector.shape_cast %592 : vector<4xf32> to vector<4x1xf32>
    %cst_389 = arith.constant 3.200000e+01 : f32
    %594 = vector.broadcast %cst_389 : f32 to vector<4x1xf32>
    %595 = arith.divf %593, %594 : vector<4x1xf32>
    %596 = vector.broadcast %595 : vector<4x1xf32> to vector<4x32xf32>
    %597 = arith.subf %589, %596 : vector<4x32xf32>
    %598 = arith.mulf %597, %597 : vector<4x32xf32>
    %cst_390 = arith.constant dense<0.000000e+00> : vector<4xf32>
    %599 = vector.multi_reduction <add>, %598, %cst_390 [1] : vector<4x32xf32> to vector<4xf32>
    %600 = vector.shape_cast %599 : vector<4xf32> to vector<4x1xf32>
    %cst_391 = arith.constant 3.200000e+01 : f32
    %601 = vector.broadcast %cst_391 : f32 to vector<4x1xf32>
    %602 = arith.divf %600, %601 : vector<4x1xf32>
    %603 = vector.broadcast %595 : vector<4x1xf32> to vector<4x32xf32>
    %604 = arith.subf %589, %603 : vector<4x32xf32>
    %cst_392 = arith.constant 9.99999974E-6 : f32
    %605 = vector.broadcast %cst_392 : f32 to vector<4x1xf32>
    %606 = arith.addf %602, %605 : vector<4x1xf32>
    %607 = math.rsqrt %606 : vector<4x1xf32>
    %608 = vector.broadcast %607 : vector<4x1xf32> to vector<4x32xf32>
    %609 = arith.mulf %604, %608 : vector<4x32xf32>
    %610 = vector.broadcast %590 : vector<1x32xf32> to vector<4x32xf32>
    %611 = arith.mulf %609, %610 : vector<4x32xf32>
    %612 = vector.broadcast %591 : vector<1x32xf32> to vector<4x32xf32>
    %613 = arith.addf %611, %612 : vector<4x32xf32>
    %614 = arith.addf %613, %466 : vector<4x32xf32>
    %c0_393 = arith.constant 0 : index
    %c0_394 = arith.constant 0 : index
    %615 = vector.load %arg11[%c0_393, %c0_394] : memref<8x32xf32, #tpu.memory_space<vmem>>, vector<4x32xf32>
    tpu.vector_store %arg11[%c0_393, %c0_394], %614 {strides = array<i32>} : memref<8x32xf32, #tpu.memory_space<vmem>>, vector<4x32xf32>,
    %c0_395 = arith.constant 0 : index
    %c0_396 = arith.constant 0 : index
    %616 = tpu.strided_load %arg11[%c0_395, %c0_396] {strides = array<i32: 2, 1>} : memref<8x32xf32, #tpu.memory_space<vmem>>, vector<2x32xf32>
    %c1_397 = arith.constant 1 : index
    %c0_398 = arith.constant 0 : index
    %617 = tpu.strided_load %arg11[%c1_397, %c0_398] {strides = array<i32: 2, 1>} : memref<8x32xf32, #tpu.memory_space<vmem>>, vector<2x32xf32>
    %618 = arith.maximumf %616, %617 : vector<2x32xf32>
    %c1_399 = arith.constant 1 : index
    %c0_400 = arith.constant 0 : index
    %c0_401 = arith.constant 0 : index
    %619 = vector.load %arg10[%c1_399, %c0_400, %c0_401] : memref<2x2x32xf32, #tpu.memory_space<vmem>>, vector<1x2x32xf32>
    %620 = vector.shape_cast %619 : vector<1x2x32xf32> to vector<2x32xf32>
    %621 = vector.shape_cast %618 : vector<2x32xf32> to vector<1x2x32xf32>
    tpu.vector_store %arg10[%c1_399, %c0_400, %c0_401], %621 {strides = array<i32>} : memref<2x2x32xf32, #tpu.memory_space<vmem>>, vector<1x2x32xf32>,
    return
  }
  func.func @transform_0(%arg0: i32) -> (i32, i32, i32) {
    %c0_i32 = arith.constant 0 : i32
    %c0_i32_0 = arith.constant 0 : i32
    %c0_i32_1 = arith.constant 0 : i32
    return %arg0, %c0_i32, %c0_i32_0 : i32, i32, i32
  }
  func.func @transform_1(%arg0: i32) -> (i32, i32, i32) {
    %c0_i32 = arith.constant 0 : i32
    %c0_i32_0 = arith.constant 0 : i32
    %c0_i32_1 = arith.constant 0 : i32
    return %arg0, %c0_i32, %c0_i32_0 : i32, i32, i32
  }
  func.func @transform_2(%arg0: i32) -> (i32, i32, i32) {
    %c0_i32 = arith.constant 0 : i32
    %c0_i32_0 = arith.constant 0 : i32
    %c0_i32_1 = arith.constant 0 : i32
    %c0_i32_2 = arith.constant 0 : i32
    return %c0_i32, %c0_i32_0, %c0_i32_1 : i32, i32, i32
  }
  func.func @transform_3(%arg0: i32) -> (i32, i32, i32) {
    %c0_i32 = arith.constant 0 : i32
    %c0_i32_0 = arith.constant 0 : i32
    %c0_i32_1 = arith.constant 0 : i32
    %c0_i32_2 = arith.constant 0 : i32
    return %c0_i32, %c0_i32_0, %c0_i32_1 : i32, i32, i32
  }
  func.func @transform_4(%arg0: i32) -> (i32, i32, i32) {
    %c0_i32 = arith.constant 0 : i32
    %c0_i32_0 = arith.constant 0 : i32
    %c0_i32_1 = arith.constant 0 : i32
    %c0_i32_2 = arith.constant 0 : i32
    return %c0_i32, %c0_i32_0, %c0_i32_1 : i32, i32, i32
  }
  func.func @transform_5(%arg0: i32) -> (i32, i32) {
    %c0_i32 = arith.constant 0 : i32
    %c0_i32_0 = arith.constant 0 : i32
    %c0_i32_1 = arith.constant 0 : i32
    return %c0_i32, %c0_i32_0 : i32, i32
  }
  func.func @transform_6(%arg0: i32) -> (i32, i32) {
    %c0_i32 = arith.constant 0 : i32
    %c0_i32_0 = arith.constant 0 : i32
    %c0_i32_1 = arith.constant 0 : i32
    return %c0_i32, %c0_i32_0 : i32, i32
  }
  func.func @transform_7(%arg0: i32) -> (i32, i32) {
    %c0_i32 = arith.constant 0 : i32
    %c0_i32_0 = arith.constant 0 : i32
    %c0_i32_1 = arith.constant 0 : i32
    return %c0_i32, %c0_i32_0 : i32, i32
  }
  func.func @transform_8(%arg0: i32) -> (i32, i32) {
    %c0_i32 = arith.constant 0 : i32
    %c0_i32_0 = arith.constant 0 : i32
    %c0_i32_1 = arith.constant 0 : i32
    return %c0_i32, %c0_i32_0 : i32, i32
  }
  func.func @transform_9(%arg0: i32) -> (i32, i32, i32) {
    %c0_i32 = arith.constant 0 : i32
    %c0_i32_0 = arith.constant 0 : i32
    %c0_i32_1 = arith.constant 0 : i32
    return %arg0, %c0_i32, %c0_i32_0 : i32, i32, i32
  }
}

</mosaic_0001>

<bundles_post_ra>
// kernel: pooling_encoder_forward.1
= control target key start
LH: loop header
LB: loop body
LE: loop exit
PB: predicated region body
PF: predicated region fallthrough
CT: control target
= control target key end

     0   :  { %v7224_v2 = vmov 0.0   ;;  %s7213_s0 = inlined_call_operand.vmem [shape: f32[2,8,32], index: 0, kind: input, shape index: {}]   ;;  %s7214_s1 = inlined_call_operand.vmem [shape: f32[2,2,8], index: 1, kind: input, shape index: {}]   ;;  %s7215_s2 = inlined_call_operand.vmem [shape: f32[6,32,16], index: 2, kind: input, shape index: {}]   ;;  %s7216_s3 = inlined_call_operand.vmem [shape: f32[6,1,16], index: 3, kind: input, shape index: {}]   ;;  %s7217_s4 = inlined_call_operand.vmem [shape: f32[2,16,32], index: 4, kind: input, shape index: {}]   ;;  %s7218_s5 = inlined_call_operand.vmem [shape: f32[32,64], index: 5, kind: input, shape index: {}]   ;;  %s7219_s6 = inlined_call_operand.vmem [shape: f32[1,64], index: 6, kind: input, shape index: {}]   ;;  %s7220_s7 = inlined_call_operand.vmem [shape: f32[64,32], index: 7, kind: input, shape index: {}]   ;;  %s7221_s8 = inlined_call_operand.vmem [shape: f32[6,32], index: 8, kind: input, shape index: {}]   ;;  %s7222_s9 = inlined_call_operand.hbm [shape: f32[2,2,32], index: 9, kind: output, shape index: {}]  }
   0x1   :  { %v6011_v0 = vld [vmem:[%s7215_s2 + $0x58] sm:$0xff]  ;;  %5369 = vmatprep.subr.mxu1 %v7224_v2  ;;  %5358 = vmatprep.subr.mxu0 %v7224_v2  ;;  %v6023_v3 = vld [vmem:[%s7215_s2 + $0x50] sm:$0xff]  ;;  %v6037_v5 = vld [vmem:[%s7215_s2 + $0x48] sm:$0xff] }
   0x2   :  { %v6016_v1 = vld [vmem:[%s7215_s2 + $0x18] sm:$0xff]  ;;  %v6028_v4 = vld [vmem:[%s7215_s2 + $0x10] sm:$0xff]  ;;  %5370 = vmatpush3.msra.mxu1 %v6011_v0  ;;  %v6042_v6 = vld [vmem:[%s7215_s2 + $0x8] sm:$0xff] }
   0x3   :  { %5359 = vmatpush3.msra.mxu0 %v6016_v1  ;;  %5371 = vmatprep.subr.mxu1 %v7224_v2 }
   0x4   :  { %5360 = vmatprep.subr.mxu0 %v7224_v2  ;;  %5372 = vmatpush3.msra.mxu1 %v6023_v3 }
   0x5   :  { %5361 = vmatpush3.msra.mxu0 %v6028_v4 }
   0x6   :  { %14 = vsyncpa [#allocation4], 0  ;;  %5373 = vmatprep.subr.mxu1 %v7224_v2  ;;  %5362 = vmatprep.subr.mxu0 %v7224_v2  ;;  %v6051_v7 = vld [vmem:[%s7215_s2 + $0x40] sm:$0xff]  ;;  %vm46_vm0 = vcmask 261120   ;;  %vm5954_vm1 = vmmov 0   ;;  %v6076_v10 = vld [vmem:[%s7215_s2 + $0x98] sm:$0xff]  ;;  %v364_v26 = vlaneseq }
   0x7   :  { %5374 = vmatpush3.msra.mxu1 %v6037_v5  ;;  %5363 = vmatpush3.msra.mxu0 %v6042_v6  ;;  %v6058_v8 = vld [vmem:[%s7215_s2] sm:$0xff]  ;;  %v6086_v11 = vld [vmem:[%s7215_s2 + $0x90] sm:$0xff]  ;;  %v6096_v12 = vld [vmem:[%s7215_s2 + $0x88] sm:$0xff]  ;;  %vm286_vm2 = vcmask 130048   ;;  %vm369_vm3 = vcmask 64512   ;;  %vm1147_vm4 = vcmask 523264  }
   0x8   :  { %5375 = vmatprep.subr.mxu1 %v7224_v2  ;;  %5364 = vmatprep.subr.mxu0 %v7224_v2  ;;  %v6065_v9 = vld [vmem:[%s7213_s0] sm:$0xff]  ;;  %v6139_v27 = vshrl.u32 %v364_v26, 7  ;;  %v6158_v41 = vld [vmem:[%s7215_s2 + $0x38] sm:$0xff]  ;;  %v6165_v42 = vld [vmem:[%s7215_s2 + $0x30] sm:$0xff]  ;;  %vm1597_vm5 = vcmask 1043456   ;;  %vm1581_vm6 = vcmask 27648  }
   0x9   :  { %5376 = vmatpush3.msra.mxu1 %v6051_v7  ;;  %5377 = vmatprep.mubr.msk.f32.mxu1 %vm5954_vm1, %v7224_v2  ;;  %v6105_v13 = vld [vmem:[%s7215_s2 + $0x80] sm:$0xff]  ;;  %v6172_v43 = vld [vmem:[%s7215_s2 + $0x28] sm:$0xff]  ;;  %v6190_v48 = vld [vmem:[%s7215_s2 + $0x78] sm:$0xff]  ;;  %vm1593_vm7 = vcmask 31744   ;;  %vm2238_vm8 = vcmask 257024   ;;  %vm2464_vm9 = vcmask 254976  }
   0xa   :  { %5365 = vmatpush3.msra.mxu0 %v6058_v8  ;;  %5366 = vmatprep.mubr.msk.f32.mxu0 %vm5954_vm1, %v7224_v2  ;;  %v6118_v14 = vld [vmem:[%s7216_s3 + $0x2] ss:$0 sm:$0xff]  ;;  %v6123_v15 = vld [vmem:[%s7216_s3] ss:$0 sm:$0xff]  ;;  %v6133_v22 = vld [vmem:[%s7216_s3 + $0x4] ss:$0 sm:$0xff] }
   0xb   :  { %5378 = vmatmul.mubr.msk.f32.vlgmr.msra.gmra.mxu1 %vm46_vm0, %v6065_v9  ;;  %5367 = vmatmul.mubr.msk.f32.vlgmr.msra.gmra.mxu0 %vm46_vm0, %v6065_v9  ;;  %v7223_v28 = vsub.s32 0, %v6139_v27  ;;  %v6145_v29 = vld [vmem:[%s7214_s1] sm:$0x3]  ;;  %v6196_v49 = vld [vmem:[%s7215_s2 + $0x70] sm:$0xff]  ;;  %v6205_v50 = vld [vmem:[%s7215_s2 + $0x68] sm:$0xff] }
   0xc   :  { %5380 = vmatprep.subr.mxu0 %v7224_v2  ;;  %5388 = vmatprep.mubr.msk.f32.mxu0 %vm5954_vm1, %v7224_v2  ;;  %v6179_v44 = vld [vmem:[%s7215_s2 + $0x20] sm:$0xff]  ;;  %v6242_v62 = vld [vmem:[%s7215_s2 + $0xb8] sm:$0xff]  ;;  %v6247_v63 = vld [vmem:[%s7215_s2 + $0xb0] sm:$0xff] }
   0xd   :  { %5381 = vmatpush3.msra.mxu0 %v6076_v10  ;;  %5396 = vmatprep.subr.mxu1 %v7224_v2  ;;  %v6150_v30 = vrot.slane %v6145_v29, %v7223_v28  ;;  %v6212_v51 = vld [vmem:[%s7215_s2 + $0x60] sm:$0xff] }
   0xe   :  { %5382 = vmatprep.subr.mxu0 %v7224_v2  ;;  %5398 = vmatprep.mubr.msk.f32.mxu1 %vm5954_vm1, %v7224_v2  ;;  %v6225_v56 = vld [vmem:[%s7216_s3 + $0x3] ss:$0 sm:$0xff]  ;;  %v6230_v57 = vld [vmem:[%s7216_s3 + $0x1] ss:$0 sm:$0xff] }
   0xf   :  { %5383 = vmatpush3.msra.mxu0 %v6086_v11 }
  0x10   :  { %5384 = vmatprep.subr.mxu0 %v7224_v2 }
  0x11   :  { %5385 = vmatpush3.msra.mxu0 %v6096_v12 }
  0x12   :  { %5386 = vmatprep.subr.mxu0 %v7224_v2 }
  0x13   :  { %5387 = vmatpush3.msra.mxu0 %v6105_v13 }
  0x14   :  { %5389 = vmatmul.mubr.msk.f32.vlgmr.msra.gmra.mxu0 %vm46_vm0, %v6065_v9  ;;  %5391 = vmatprep.subr.mxu0 %v7224_v2 }
  0x15   :  { %5393 = vmatprep.mubr.msk.f32.mxu0 %vm5954_vm1, %v7224_v2 }
  0xcb   :  { %v199_v16 = vpop.f32.mrf.mxu1  ;;  %v116_v17 = vpop.f32.mrf.mxu0 }
  0xcc   :  { %v200_v18 = vadd.f32 %v6118_v14, %v199_v16  ;;  %v117_v19 = vadd.f32 %v6123_v15, %v116_v17  ;;  %v6254_v16 = vld [vmem:[%s7215_s2 + $0xa8] sm:$0xff]  ;;  %v6261_v17 = vld [vmem:[%s7215_s2 + $0xa0] sm:$0xff] }
  0xcd   :  { %v5379_v20 = vpop.f32.mrf.mxu1  ;;  %v5368_v21 = vpop.f32.mrf.mxu0 }
  0xce   :  { %5392 = vmatpush3.xpose.msk.msra.mxu0 %vm286_vm2, %v200_v18 }
  0xcf   :  { %5401 = vmatprep.subr.mxu0 %v7224_v2 }
  0xd1   :  { %5394 = vmatmul.mubr.msk.f32.vlgmr.msra.gmra.mxu0 %vm286_vm2, %v117_v19 }
  0xd2   :  { %5409 = vmatprep.mubr.msk.f32.mxu0 %vm5954_vm1, %v7224_v2  ;;  %5402 = vmatpush3.msra.mxu0 %v6158_v41 }
  0xd3   :  { %5403 = vmatprep.subr.mxu0 %v7224_v2 }
  0xd4   :  { %v282_v23 = vpop.f32.mrf.mxu0  ;;  %5404 = vmatpush3.msra.mxu0 %v6165_v42 }
  0xd5   :  { %v283_v24 = vadd.f32 %v6133_v22, %v282_v23  ;;  %5405 = vmatprep.subr.mxu0 %v7224_v2 }
  0xd6   :  { %v5390_v25 = vpop.f32.mrf.mxu0  ;;  %5406 = vmatpush3.msra.mxu0 %v6172_v43 }
  0xd7   :  { %5397 = vmatpush3.msra.mxu1 %v283_v24  ;;  %5407 = vmatprep.subr.mxu0 %v7224_v2 }
  0xd8   :  { %5412 = vmatprep.subr.mxu1 %v7224_v2  ;;  %5408 = vmatpush3.msra.mxu0 %v6179_v44 }
  0xd9   :  { %5410 = vmatmul.mubr.msk.f32.vlgmr.msra.gmra.mxu0 %vm46_vm0, %v6065_v9  ;;  %5423 = vmatprep.subr.mxu0 %v7224_v2 }
  0xda   :  { %5431 = vmatprep.mubr.msk.f32.mxu0 %vm5954_vm1, %v7224_v2  ;;  %5424 = vmatpush3.msra.mxu0 %v6242_v62 }
  0xdb   :  { %5425 = vmatprep.subr.mxu0 %v7224_v2 }
  0xdc   :  { %5426 = vmatpush3.msra.mxu0 %v6247_v63 }
  0xdd   :  { %5427 = vmatprep.subr.mxu0 %v7224_v2 }
  0xde   :  { %5428 = vmatpush3.msra.mxu0 %v6254_v16 }
  0xdf   :  { %5429 = vmatprep.subr.mxu0 %v7224_v2 }
  0xe0   :  { %5430 = vmatpush3.msra.mxu0 %v6261_v17 }
  0xe1   :  { %5432 = vmatmul.mubr.msk.f32.vlgmr.msra.gmra.mxu0 %vm46_vm0, %v6065_v9  ;;  %5444 = vmatprep.subr.mxu0 %v7224_v2 }
  0xe2   :  { %5448 = vmatprep.mubr.msk.f32.mxu0 %vm5954_vm1, %v7224_v2 }
 0x191   :  { %v359_v31 = vpop.f32.mrf.mxu0 }
 0x192   :  { %v363_v32 = vmul.f32 0.25, %v359_v31 }
 0x193   :  { %v5395_v33 = vpop.f32.mrf.mxu0 }
 0x194   :  { %v368_v34 = vadd.f32 %v6150_v30, %v363_v32  ;;  %v6277_v33 = vld [vmem:[%s7216_s3 + $0x5] ss:$0 sm:$0xff] }
 0x196   :  { %v370_v35 = vsel %vm369_vm3, %v368_v34, -inf }
 0x197   :  { %371 = vmax.xlane.f32.xlu0 %v370_v35 }
 0x199   :  { %v535_v52 = vpop.f32.mrf.mxu0 }
 0x19a   :  { %v536_v60 = vadd.f32 %v6230_v57, %v535_v52 }
 0x19b   :  { %v5411_v53 = vpop.f32.mrf.mxu0 }
 0x220   :  { %v372_v36 = vpop.xlane.xlu0 %371 }
 0x221   :  { %v373_v37 = vsub.f32 %v368_v34, %v372_v36  ;;  %v701_v34 = vpop.f32.mrf.mxu0  ;;  %v6284_v36 = vld [vmem:[%s7217_s4 + $0x18] sm:$0xff] }
 0x222   :  { %v702_v35 = vadd.f32 %v6277_v33, %v701_v34  ;;  %5445 = vmatpush3.msra.mxu0 %v6284_v36  ;;  %v6349_v34 = vld [vmem:[%s7218_s5] sm:$0xff] }
 0x223   :  { %v374_v38 = vmul.f32 1.442695, %v373_v37  ;;  %5446 = vmatprep.subr.mxu0 %v7224_v2 }
 0x225   :  { %5883 = vpow2.f32 %v374_v38 }
 0x232   :  { %v5884_v39 = vpop.eup %5883 }
 0x233   :  { %v376_v40 = vsel %vm369_vm3, %v5884_v39, 0.0 }
 0x234   :  { %377 = vadd.xlane.f32.xlu0 %v376_v40  ;;  %v6291_v40 = vld [vmem:[%s7217_s4 + $0x8] sm:$0xff] }
 0x2bd   :  { %v378_v45 = vpop.xlane.xlu0 %377 }
 0x2be   :  { %5885 = vrcp.f32 %v378_v45  ;;  %v6297_v45 = vld [vmem:[%s7217_s4] sm:$0xff] }
 0x2cb   :  { %v5886_v46 = vpop.eup %5885 }
 0x2cc   :  { %v380_v47 = vmul.f32 %v5886_v46, %v5884_v39  ;;  %v6311_v46 = vld [vmem:[%s7217_s4 + $0x10] sm:$0xff] }
 0x2cd   :  { %5447 = vmatpush3.msra.mxu0 %v6311_v46 }
 0x2ce   :  { %5399 = vmatmul.mubr.msk.f32.vlgmr.msra.gmra.mxu1 %vm369_vm3, %v380_v47  ;;  %5458 = vmatprep.subr.mxu0 %v7224_v2 }
 0x2cf   :  { %5413 = vmatpush3.msra.mxu1 %v6190_v48  ;;  %5420 = vmatprep.mubr.msk.f32.mxu1 %vm5954_vm1, %v7224_v2 }
 0x2d0   :  { %5414 = vmatprep.subr.mxu1 %v7224_v2 }
 0x2d1   :  { %5415 = vmatpush3.msra.mxu1 %v6196_v49 }
 0x2d2   :  { %5416 = vmatprep.subr.mxu1 %v7224_v2 }
 0x2d3   :  { %5417 = vmatpush3.msra.mxu1 %v6205_v50 }
 0x2d4   :  { %5418 = vmatprep.subr.mxu1 %v7224_v2 }
 0x2d5   :  { %5419 = vmatpush3.msra.mxu1 %v6212_v51 }
 0x2d6   :  { %5421 = vmatmul.mubr.msk.f32.vlgmr.msra.gmra.mxu1 %vm46_vm0, %v6065_v9  ;;  %5434 = vmatprep.subr.mxu1 %v7224_v2 }
 0x2d7   :  { %5436 = vmatprep.mubr.msk.f32.mxu1 %vm5954_vm1, %v7224_v2 }
 0x38e   :  { %v450_v54 = vpop.f32.mrf.mxu1 }
 0x390   :  { %v5400_v55 = vpop.f32.mrf.mxu1 }
 0x396   :  { %v618_v58 = vpop.f32.mrf.mxu1 }
 0x397   :  { %v619_v59 = vadd.f32 %v6225_v56, %v618_v58  ;;  %v6321_v58 = vld [vmem:[%s7221_s8] ss:$0 sm:$0xff] }
 0x398   :  { %v5422_v61 = vpop.f32.mrf.mxu1 }
 0x399   :  { %5435 = vmatpush3.xpose.msk.msra.mxu1 %vm286_vm2, %v619_v59 }
 0x39a   :  { %5439 = vmatprep.subr.mxu1 %v7224_v2 }
 0x39c   :  { %5437 = vmatmul.mubr.msk.f32.vlgmr.msra.gmra.mxu1 %vm286_vm2, %v536_v60 }
 0x39d   :  { %5441 = vmatprep.mubr.msk.f32.mxu1 %vm5954_vm1, %v7224_v2  ;;  %5440 = vmatpush3.msra.mxu1 %v702_v35  ;;  %v6357_v35 = vld [vmem:[%s7220_s7 + $0x38] sm:$0xff] }
 0x39e   :  { %5451 = vmatprep.subr.mxu1 %v7224_v2 }
 0x45c   :  { %v777_v18 = vpop.f32.mrf.mxu1 }
 0x45d   :  { %v781_v19 = vmul.f32 0.25, %v777_v18 }
 0x45e   :  { %v5438_v20 = vpop.f32.mrf.mxu1 }
 0x45f   :  { %v782_v21 = vadd.f32 %v781_v19, %v6150_v30  ;;  %v5433_v30 = vpop.f32.mrf.mxu0 }
 0x460   :  { %v6362_v30 = vld [vmem:[%s7220_s7 + $0x30] sm:$0xff] }
 0x461   :  { %v783_v23 = vsel %vm369_vm3, %v782_v21, -inf }
 0x462   :  { %784 = vmax.xlane.f32.xlu1 %v783_v23 }
 0x4eb   :  { %v785_v24 = vpop.xlane.xlu1 %784 }
 0x4ec   :  { %v786_v25 = vsub.f32 %v782_v21, %v785_v24 }
 0x4ee   :  { %v787_v26 = vmul.f32 1.442695, %v786_v25 }
 0x4f0   :  { %5887 = vpow2.f32 %v787_v26  ;;  %v6330_v26 = vld [vmem:[%s7218_s5 + $0x18] sm:$0xff] }
 0x4fd   :  { %v5888_v31 = vpop.eup %5887 }
 0x4fe   :  { %v789_v32 = vsel %vm369_vm3, %v5888_v31, 0.0 }
 0x4ff   :  { %790 = vadd.xlane.f32.xlu1 %v789_v32  ;;  %v6342_v32 = vld [vmem:[%s7218_s5 + $0x8] sm:$0xff] }
 0x588   :  { %v791_v37 = vpop.xlane.xlu1 %790 }
 0x589   :  { %5889 = vrcp.f32 %v791_v37  ;;  %v6370_v37 = vld [vmem:[%s7220_s7 + $0x28] sm:$0xff] }
 0x596   :  { %v5890_v38 = vpop.eup %5889 }
 0x597   :  { %v793_v39 = vmul.f32 %v5890_v38, %v5888_v31  ;;  %v6337_v31 = vld [vmem:[%s7218_s5 + $0x10] sm:$0xff]  ;;  %v6377_v38 = vld [vmem:[%s7220_s7 + $0x20] sm:$0xff] }
 0x599   :  { %5442 = vmatmul.mubr.msk.f32.vlgmr.msra.gmra.mxu1 %vm369_vm3, %v793_v39  ;;  %v6384_v39 = vld [vmem:[%s7220_s7 + $0x18] sm:$0xff] }
 0x59a   :  { %5452 = vmatpush3.msra.mxu1 %v6291_v40  ;;  %5455 = vmatprep.mubr.msk.f32.mxu1 %vm5954_vm1, %v7224_v2 }
 0x59b   :  { %5453 = vmatprep.subr.mxu1 %v7224_v2 }
 0x59c   :  { %5454 = vmatpush3.msra.mxu1 %v6297_v45 }
 0x59d   :  { %5456 = vmatmul.mubr.msk.f32.vlgmr.msra.gmra.mxu1 %vm286_vm2, %v450_v54  ;;  %5469 = vmatprep.subr.mxu1 %v7224_v2 }
 0x59e   :  { %5485 = vmatprep.mubr.msk.f32.mxu1 %vm5954_vm1, %v7224_v2  ;;  %5470 = vmatpush3.msra.mxu1 %v6357_v35 }
 0x59f   :  { %5471 = vmatprep.subr.mxu1 %v7224_v2 }
 0x5a0   :  { %5472 = vmatpush3.msra.mxu1 %v6362_v30 }
 0x5a1   :  { %5473 = vmatprep.subr.mxu1 %v7224_v2 }
 0x5a2   :  { %5474 = vmatpush3.msra.mxu1 %v6370_v37 }
 0x5a3   :  { %5475 = vmatprep.subr.mxu1 %v7224_v2 }
 0x5a4   :  { %5476 = vmatpush3.msra.mxu1 %v6377_v38 }
 0x5a5   :  { %5477 = vmatprep.subr.mxu1 %v7224_v2 }
 0x5a6   :  { %5478 = vmatpush3.msra.mxu1 %v6384_v39 }
 0x5a7   :  { %5479 = vmatprep.subr.mxu1 %v7224_v2 }
 0x659   :  { %v863_v47 = vpop.f32.mrf.mxu1 }
 0x65a   :  { %5449 = vmatmul.mubr.msk.f32.vlgmr.msra.gmra.mxu0 %vm286_vm2, %v863_v47 }
 0x65b   :  { %v5443_v52 = vpop.f32.mrf.mxu1  ;;  %5466 = vmatprep.mubr.msk.f32.mxu0 %vm5954_vm1, %v7224_v2  ;;  %5459 = vmatpush3.msra.mxu0 %v6330_v26 }
 0x65c   :  { %5460 = vmatprep.subr.mxu0 %v7224_v2 }
 0x65d   :  { %v1012_v53 = vpop.f32.mrf.mxu1  ;;  %5461 = vmatpush3.msra.mxu0 %v6337_v31 }
 0x65e   :  { %5462 = vmatprep.subr.mxu0 %v7224_v2 }
 0x65f   :  { %v5457_v54 = vpop.f32.mrf.mxu1  ;;  %5463 = vmatpush3.msra.mxu0 %v6342_v32 }
 0x660   :  { %5464 = vmatprep.subr.mxu0 %v7224_v2 }
 0x661   :  { %5465 = vmatpush3.msra.mxu0 %v6349_v34 }
 0x662   :  { %5488 = vmatprep.subr.mxu0 %v7224_v2 }
 0x71a   :  { %v939_v55 = vpop.f32.mrf.mxu0 }
 0x71b   :  { %v1013_v59 = vadd.f32 %v1012_v53, %v939_v55  ;;  %v6393_v55 = vld [vmem:[%s7221_s8 + $0x1] ss:$0 sm:$0xff] }
 0x71c   :  { %v5450_v60 = vpop.f32.mrf.mxu0 }
 0x71d   :  { %v1021_v61 = vadd.f32 %v6321_v58, %v1013_v59  ;;  %v6398_v60 = vld [vmem:[%s7221_s8 + $0x2] ss:$0 sm:$0xff] }
 0x71f   :  { %v1022_v18 = vadd.f32 %v1021_v61, %v6065_v9 }
 0x721   :  { %v1025_v19 = vsel %vm46_vm0, %v1022_v18, 0.0 }
 0x722   :  { %1026 = vadd.xlane.f32.xlu0 %v1025_v19  ;;  %v6416_v19 = vld [vmem:[%s7220_s7 + $0x10] sm:$0xff] }
 0x723   :  { %5480 = vmatpush3.msra.mxu1 %v6416_v19 }
 0x724   :  { %5481 = vmatprep.subr.mxu1 %v7224_v2 }
 0x7ab   :  { %v1027_v20 = vpop.xlane.xlu0 %1026 }
 0x7ac   :  { %v1029_v21 = vmul.f32 0.03125, %v1027_v20  ;;  %v6423_v20 = vld [vmem:[%s7220_s7 + $0x8] sm:$0xff] }
 0x7ad   :  { %5482 = vmatpush3.msra.mxu1 %v6423_v20 }
 0x7ae   :  { %v1030_v23 = vsub.f32 %v1022_v18, %v1029_v21  ;;  %5483 = vmatprep.subr.mxu1 %v7224_v2  ;;  %v6430_v21 = vld [vmem:[%s7220_s7] sm:$0xff] }
 0x7af   :  { %5484 = vmatpush3.msra.mxu1 %v6430_v21 }
 0x7b0   :  { %v1031_v24 = vmul.f32 %v1030_v23, %v1030_v23  ;;  %5510 = vmatprep.subr.mxu1 %v7224_v2 }
 0x7b2   :  { %v1032_v25 = vsel %vm46_vm0, %v1031_v24, 0.0 }
 0x7b3   :  { %1033 = vadd.xlane.f32.xlu1 %v1032_v25 }
 0x83c   :  { %v1034_v47 = vpop.xlane.xlu1 %1033 }
 0x83d   :  { %v1035_v52 = vmul.f32 0.03125, %v1034_v47 }
 0x83f   :  { %v1036_v53 = vadd.f32 1e-05, %v1035_v52 }
 0x841   :  { %5891 = vrsqrt.f32 %v1036_v53 }
 0x84e   :  { %v5892_v54 = vpop.eup %5891 }
 0x84f   :  { %v1038_v59 = vmul.f32 %v5892_v54, %v1030_v23  ;;  %v6437_v23 = vld [vmem:[%s7219_s6] ss:$0 sm:$0xff] }
 0x850   :  { %7227 = vst [vmem:[#allocation6_spill] sm:$0xff] %v6437_v23 }
 0x851   :  { %v1043_v61 = vmul.f32 %v6393_v55, %v1038_v59 }
 0x853   :  { %v1048_v18 = vadd.f32 %v6398_v60, %v1043_v61 }
 0x855   :  { %5467 = vmatmul.mubr.msk.f32.vlgmr.msra.gmra.mxu0 %vm46_vm0, %v1048_v18 }
 0x856   :  { %5489 = vmatpush3.msra.mxu0 %v6016_v1  ;;  %5496 = vmatprep.mubr.msk.f32.mxu0 %vm5954_vm1, %v7224_v2 }
 0x857   :  { %5490 = vmatprep.subr.mxu0 %v7224_v2 }
 0x858   :  { %5491 = vmatpush3.msra.mxu0 %v6028_v4 }
 0x859   :  { %5492 = vmatprep.subr.mxu0 %v7224_v2 }
 0x85a   :  { %5493 = vmatpush3.msra.mxu0 %v6042_v6 }
 0x85b   :  { %5494 = vmatprep.subr.mxu0 %v7224_v2 }
 0x85c   :  { %5495 = vmatpush3.msra.mxu0 %v6058_v8 }
 0x85d   :  { %5499 = vmatprep.subr.mxu0 %v7224_v2 }
 0x915   :  { %v1129_v24 = vpop.f32.mrf.mxu0 }
 0x916   :  { %v1130_v25 = vadd.f32 %v6437_v23, %v1129_v24 }
 0x917   :  { %v5468_v47 = vpop.f32.mrf.mxu0 }
 0x918   :  { %v1133_v52 = vmax.f32 %v1130_v25, 0.0 }
 0x91a   :  { %5486 = vmatmul.mubr.msk.f32.vlgmr.msra.gmra.mxu1 %vm1147_vm4, %v1133_v52 }
 0x91b   :  { %5511 = vmatpush3.msra.mxu1 %v6076_v10  ;;  %5518 = vmatprep.mubr.msk.f32.mxu1 %vm5954_vm1, %v7224_v2  ;;  %v6454_v10 = vld [vmem:[%s7221_s8 + $0x3] ss:$0 sm:$0xff] }
 0x91c   :  { %5512 = vmatprep.subr.mxu1 %v7224_v2 }
 0x91d   :  { %5513 = vmatpush3.msra.mxu1 %v6086_v11 }
 0x91e   :  { %5514 = vmatprep.subr.mxu1 %v7224_v2 }
 0x91f   :  { %5515 = vmatpush3.msra.mxu1 %v6096_v12 }
 0x920   :  { %5516 = vmatprep.subr.mxu1 %v7224_v2 }
 0x921   :  { %5517 = vmatpush3.msra.mxu1 %v6105_v13 }
 0x922   :  { %5526 = vmatprep.subr.mxu1 %v7224_v2 }
 0x9da   :  { %v1217_v53 = vpop.f32.mrf.mxu1 }
 0x9db   :  { %v1218_v54 = vadd.f32 %v6454_v10, %v1217_v53  ;;  %v6462_v53 = vld [vmem:[%s7221_s8 + $0x4] ss:$0 sm:$0xff] }
 0x9dc   :  { %v5487_v59 = vpop.f32.mrf.mxu1 }
 0x9dd   :  { %v1221_v11 = vadd.f32 %v1218_v54, %v1048_v18  ;;  %v6467_v54 = vld [vmem:[%s7221_s8 + $0x5] ss:$0 sm:$0xff] }
 0x9df   :  { %v1224_v61 = vsel %vm46_vm0, %v1221_v11, 0.0 }
 0x9e0   :  { %1225 = vadd.xlane.f32.xlu0 %v1224_v61 }
 0xa69   :  { %v1226_v12 = vpop.xlane.xlu0 %1225 }
 0xa6a   :  { %v1227_v24 = vmul.f32 0.03125, %v1226_v12 }
 0xa6c   :  { %v1228_v25 = vsub.f32 %v1221_v11, %v1227_v24 }
 0xa6e   :  { %v1229_v47 = vmul.f32 %v1228_v25, %v1228_v25 }
 0xa70   :  { %v1230_v13 = vsel %vm46_vm0, %v1229_v47, 0.0 }
 0xa71   :  { %1231 = vadd.xlane.f32.xlu1 %v1230_v13 }
 0xafa   :  { %v1232_v52 = vpop.xlane.xlu1 %1231 }
 0xafb   :  { %v1233_v28 = vmul.f32 0.03125, %v1232_v52 }
 0xafd   :  { %v1234_v2 = vadd.f32 1e-05, %v1233_v28 }
 0xaff   :  { %5893 = vrsqrt.f32 %v1234_v2 }
 0xb0c   :  { %v5894_v23 = vpop.eup %5893 }
 0xb0d   :  { %v1236_v18 = vmul.f32 %v5894_v23, %v1228_v25  ;;  %v7228_v23 = vmov 0.0  }
 0xb0f   :  { %v1241_v59 = vmul.f32 %v6462_v53, %v1236_v18 }
 0xb11   :  { %v1246_v11 = vadd.f32 %v6467_v54, %v1241_v59 }
 0xb13   :  { %v1247_v61 = vadd.f32 %v1246_v11, %v6065_v9 }
 0xb15   :  { %1248 = vst.msk [vmem:[#allocation2] sm:$0xff] %vm46_vm0, %v1247_v61 }
 0xb1c   :  { %v1249_v2 = vld [vmem:[#allocation2] ss:$2 sm:$0xf]  ;;  %v1251_v28 = vld [vmem:[#allocation2 + $0x1] ss:$2 sm:$0xf] }
 0xb1d   :  { %v6473_v12 = vmax.f32 %v1249_v2, %v1251_v28 }
 0xb1f   :  { %5497 = vmatmul.mubr.msk.f32.vlgmr.msra.gmra.mxu0 %vm46_vm0, %v6473_v12  ;;  %5519 = vmatmul.mubr.msk.f32.vlgmr.msra.gmra.mxu1 %vm46_vm0, %v6473_v12 }
 0xb20   :  { %5500 = vmatpush3.msra.mxu0 %v6011_v0  ;;  %5507 = vmatprep.mubr.msk.f32.mxu0 %vm5954_vm1, %v7228_v23 }
 0xb21   :  { %5501 = vmatprep.subr.mxu0 %v7228_v23  ;;  %5528 = vmatprep.mubr.msk.f32.mxu1 %vm5954_vm1, %v7228_v23 }
 0xb22   :  { %5502 = vmatpush3.msra.mxu0 %v6023_v3 }
 0xb23   :  { %5503 = vmatprep.subr.mxu0 %v7228_v23 }
 0xb24   :  { %5504 = vmatpush3.msra.mxu0 %v6037_v5 }
 0xb25   :  { %5505 = vmatprep.subr.mxu0 %v7228_v23 }
 0xb26   :  { %5506 = vmatpush3.msra.mxu0 %v6051_v7 }
 0xb27   :  { %5508 = vmatmul.mubr.msk.f32.vlgmr.msra.gmra.mxu0 %vm46_vm0, %v6473_v12  ;;  %5521 = vmatprep.subr.mxu0 %v7228_v23 }
 0xb28   :  { %5523 = vmatprep.mubr.msk.f32.mxu0 %vm5954_vm1, %v7228_v23 }
 0xbdf   :  { %v1333_v0 = vpop.f32.mrf.mxu0  ;;  %v1495_v9 = vpop.f32.mrf.mxu1 }
 0xbe0   :  { %v1496_v24 = vadd.f32 %v6133_v22, %v1495_v9  ;;  %v1334_v59 = vadd.f32 %v6123_v15, %v1333_v0 }
 0xbe1   :  { %v5498_v25 = vpop.f32.mrf.mxu0  ;;  %v5520_v47 = vpop.f32.mrf.mxu1 }
 0xbe2   :  { %5527 = vmatpush3.msk.msra.mxu1 %vm1597_vm5, %v1496_v24 }
 0xbe3   :  { %5542 = vmatprep.subr.mxu1 %v7228_v23 }
 0xbe7   :  { %v1414_v13 = vpop.f32.mrf.mxu0 }
 0xbe8   :  { %v1415_v52 = vadd.f32 %v6118_v14, %v1414_v13  ;;  %v1578_v14 = vsub.s32 1, %v6139_v27 }
 0xbe9   :  { %v5509_v18 = vpop.f32.mrf.mxu0 }
 0xbea   :  { %5522 = vmatpush3.xpose.msk.msra.mxu0 %vm286_vm2, %v1415_v52  ;;  %v1579_v15 = vrot.slane %v6145_v29, %v1578_v14 }
 0xbeb   :  { %5531 = vmatprep.subr.mxu0 %v7228_v23 }
 0xbed   :  { %5524 = vmatmul.mubr.msk.f32.vlgmr.msra.gmra.mxu0 %vm286_vm2, %v1334_v59 }
 0xbee   :  { %5532 = vmatpush3.msra.mxu0 %v6158_v41  ;;  %5539 = vmatprep.mubr.msk.f32.mxu0 %vm5954_vm1, %v7228_v23 }
 0xbef   :  { %5533 = vmatprep.subr.mxu0 %v7228_v23 }
 0xbf0   :  { %5534 = vmatpush3.msra.mxu0 %v6165_v42 }
 0xbf1   :  { %5535 = vmatprep.subr.mxu0 %v7228_v23 }
 0xbf2   :  { %5536 = vmatpush3.msra.mxu0 %v6172_v43 }
 0xbf3   :  { %5537 = vmatprep.subr.mxu0 %v7228_v23 }
 0xbf4   :  { %5538 = vmatpush3.msra.mxu0 %v6179_v44 }
 0xbf5   :  { %5540 = vmatmul.mubr.msk.f32.vlgmr.msra.gmra.mxu0 %vm46_vm0, %v6473_v12  ;;  %5553 = vmatprep.subr.mxu0 %v7228_v23 }
 0xbf6   :  { %5554 = vmatpush3.msra.mxu0 %v6242_v62  ;;  %5561 = vmatprep.mubr.msk.f32.mxu0 %vm5954_vm1, %v7228_v23 }
 0xbf7   :  { %5555 = vmatprep.subr.mxu0 %v7228_v23 }
 0xbf8   :  { %5556 = vmatpush3.msra.mxu0 %v6247_v63 }
 0xbf9   :  { %5557 = vmatprep.subr.mxu0 %v7228_v23 }
 0xbfa   :  { %5558 = vmatpush3.msra.mxu0 %v6254_v16 }
 0xbfb   :  { %5559 = vmatprep.subr.mxu0 %v7228_v23 }
 0xbfc   :  { %5560 = vmatpush3.msra.mxu0 %v6261_v17 }
 0xbfd   :  { %5562 = vmatmul.mubr.msk.f32.vlgmr.msra.gmra.mxu0 %vm46_vm0, %v6473_v12  ;;  %5574 = vmatprep.subr.mxu0 %v7228_v23 }
 0xbfe   :  { %5575 = vmatpush3.msra.mxu0 %v6284_v36  ;;  %5578 = vmatprep.mubr.msk.f32.mxu0 %vm5954_vm1, %v7228_v23 }
 0xbff   :  { %5576 = vmatprep.subr.mxu0 %v7228_v23 }
 0xc00   :  { %5577 = vmatpush3.msra.mxu0 %v6311_v46 }
 0xc01   :  { %5588 = vmatprep.subr.mxu0 %v7228_v23 }
 0xcad   :  { %v1571_v22 = vpop.f32.mrf.mxu0 }
 0xcae   :  { %v1575_v41 = vmul.f32 0.25, %v1571_v22 }
 0xcaf   :  { %v5525_v42 = vpop.f32.mrf.mxu0 }
 0xcb0   :  { %v1580_v43 = vadd.f32 %v1579_v15, %v1575_v41 }
 0xcb2   :  { %v1582_v44 = vsel %vm1581_vm6, %v1580_v43, -inf }
 0xcb3   :  { %1583 = vmax.xlane.f32.xlu0 %v1582_v44 }
 0xcb5   :  { %v1750_v62 = vpop.f32.mrf.mxu0 }
 0xcb7   :  { %v5541_v63 = vpop.f32.mrf.mxu0 }
 0xcbd   :  { %v1912_v16 = vpop.f32.mrf.mxu0 }
 0xcbf   :  { %v5563_v17 = vpop.f32.mrf.mxu0 }
 0xd3c   :  { %v1584_v36 = vpop.xlane.xlu0 %1583 }
 0xd3d   :  { %v1585_v46 = vsub.f32 %v1580_v43, %v1584_v36 }
 0xd3f   :  { %v1586_v11 = vmul.f32 1.442695, %v1585_v46 }
 0xd41   :  { %5895 = vpow2.f32 %v1586_v11  ;;  %v6656_v11 = vld [vmem:[%s7216_s3 + $0x2] ss:$0 sm:$0xff] }
 0xd4e   :  { %v5896_v61 = vpop.eup %5895 }
 0xd4f   :  { %v1588_v2 = vsel %vm1581_vm6, %v5896_v61, 0.0 }
 0xd50   :  { %1589 = vadd.xlane.f32.xlu1 %v1588_v2  ;;  %v6661_v2 = vld [vmem:[%s7216_s3] ss:$0 sm:$0xff] }
 0xdd9   :  { %v1590_v29 = vpop.xlane.xlu1 %1589 }
 0xdda   :  { %5897 = vrcp.f32 %v1590_v29 }
 0xde7   :  { %v5898_v28 = vpop.eup %5897 }
 0xde8   :  { %v1592_v0 = vmul.f32 %v5898_v28, %v5896_v61 }
 0xdea   :  { %5529 = vmatmul.mubr.msk.f32.vlgmr.msra.gmra.mxu1 %vm1593_vm7, %v1592_v0 }
 0xdeb   :  { %5543 = vmatpush3.msra.mxu1 %v6190_v48  ;;  %5550 = vmatprep.mubr.msk.f32.mxu1 %vm5954_vm1, %v7228_v23 }
 0xdec   :  { %5544 = vmatprep.subr.mxu1 %v7228_v23 }
 0xded   :  { %5545 = vmatpush3.msra.mxu1 %v6196_v49 }
 0xdee   :  { %5546 = vmatprep.subr.mxu1 %v7228_v23 }
 0xdef   :  { %5547 = vmatpush3.msra.mxu1 %v6205_v50  ;;  %v1751_v50 = vadd.f32 %v6230_v57, %v1750_v62 }
 0xdf0   :  { %5548 = vmatprep.subr.mxu1 %v7228_v23 }
 0xdf1   :  { %5549 = vmatpush3.msra.mxu1 %v6212_v51  ;;  %v1913_v51 = vadd.f32 %v6277_v33, %v1912_v16 }
 0xdf2   :  { %5551 = vmatmul.mubr.msk.f32.vlgmr.msra.gmra.mxu1 %vm46_vm0, %v6473_v12  ;;  %5564 = vmatprep.subr.mxu1 %v7228_v23 }
 0xdf3   :  { %5566 = vmatprep.mubr.msk.f32.mxu1 %vm5954_vm1, %v7228_v23 }
 0xeaa   :  { %v1667_v48 = vpop.f32.mrf.mxu1 }
 0xeac   :  { %v5530_v9 = vpop.f32.mrf.mxu1 }
 0xead   :  { %v6678_v9 = vld [vmem:[%s7215_s2 + $0x90] sm:$0xff] }
 0xeb2   :  { %v1831_v24 = vpop.f32.mrf.mxu1 }
 0xeb3   :  { %v1832_v49 = vadd.f32 %v6225_v56, %v1831_v24  ;;  %v6685_v24 = vld [vmem:[%s7215_s2 + $0x88] sm:$0xff] }
 0xeb4   :  { %v5552_v25 = vpop.f32.mrf.mxu1 }
 0xeb5   :  { %5565 = vmatpush3.xpose.msk.msra.mxu1 %vm286_vm2, %v1832_v49  ;;  %v6692_v49 = vld [vmem:[%s7215_s2 + $0x80] sm:$0xff] }
 0xeb6   :  { %5569 = vmatprep.subr.mxu1 %v7228_v23 }
 0xeb8   :  { %5567 = vmatmul.mubr.msk.f32.vlgmr.msra.gmra.mxu1 %vm286_vm2, %v1751_v50 }
 0xeb9   :  { %5570 = vmatpush3.msk.msra.mxu1 %vm1597_vm5, %v1913_v51  ;;  %5571 = vmatprep.mubr.msk.f32.mxu1 %vm5954_vm1, %v7228_v23  ;;  %v6707_v51 = vld [vmem:[%s7214_s1 + $0x2] sm:$0x3] }
 0xeba   :  { %5581 = vmatprep.subr.mxu1 %v7228_v23 }
 0xf78   :  { %v1988_v47 = vpop.f32.mrf.mxu1 }
 0xf79   :  { %v1992_v56 = vmul.f32 0.25, %v1988_v47  ;;  %v7230_v47 = vsub.s32 0, %v6139_v27 }
 0xf7a   :  { %v5568_v13 = vpop.f32.mrf.mxu1 }
 0xf7b   :  { %v1993_v52 = vadd.f32 %v1992_v56, %v1579_v15  ;;  %v6712_v56 = vrot.slane %v6707_v51, %v7230_v47 }
 0xf7d   :  { %v1994_v18 = vsel %vm1581_vm6, %v1993_v52, -inf }
 0xf7e   :  { %1995 = vmax.xlane.f32.xlu0 %v1994_v18 }
0x1007   :  { %v1996_v57 = vpop.xlane.xlu0 %1995 }
0x1008   :  { %v1997_v59 = vsub.f32 %v1993_v52, %v1996_v57 }
0x100a   :  { %v1998_v22 = vmul.f32 1.442695, %v1997_v59 }
0x100c   :  { %5899 = vpow2.f32 %v1998_v22 }
0x1019   :  { %v5900_v33 = vpop.eup %5899 }
0x101a   :  { %v2000_v41 = vsel %vm1581_vm6, %v5900_v33, 0.0 }
0x101b   :  { %2001 = vadd.xlane.f32.xlu1 %v2000_v41 }
0x10a4   :  { %v2002_v42 = vpop.xlane.xlu1 %2001 }
0x10a5   :  { %5901 = vrcp.f32 %v2002_v42 }
0x10b2   :  { %v5902_v43 = vpop.eup %5901 }
0x10b3   :  { %v2004_v44 = vmul.f32 %v5902_v43, %v5900_v33 }
0x10b5   :  { %5572 = vmatmul.mubr.msk.f32.vlgmr.msra.gmra.mxu1 %vm1593_vm7, %v2004_v44  ;;  %v6720_v44 = vld [vmem:[%s7216_s3 + $0x4] ss:$0 sm:$0xff] }
0x10b6   :  { %5582 = vmatpush3.msra.mxu1 %v6291_v40  ;;  %5585 = vmatprep.mubr.msk.f32.mxu1 %vm5954_vm1, %v7228_v23 }
0x10b7   :  { %5583 = vmatprep.subr.mxu1 %v7228_v23 }
0x10b8   :  { %5584 = vmatpush3.msra.mxu1 %v6297_v45 }
0x10b9   :  { %5586 = vmatmul.mubr.msk.f32.vlgmr.msra.gmra.mxu1 %vm286_vm2, %v1667_v48  ;;  %5599 = vmatprep.subr.mxu1 %v7228_v23  ;;  %v6673_v48 = vld [vmem:[%s7215_s2 + $0x98] sm:$0xff] }
0x10ba   :  { %5600 = vmatpush3.msra.mxu1 %v6357_v35  ;;  %5615 = vmatprep.mubr.msk.f32.mxu1 %vm5954_vm1, %v7228_v23 }
0x10bb   :  { %5601 = vmatprep.subr.mxu1 %v7228_v23 }
0x10bc   :  { %5602 = vmatpush3.msra.mxu1 %v6362_v30 }
0x10bd   :  { %5603 = vmatprep.subr.mxu1 %v7228_v23 }
0x10be   :  { %5604 = vmatpush3.msra.mxu1 %v6370_v37 }
0x10bf   :  { %5605 = vmatprep.subr.mxu1 %v7228_v23 }
0x10c0   :  { %5606 = vmatpush3.msra.mxu1 %v6377_v38 }
0x10c1   :  { %5607 = vmatprep.subr.mxu1 %v7228_v23 }
0x10c2   :  { %5608 = vmatpush3.msra.mxu1 %v6384_v39 }
0x10c3   :  { %5609 = vmatprep.subr.mxu1 %v7228_v23 }
0x10c4   :  { %5610 = vmatpush3.msra.mxu1 %v6416_v19 }
0x10c5   :  { %5611 = vmatprep.subr.mxu1 %v7228_v23 }
0x10c6   :  { %5612 = vmatpush3.msra.mxu1 %v6423_v20 }
0x10c7   :  { %5613 = vmatprep.subr.mxu1 %v7228_v23 }
0x10c8   :  { %5614 = vmatpush3.msra.mxu1 %v6430_v21 }
0x10c9   :  { %5640 = vmatprep.subr.mxu1 %v7228_v23 }
0x1175   :  { %v2077_v40 = vpop.f32.mrf.mxu1 }
0x1176   :  { %5579 = vmatmul.mubr.msk.f32.vlgmr.msra.gmra.mxu0 %vm286_vm2, %v2077_v40 }
0x1177   :  { %v5573_v45 = vpop.f32.mrf.mxu1  ;;  %5589 = vmatpush3.msra.mxu0 %v6330_v26  ;;  %5596 = vmatprep.mubr.msk.f32.mxu0 %vm5954_vm1, %v7228_v23 }
0x1178   :  { %5590 = vmatprep.subr.mxu0 %v7228_v23 }
0x1179   :  { %v2225_v35 = vpop.f32.mrf.mxu1  ;;  %5591 = vmatpush3.msra.mxu0 %v6337_v31 }
0x117a   :  { %5592 = vmatprep.subr.mxu0 %v7228_v23 }
0x117b   :  { %v5587_v30 = vpop.f32.mrf.mxu1  ;;  %5593 = vmatpush3.msra.mxu0 %v6342_v32 }
0x117c   :  { %5594 = vmatprep.subr.mxu0 %v7228_v23  ;;  %v6727_v30 = vld [vmem:[%s7215_s2 + $0x38] sm:$0xff] }
0x117d   :  { %5595 = vmatpush3.msra.mxu0 %v6349_v34 }
0x117e   :  { %5618 = vmatprep.subr.mxu0 %v7228_v23 }
0x1236   :  { %v2152_v26 = vpop.f32.mrf.mxu0 }
0x1237   :  { %v2226_v37 = vadd.f32 %v2225_v35, %v2152_v26  ;;  %v6734_v26 = vld [vmem:[%s7215_s2 + $0x30] sm:$0xff] }
0x1238   :  { %v5580_v38 = vpop.f32.mrf.mxu0 }
0x1239   :  { %v2234_v39 = vadd.f32 %v6321_v58, %v2226_v37  ;;  %v6741_v37 = vld [vmem:[%s7215_s2 + $0x28] sm:$0xff]  ;;  %v6748_v38 = vld [vmem:[%s7215_s2 + $0x20] sm:$0xff] }
0x123b   :  { %v2235_v19 = vadd.f32 %v2234_v39, %v6473_v12 }
0x123d   :  { %v2239_v31 = vsel %vm2238_vm8, %v2235_v19, 0.0 }
0x123e   :  { %2240 = vadd.xlane.f32.xlu0 %v2239_v31 }
0x12c7   :  { %v2241_v20 = vpop.xlane.xlu0 %2240 }
0x12c8   :  { %v2242_v21 = vmul.f32 0.03125, %v2241_v20  ;;  %v6759_v20 = vld [vmem:[%s7215_s2 + $0x78] sm:$0xff] }
0x12ca   :  { %v2243_v32 = vsub.f32 %v2235_v19, %v2242_v21  ;;  %v6765_v21 = vld [vmem:[%s7215_s2 + $0x70] sm:$0xff] }
0x12cc   :  { %v2244_v15 = vmul.f32 %v2243_v32, %v2243_v32 }
0x12ce   :  { %v2245_v62 = vsel %vm2238_vm8, %v2244_v15, 0.0  ;;  %v6781_v15 = vld [vmem:[%s7215_s2 + $0x60] sm:$0xff] }
0x12cf   :  { %2246 = vadd.xlane.f32.xlu1 %v2245_v62 }
0x1358   :  { %v2247_v34 = vpop.xlane.xlu1 %2246 }
0x1359   :  { %v2248_v63 = vmul.f32 0.03125, %v2247_v34 }
0x135b   :  { %v2249_v16 = vadd.f32 1e-05, %v2248_v63 }
0x135d   :  { %5903 = vrsqrt.f32 %v2249_v16 }
0x136a   :  { %v5904_v17 = vpop.eup %5903 }
0x136b   :  { %v2251_v36 = vmul.f32 %v5904_v17, %v2243_v32  ;;  %v6774_v32 = vld [vmem:[%s7215_s2 + $0x68] sm:$0xff]  ;;  %v6794_v17 = vld [vmem:[%s7216_s3 + $0x3] ss:$0 sm:$0xff] }
0x136d   :  { %v2256_v58 = vmul.f32 %v6393_v55, %v2251_v36  ;;  %v6623_v55 = vld [vmem:[%s7213_s0 + $0x8] sm:$0xff]  ;;  %v6799_v36 = vld [vmem:[%s7216_s3 + $0x1] ss:$0 sm:$0xff] }
0x136f   :  { %v6609_v46 = vadd.f32 %v6398_v60, %v2256_v58 }
0x1371   :  { %5597 = vmatmul.mubr.msk.f32.vlgmr.msra.gmra.mxu0 %vm46_vm0, %v6609_v46 }
0x1372   :  { %5619 = vmatpush3.msra.mxu0 %v6016_v1  ;;  %5626 = vmatprep.mubr.msk.f32.mxu0 %vm5954_vm1, %v7228_v23  ;;  %v6629_v1 = vld [vmem:[%s7215_s2 + $0x58] sm:$0xff] }
0x1373   :  { %5620 = vmatprep.subr.mxu0 %v7228_v23 }
0x1374   :  { %5621 = vmatpush3.msra.mxu0 %v6028_v4 }
0x1375   :  { %5622 = vmatprep.subr.mxu0 %v7228_v23 }
0x1376   :  { %5623 = vmatpush3.msra.mxu0 %v6042_v6  ;;  %v7229_v6 = vld [vmem:[#allocation6_spill] sm:$0xff] }
0x1377   :  { %5624 = vmatprep.subr.mxu0 %v7228_v23 }
0x1378   :  { %5625 = vmatpush3.msra.mxu0 %v6058_v8 }
0x1379   :  { %5627 = vmatmul.mubr.msk.f32.vlgmr.msra.gmra.mxu0 %vm46_vm0, %v6623_v55  ;;  %5629 = vmatprep.subr.mxu0 %v7228_v23 }
0x137a   :  { %5630 = vmatpush3.msra.mxu0 %v6629_v1  ;;  %5637 = vmatprep.mubr.msk.f32.mxu0 %vm5954_vm1, %v7228_v23 }
0x137b   :  { %5631 = vmatprep.subr.mxu0 %v7228_v23 }
0x137c   :  { %5632 = vmatpush3.msra.mxu0 %v6023_v3 }
0x137d   :  { %5633 = vmatprep.subr.mxu0 %v7228_v23 }
0x137e   :  { %5634 = vmatpush3.msra.mxu0 %v6037_v5 }
0x137f   :  { %5635 = vmatprep.subr.mxu0 %v7228_v23 }
0x1380   :  { %5636 = vmatpush3.msra.mxu0 %v6051_v7 }
0x1381   :  { %5638 = vmatmul.mubr.msk.f32.vlgmr.msra.gmra.mxu0 %vm46_vm0, %v6623_v55  ;;  %5651 = vmatprep.subr.mxu0 %v7228_v23 }
0x1382   :  { %5653 = vmatprep.mubr.msk.f32.mxu0 %vm5954_vm1, %v7228_v23 }
0x1431   :  { %v2342_v4 = vpop.f32.mrf.mxu0 }
0x1432   :  { %v2343_v8 = vadd.f32 %v7229_v6, %v2342_v4 }
0x1433   :  { %v5598_v3 = vpop.f32.mrf.mxu0 }
0x1434   :  { %v2346_v60 = vmax.f32 %v2343_v8, 0.0  ;;  %v6811_v3 = vld [vmem:[%s7215_s2 + $0xb8] sm:$0xff] }
0x1436   :  { %5616 = vmatmul.mubr.msk.f32.vlgmr.msra.gmra.mxu1 %vm1147_vm4, %v2346_v60  ;;  %v6816_v60 = vld [vmem:[%s7215_s2 + $0xb0] sm:$0xff] }
0x1437   :  { %5648 = vmatprep.mubr.msk.f32.mxu1 %vm5954_vm1, %v7228_v23  ;;  %5641 = vmatpush3.msra.mxu1 %v6673_v48 }
0x1438   :  { %5642 = vmatprep.subr.mxu1 %v7228_v23 }
0x1439   :  { %v2550_v5 = vpop.f32.mrf.mxu0  ;;  %5643 = vmatpush3.msra.mxu1 %v6678_v9 }
0x143a   :  { %v2551_v0 = vadd.f32 %v6661_v2, %v2550_v5  ;;  %5644 = vmatprep.subr.mxu1 %v7228_v23  ;;  %v6823_v5 = vld [vmem:[%s7215_s2 + $0xa8] sm:$0xff] }
0x143b   :  { %v5628_v7 = vpop.f32.mrf.mxu0  ;;  %5645 = vmatpush3.msra.mxu1 %v6685_v24 }
0x143c   :  { %5646 = vmatprep.subr.mxu1 %v7228_v23  ;;  %v6830_v7 = vld [vmem:[%s7215_s2 + $0xa0] sm:$0xff] }
0x143d   :  { %5647 = vmatpush3.msra.mxu1 %v6692_v49 }
0x143e   :  { %5649 = vmatmul.mubr.msk.f32.vlgmr.msra.gmra.mxu1 %vm46_vm0, %v6623_v55  ;;  %5656 = vmatprep.subr.mxu1 %v7228_v23 }
0x143f   :  { %5658 = vmatprep.mubr.msk.f32.mxu1 %vm5954_vm1, %v7228_v23 }
0x1441   :  { %v2631_v61 = vpop.f32.mrf.mxu0 }
0x1442   :  { %v2632_v29 = vadd.f32 %v6656_v11, %v2631_v61 }
0x1443   :  { %v5639_v28 = vpop.f32.mrf.mxu0 }
0x1444   :  { %5652 = vmatpush3.xpose.msk.msra.mxu0 %vm286_vm2, %v2632_v29 }
0x1445   :  { %5661 = vmatprep.subr.mxu0 %v7228_v23 }
0x1447   :  { %5654 = vmatmul.mubr.msk.f32.vlgmr.msra.gmra.mxu0 %vm286_vm2, %v2551_v0 }
0x1448   :  { %5669 = vmatprep.mubr.msk.f32.mxu0 %vm5954_vm1, %v7228_v23  ;;  %5662 = vmatpush3.msra.mxu0 %v6727_v30 }
0x1449   :  { %5663 = vmatprep.subr.mxu0 %v7228_v23 }
0x144a   :  { %5664 = vmatpush3.msra.mxu0 %v6734_v26 }
0x144b   :  { %5665 = vmatprep.subr.mxu0 %v7228_v23 }
0x144c   :  { %5666 = vmatpush3.msra.mxu0 %v6741_v37 }
0x144d   :  { %5667 = vmatprep.subr.mxu0 %v7228_v23 }
0x144e   :  { %5668 = vmatpush3.msra.mxu0 %v6748_v38 }
0x144f   :  { %5670 = vmatmul.mubr.msk.f32.vlgmr.msra.gmra.mxu0 %vm46_vm0, %v6623_v55  ;;  %5683 = vmatprep.subr.mxu0 %v7228_v23 }
0x1450   :  { %5691 = vmatprep.mubr.msk.f32.mxu0 %vm5954_vm1, %v7228_v23  ;;  %5684 = vmatpush3.msra.mxu0 %v6811_v3 }
0x1451   :  { %5685 = vmatprep.subr.mxu0 %v7228_v23 }
0x1452   :  { %5686 = vmatpush3.msra.mxu0 %v6816_v60 }
0x1453   :  { %5687 = vmatprep.subr.mxu0 %v7228_v23 }
0x1454   :  { %5688 = vmatpush3.msra.mxu0 %v6823_v5 }
0x1455   :  { %5689 = vmatprep.subr.mxu0 %v7228_v23 }
0x1456   :  { %5690 = vmatpush3.msra.mxu0 %v6830_v7 }
0x1457   :  { %5692 = vmatmul.mubr.msk.f32.vlgmr.msra.gmra.mxu0 %vm46_vm0, %v6623_v55  ;;  %5704 = vmatprep.subr.mxu0 %v7228_v23 }
0x1458   :  { %5708 = vmatprep.mubr.msk.f32.mxu0 %vm5954_vm1, %v7228_v23 }
0x14f6   :  { %v6702_v25 = vpop.f32.mrf.mxu1 }
0x14f8   :  { %v5617_v50 = vpop.f32.mrf.mxu1 }
0x14fe   :  { %v2712_v40 = vpop.f32.mrf.mxu1 }
0x14ff   :  { %v2713_v45 = vadd.f32 %v6720_v44, %v2712_v40 }
0x1500   :  { %v5650_v35 = vpop.f32.mrf.mxu1 }
0x1501   :  { %5657 = vmatpush3.msra.mxu1 %v2713_v45  ;;  %v6860_v45 = vld [vmem:[%s7217_s4 + $0x8] sm:$0xff]  ;;  %v6866_v35 = vld [vmem:[%s7217_s4] sm:$0xff] }
0x1502   :  { %5672 = vmatprep.subr.mxu1 %v7228_v23 }
0x1507   :  { %v2788_v13 = vpop.f32.mrf.mxu0 }
0x1508   :  { %v2792_v52 = vmul.f32 0.25, %v2788_v13 }
0x1509   :  { %v5655_v18 = vpop.f32.mrf.mxu0 }
0x150a   :  { %v2797_v57 = vadd.f32 %v6712_v56, %v2792_v52 }
0x150c   :  { %v2798_v59 = vsel %vm369_vm3, %v2797_v57, -inf }
0x150d   :  { %2799 = vmax.xlane.f32.xlu0 %v2798_v59  ;;  %v6846_v59 = vld [vmem:[%s7216_s3 + $0x5] ss:$0 sm:$0xff] }
0x150f   :  { %v2961_v62 = vpop.f32.mrf.mxu0 }
0x1510   :  { %v2962_v6 = vadd.f32 %v6799_v36, %v2961_v62 }
0x1511   :  { %v5671_v34 = vpop.f32.mrf.mxu0 }
0x1596   :  { %v2800_v22 = vpop.xlane.xlu0 %2799 }
0x1597   :  { %v2801_v33 = vsub.f32 %v2797_v57, %v2800_v22  ;;  %v3123_v22 = vpop.f32.mrf.mxu0 }
0x1599   :  { %v2802_v41 = vmul.f32 1.442695, %v2801_v33  ;;  %v3124_v33 = vadd.f32 %v6846_v59, %v3123_v22 }
0x159b   :  { %5905 = vpow2.f32 %v2802_v41  ;;  %v6853_v41 = vld [vmem:[%s7217_s4 + $0x18] sm:$0xff] }
0x159c   :  { %5705 = vmatpush3.msra.mxu0 %v6853_v41 }
0x159d   :  { %5706 = vmatprep.subr.mxu0 %v7228_v23 }
0x15a8   :  { %v5906_v42 = vpop.eup %5905 }
0x15a9   :  { %v2804_v43 = vsel %vm369_vm3, %v5906_v42, 0.0 }
0x15aa   :  { %2805 = vadd.xlane.f32.xlu1 %v2804_v43 }
0x1633   :  { %v2806_v39 = vpop.xlane.xlu1 %2805 }
0x1634   :  { %5907 = vrcp.f32 %v2806_v39  ;;  %v6880_v39 = vld [vmem:[%s7217_s4 + $0x10] sm:$0xff] }
0x1635   :  { %5707 = vmatpush3.msra.mxu0 %v6880_v39 }
0x1636   :  { %5718 = vmatprep.subr.mxu0 %v7228_v23 }
0x1641   :  { %v5908_v19 = vpop.eup %5907 }
0x1642   :  { %v2808_v31 = vmul.f32 %v5908_v19, %v5906_v42 }
0x1644   :  { %5659 = vmatmul.mubr.msk.f32.vlgmr.msra.gmra.mxu1 %vm369_vm3, %v2808_v31 }
0x1645   :  { %5673 = vmatpush3.msra.mxu1 %v6759_v20  ;;  %5680 = vmatprep.mubr.msk.f32.mxu1 %vm5954_vm1, %v7228_v23 }
0x1646   :  { %5674 = vmatprep.subr.mxu1 %v7228_v23 }
0x1647   :  { %5675 = vmatpush3.msra.mxu1 %v6765_v21 }
0x1648   :  { %5676 = vmatprep.subr.mxu1 %v7228_v23 }
0x1649   :  { %5677 = vmatpush3.msra.mxu1 %v6774_v32 }
0x164a   :  { %5678 = vmatprep.subr.mxu1 %v7228_v23 }
0x164b   :  { %5679 = vmatpush3.msra.mxu1 %v6781_v15 }
0x164c   :  { %5681 = vmatmul.mubr.msk.f32.vlgmr.msra.gmra.mxu1 %vm46_vm0, %v6623_v55  ;;  %5694 = vmatprep.subr.mxu1 %v7228_v23 }
0x164d   :  { %5696 = vmatprep.mubr.msk.f32.mxu1 %vm5954_vm1, %v7228_v23 }
0x1704   :  { %v2878_v63 = vpop.f32.mrf.mxu1 }
0x1706   :  { %v5660_v16 = vpop.f32.mrf.mxu1 }
0x1707   :  { %v6890_v16 = vld [vmem:[%s7221_s8] ss:$0 sm:$0xff] }
0x170c   :  { %v3042_v58 = vpop.f32.mrf.mxu1 }
0x170d   :  { %v3043_v4 = vadd.f32 %v6794_v17, %v3042_v58 }
0x170e   :  { %v5682_v8 = vpop.f32.mrf.mxu1 }
0x170f   :  { %5695 = vmatpush3.xpose.msk.msra.mxu1 %vm286_vm2, %v3043_v4 }
0x1710   :  { %5699 = vmatprep.subr.mxu1 %v7228_v23 }
0x1712   :  { %5697 = vmatmul.mubr.msk.f32.vlgmr.msra.gmra.mxu1 %vm286_vm2, %v2962_v6  ;;  %v2430_v6 = vadd.f32 %v6454_v10, %v6702_v25 }
0x1713   :  { %5701 = vmatprep.mubr.msk.f32.mxu1 %vm5954_vm1, %v7228_v23  ;;  %5700 = vmatpush3.msra.mxu1 %v3124_v33 }
0x1714   :  { %5711 = vmatprep.subr.mxu1 %v7228_v23 }
0x17d2   :  { %v3199_v61 = vpop.f32.mrf.mxu1 }
0x17d3   :  { %v3203_v29 = vmul.f32 0.25, %v3199_v61 }
0x17d4   :  { %v5698_v28 = vpop.f32.mrf.mxu1 }
0x17d5   :  { %v3204_v0 = vadd.f32 %v3203_v29, %v6712_v56  ;;  %v5693_v56 = vpop.f32.mrf.mxu0  ;;  %v2433_v28 = vadd.f32 %v2430_v6, %v6609_v46  ;;  %v6904_v46 = vld [vmem:[%s7218_s5 + $0x18] sm:$0xff] }
0x17d6   :  { %v6911_v56 = vld [vmem:[%s7218_s5 + $0x10] sm:$0xff] }
0x17d7   :  { %v3205_v50 = vsel %vm369_vm3, %v3204_v0, -inf }
0x17d8   :  { %3206 = vmax.xlane.f32.xlu0 %v3205_v50 }
0x1861   :  { %v3207_v47 = vpop.xlane.xlu0 %3206 }
0x1862   :  { %v3208_v13 = vsub.f32 %v3204_v0, %v3207_v47  ;;  %v2436_v0 = vsel %vm2238_vm8, %v2433_v28, 0.0 }
0x1864   :  { %v3209_v52 = vmul.f32 1.442695, %v3208_v13 }
0x1866   :  { %5909 = vpow2.f32 %v3209_v52 }
0x1873   :  { %v5910_v18 = vpop.eup %5909 }
0x1874   :  { %v3211_v57 = vsel %vm369_vm3, %v5910_v18, 0.0 }
0x1875   :  { %3212 = vadd.xlane.f32.xlu1 %v3211_v57 }
0x18fe   :  { %v3213_v42 = vpop.xlane.xlu1 %3212 }
0x18ff   :  { %5911 = vrcp.f32 %v3213_v42  ;;  %v6918_v42 = vld [vmem:[%s7218_s5 + $0x8] sm:$0xff] }
0x190c   :  { %v5912_v43 = vpop.eup %5911 }
0x190d   :  { %v3215_v40 = vmul.f32 %v5912_v43, %v5910_v18  ;;  %v6925_v43 = vld [vmem:[%s7218_s5] sm:$0xff] }
0x190f   :  { %5702 = vmatmul.mubr.msk.f32.vlgmr.msra.gmra.mxu1 %vm369_vm3, %v3215_v40  ;;  %v6932_v40 = vld [vmem:[%s7220_s7 + $0x38] sm:$0xff] }
0x1910   :  { %5712 = vmatpush3.msra.mxu1 %v6860_v45  ;;  %5715 = vmatprep.mubr.msk.f32.mxu1 %vm5954_vm1, %v7228_v23 }
0x1911   :  { %5713 = vmatprep.subr.mxu1 %v7228_v23 }
0x1912   :  { %5714 = vmatpush3.msra.mxu1 %v6866_v35 }
0x1913   :  { %5716 = vmatmul.mubr.msk.f32.vlgmr.msra.gmra.mxu1 %vm286_vm2, %v2878_v63  ;;  %5729 = vmatprep.subr.mxu1 %v7228_v23 }
0x1914   :  { %5745 = vmatprep.mubr.msk.f32.mxu1 %vm5954_vm1, %v7228_v23  ;;  %5730 = vmatpush3.msra.mxu1 %v6932_v40 }
0x1915   :  { %5731 = vmatprep.subr.mxu1 %v7228_v23 }
0x19cf   :  { %v3285_v19 = vpop.f32.mrf.mxu1 }
0x19d0   :  { %5709 = vmatmul.mubr.msk.f32.vlgmr.msra.gmra.mxu0 %vm286_vm2, %v3285_v19  ;;  %v6937_v19 = vld [vmem:[%s7220_s7 + $0x30] sm:$0xff] }
0x19d1   :  { %v5703_v31 = vpop.f32.mrf.mxu1  ;;  %5726 = vmatprep.mubr.msk.f32.mxu0 %vm5954_vm1, %v7228_v23  ;;  %5719 = vmatpush3.msra.mxu0 %v6904_v46 }
0x19d2   :  { %5720 = vmatprep.subr.mxu0 %v7228_v23  ;;  %v6944_v31 = vld [vmem:[%s7220_s7 + $0x28] sm:$0xff]  ;;  %5732 = vmatpush3.msra.mxu1 %v6937_v19 }
0x19d3   :  { %v3433_v62 = vpop.f32.mrf.mxu1  ;;  %5721 = vmatpush3.msra.mxu0 %v6911_v56  ;;  %5733 = vmatprep.subr.mxu1 %v7228_v23 }
0x19d4   :  { %5722 = vmatprep.subr.mxu0 %v7228_v23  ;;  %5734 = vmatpush3.msra.mxu1 %v6944_v31 }
0x19d5   :  { %v5717_v34 = vpop.f32.mrf.mxu1  ;;  %5723 = vmatpush3.msra.mxu0 %v6918_v42  ;;  %5735 = vmatprep.subr.mxu1 %v7228_v23 }
0x19d6   :  { %5724 = vmatprep.subr.mxu0 %v7228_v23  ;;  %v6958_v34 = vld [vmem:[%s7220_s7 + $0x18] sm:$0xff] }
0x19d7   :  { %5725 = vmatpush3.msra.mxu0 %v6925_v43 }
0x19d8   :  { %5748 = vmatprep.subr.mxu0 %v7228_v23 }
0x1a90   :  { %v3360_v63 = vpop.f32.mrf.mxu0 }
0x1a91   :  { %v3434_v58 = vadd.f32 %v3433_v62, %v3360_v63  ;;  %v6951_v62 = vld [vmem:[%s7220_s7 + $0x20] sm:$0xff] }
0x1a92   :  { %v5710_v4 = vpop.f32.mrf.mxu0  ;;  %5736 = vmatpush3.msra.mxu1 %v6951_v62 }
0x1a93   :  { %v3442_v8 = vadd.f32 %v6890_v16, %v3434_v58  ;;  %5737 = vmatprep.subr.mxu1 %v7228_v23 }
0x1a94   :  { %5738 = vmatpush3.msra.mxu1 %v6958_v34 }
0x1a95   :  { %v3443_v61 = vadd.f32 %v6623_v55, %v3442_v8  ;;  %5739 = vmatprep.subr.mxu1 %v7228_v23 }
0x1a97   :  { %v3446_v29 = vsel %vm46_vm0, %v3443_v61, 0.0 }
0x1a98   :  { %3447 = vadd.xlane.f32.xlu0 %v3446_v29 }
0x1a9c   :  { %2437 = vadd.xlane.f32.xlu0 %v2436_v0 }
0x1b21   :  { %v3448_v50 = vpop.xlane.xlu0 %3447 }
0x1b22   :  { %v3449_v47 = vmul.f32 0.03125, %v3448_v50  ;;  %v6972_v50 = vld [vmem:[%s7221_s8 + $0x2] ss:$0 sm:$0xff] }
0x1b24   :  { %v3450_v13 = vsub.f32 %v3443_v61, %v3449_v47 }
0x1b25   :  { %v2438_v52 = vpop.xlane.xlu0 %2437 }
0x1b26   :  { %v2439_v18 = vmul.f32 0.03125, %v2438_v52  ;;  %v3451_v57 = vmul.f32 %v3450_v13, %v3450_v13 }
0x1b28   :  { %v2440_v22 = vsub.f32 %v2433_v28, %v2439_v18  ;;  %v3452_v10 = vsel %vm46_vm0, %v3451_v57, 0.0  ;;  %v6967_v28 = vld [vmem:[%s7221_s8 + $0x1] ss:$0 sm:$0xff] }
0x1b29   :  { %3453 = vadd.xlane.f32.xlu1 %v3452_v10 }
0x1b2a   :  { %v2441_v25 = vmul.f32 %v2440_v22, %v2440_v22 }
0x1b2c   :  { %v2442_v33 = vsel %vm2238_vm8, %v2441_v25, 0.0 }
0x1b2d   :  { %2443 = vadd.xlane.f32.xlu0 %v2442_v33 }
0x1bb2   :  { %v3454_v63 = vpop.xlane.xlu1 %3453 }
0x1bb3   :  { %v3455_v58 = vmul.f32 0.03125, %v3454_v63 }
0x1bb5   :  { %v3456_v4 = vadd.f32 1e-05, %v3455_v58 }
0x1bb6   :  { %v2444_v6 = vpop.xlane.xlu0 %2443 }
0x1bb7   :  { %5913 = vrsqrt.f32 %v3456_v4  ;;  %v2445_v8 = vmul.f32 0.03125, %v2444_v6 }
0x1bb9   :  { %v2446_v61 = vadd.f32 1e-05, %v2445_v8 }
0x1bbb   :  { %5915 = vrsqrt.f32 %v2446_v61 }
0x1bc4   :  { %v5914_v29 = vpop.eup %5913 }
0x1bc5   :  { %v3458_v0 = vmul.f32 %v5914_v29, %v3450_v13 }
0x1bc7   :  { %v3463_v47 = vmul.f32 %v6967_v28, %v3458_v0 }
0x1bc8   :  { %v5916_v52 = vpop.eup %5915 }
0x1bc9   :  { %v2448_v18 = vmul.f32 %v5916_v52, %v2440_v22  ;;  %v3468_v57 = vadd.f32 %v6972_v50, %v3463_v47  ;;  %v7008_v22 = vld [vmem:[%s7219_s6] ss:$0 sm:$0xff] }
0x1bcb   :  { %v2453_v10 = vmul.f32 %v6462_v53, %v2448_v18  ;;  %5727 = vmatmul.mubr.msk.f32.vlgmr.msra.gmra.mxu0 %vm46_vm0, %v3468_v57  ;;  %v6987_v53 = vld [vmem:[%s7220_s7 + $0x10] sm:$0xff] }
0x1bcc   :  { %5756 = vmatprep.mubr.msk.f32.mxu0 %vm5954_vm1, %v7228_v23  ;;  %5740 = vmatpush3.msra.mxu1 %v6987_v53 }
0x1bcd   :  { %v2458_v13 = vadd.f32 %v6467_v54, %v2453_v10  ;;  %5741 = vmatprep.subr.mxu1 %v7228_v23  ;;  %v6994_v54 = vld [vmem:[%s7220_s7 + $0x8] sm:$0xff] }
0x1bce   :  { %5742 = vmatpush3.msra.mxu1 %v6994_v54 }
0x1bcf   :  { %v2459_v25 = vadd.f32 %v2458_v13, %v6473_v12  ;;  %5743 = vmatprep.subr.mxu1 %v7228_v23  ;;  %v7001_v12 = vld [vmem:[%s7220_s7] sm:$0xff] }
0x1bd0   :  { %5744 = vmatpush3.msra.mxu1 %v7001_v12 }
0x1bd1   :  { %2460 = vst.msk [vmem:[#allocation2] sm:$0xf] %vm2238_vm8, %v2459_v25  ;;  %5770 = vmatprep.subr.mxu1 %v7228_v23  ;;  %v3674_v25 = vld [vmem:[%s7215_s2 + $0x18] sm:$0xff] }
0x1bd2   :  { %5749 = vmatpush3.msra.mxu0 %v3674_v25 }
0x1bd3   :  { %5750 = vmatprep.subr.mxu0 %v7228_v23 }
0x1bd8   :  { %v2461_v33 = vld [vmem:[#allocation2] ss:$2 sm:$0x3]  ;;  %v2462_v63 = vld [vmem:[#allocation2 + $0x1] ss:$2 sm:$0x3] }
0x1bd9   :  { %v2463_v58 = vmax.f32 %v2461_v33, %v2462_v63  ;;  %v3673_v33 = vld [vmem:[%s7215_s2 + $0x10] sm:$0xff]  ;;  %v3671_v63 = vld [vmem:[%s7215_s2] sm:$0xff] }
0x1bda   :  { %5751 = vmatpush3.msra.mxu0 %v3673_v33 }
0x1bdb   :  { %2465 = vst.msk [vmem:[#allocation3] sm:$0x3] %vm2464_vm9, %v2463_v58  ;;  %5752 = vmatprep.subr.mxu0 %v7228_v23 }
0x1c8b   :  { %v3549_v4 = vpop.f32.mrf.mxu0 }
0x1c8c   :  { %v3550_v6 = vadd.f32 %v7008_v22, %v3549_v4 }
0x1c8d   :  { %v5728_v8 = vpop.f32.mrf.mxu0 }
0x1c8e   :  { %v3553_v61 = vmax.f32 %v3550_v6, 0.0 }
0x1c90   :  { %5746 = vmatmul.mubr.msk.f32.vlgmr.msra.gmra.mxu1 %vm1147_vm4, %v3553_v61  ;;  %v7049_v61 = vld [vmem:[%s7221_s8 + $0x4] ss:$0 sm:$0xff] }
0x1c91   :  { %5771 = vmatpush3.msra.mxu1 %v6673_v48  ;;  %5778 = vmatprep.mubr.msk.f32.mxu1 %vm5954_vm1, %v7228_v23  ;;  %v7025_v48 = vld [vmem:[%s7221_s8 + $0x3] ss:$0 sm:$0xff] }
0x1c92   :  { %5772 = vmatprep.subr.mxu1 %v7228_v23 }
0x1c93   :  { %5773 = vmatpush3.msra.mxu1 %v6678_v9 }
0x1c94   :  { %5774 = vmatprep.subr.mxu1 %v7228_v23 }
0x1c95   :  { %5775 = vmatpush3.msra.mxu1 %v6685_v24 }
0x1c96   :  { %5776 = vmatprep.subr.mxu1 %v7228_v23 }
0x1c97   :  { %5777 = vmatpush3.msra.mxu1 %v6692_v49 }
0x1c98   :  { %5786 = vmatprep.subr.mxu1 %v7228_v23 }
0x1d50   :  { %v3636_v29 = vpop.f32.mrf.mxu1 }
0x1d51   :  { %v3637_v0 = vadd.f32 %v7025_v48, %v3636_v29 }
0x1d52   :  { %v5747_v47 = vpop.f32.mrf.mxu1 }
0x1d53   :  { %v3640_v9 = vadd.f32 %v3637_v0, %v3468_v57  ;;  %v3672_v57 = vld [vmem:[%s7215_s2 + $0x8] sm:$0xff]  ;;  %v7054_v0 = vld [vmem:[%s7221_s8 + $0x5] ss:$0 sm:$0xff] }
0x1d54   :  { %5753 = vmatpush3.msra.mxu0 %v3672_v57 }
0x1d55   :  { %v3643_v52 = vsel %vm46_vm0, %v3640_v9, 0.0  ;;  %5754 = vmatprep.subr.mxu0 %v7228_v23 }
0x1d56   :  { %3644 = vadd.xlane.f32.xlu1 %v3643_v52  ;;  %5755 = vmatpush3.msra.mxu0 %v3671_v63 }
0x1d57   :  { %5759 = vmatprep.subr.mxu0 %v7228_v23 }
0x1ddf   :  { %v3645_v24 = vpop.xlane.xlu1 %3644 }
0x1de0   :  { %v3646_v18 = vmul.f32 0.03125, %v3645_v24 }
0x1de2   :  { %v3647_v10 = vsub.f32 %v3640_v9, %v3646_v18 }
0x1de4   :  { %v3648_v13 = vmul.f32 %v3647_v10, %v3647_v10 }
0x1de6   :  { %v3649_v49 = vsel %vm46_vm0, %v3648_v13, 0.0 }
0x1de7   :  { %3650 = vadd.xlane.f32.xlu1 %v3649_v49  ;;  %v5070_v49 = vld [vmem:[%s7215_s2 + $0x40] sm:$0xff] }
0x1e70   :  { %v3651_v58 = vpop.xlane.xlu1 %3650 }
0x1e71   :  { %v3652_v4 = vmul.f32 0.03125, %v3651_v58 }
0x1e73   :  { %v3653_v6 = vadd.f32 1e-05, %v3652_v4 }
0x1e75   :  { %5917 = vrsqrt.f32 %v3653_v6 }
0x1e82   :  { %v5918_v8 = vpop.eup %5917 }
0x1e83   :  { %v3655_v29 = vmul.f32 %v5918_v8, %v3647_v10  ;;  %v5072_v10 = vld [vmem:[%s7215_s2 + $0x50] sm:$0xff] }
0x1e85   :  { %v3660_v47 = vmul.f32 %v7049_v61, %v3655_v29 }
0x1e87   :  { %v3665_v9 = vadd.f32 %v7054_v0, %v3660_v47 }
0x1e89   :  { %v3666_v52 = vadd.f32 %v6623_v55, %v3665_v9  ;;  %v5071_v55 = vld [vmem:[%s7215_s2 + $0x48] sm:$0xff]  ;;  %s5955_s2 = smov [#allocation3]  }
0x1e8a   :  { %s4885_s21 = sshll.u32 %s5955_s2, 4  ;;  %s4886_s21 = int_to_ptr.vmem [resolvable:$true] %s4885_s21 }
0x1e8b   :  { %3667 = vst.msk [vmem:[#allocation2] sm:$0xff] %vm46_vm0, %v3666_v52  ;;  %s5931_s22 = scalar_lea.vmem %s4886_s21, 64  ;;  %p5936_p1 = scmp.lt.s32.totalorder %s4886_s21, %s4886_s21 }
0x1e8c   :  { %p5932_p0 = scmp.ne.s32.totalorder %s4886_s21, %s5931_s22  ;;  %p5937_p2 = scmp.lt.s32.totalorder %s5931_s22, %s5931_s22 }
0x1e8e   :  { %p5938_p3 = por %p5937_p2, %p5936_p1 }
0x1e90   :  { %p5939_p4 = pnand %p5938_p3, %p5932_p0 }
0x1e92   :  { %v3668_v24 = vld [vmem:[#allocation2] ss:$2 sm:$0xf]  ;;  %v3669_v18 = vld [vmem:[#allocation2 + $0x1] ss:$2 sm:$0xf] }
0x1e93   :  { %v7060_v13 = vmax.f32 %v3668_v24, %v3669_v18 }
0x1e95   :  { %5757 = vmatmul.mubr.msk.f32.vlgmr.msra.gmra.mxu0 %vm46_vm0, %v7060_v13  ;;  %5779 = vmatmul.mubr.msk.f32.vlgmr.msra.gmra.mxu1 %vm46_vm0, %v7060_v13 }
0x1e96   :  { %5760 = vmatpush3.msra.mxu0 %v6629_v1  ;;  %5767 = vmatprep.mubr.msk.f32.mxu0 %vm5954_vm1, %v7228_v23 }
0x1e97   :  { %5761 = vmatprep.subr.mxu0 %v7228_v23  ;;  %5788 = vmatprep.mubr.msk.f32.mxu1 %vm5954_vm1, %v7228_v23 }
0x1e98   :  { %5762 = vmatpush3.msra.mxu0 %v5072_v10 }
0x1e99   :  { %5763 = vmatprep.subr.mxu0 %v7228_v23 }
0x1e9a   :  { %5764 = vmatpush3.msra.mxu0 %v5071_v55 }
0x1e9b   :  { %5765 = vmatprep.subr.mxu0 %v7228_v23 }
0x1e9c   :  { %5766 = vmatpush3.msra.mxu0 %v5070_v49 }
0x1e9d   :  { %5768 = vmatmul.mubr.msk.f32.vlgmr.msra.gmra.mxu0 %vm46_vm0, %v7060_v13  ;;  %5781 = vmatprep.subr.mxu0 %v7228_v23 }
0x1e9e   :  { %5783 = vmatprep.mubr.msk.f32.mxu0 %vm5954_vm1, %v7228_v23 }
0x1f55   :  { %v3751_v1 = vpop.f32.mrf.mxu0  ;;  %v3913_v25 = vpop.f32.mrf.mxu1 }
0x1f56   :  { %v3914_v33 = vadd.f32 %v6720_v44, %v3913_v25  ;;  %v3752_v8 = vadd.f32 %v6661_v2, %v3751_v1 }
0x1f57   :  { %v5758_v57 = vpop.f32.mrf.mxu0  ;;  %v5780_v63 = vpop.f32.mrf.mxu1 }
0x1f58   :  { %5787 = vmatpush3.msk.msra.mxu1 %vm1597_vm5, %v3914_v33 }
0x1f59   :  { %5802 = vmatprep.subr.mxu1 %v7228_v23 }
0x1f5d   :  { %v3832_v58 = vpop.f32.mrf.mxu0 }
0x1f5e   :  { %v3833_v4 = vadd.f32 %v6656_v11, %v3832_v58  ;;  %v3997_v11 = vrot.slane %v6707_v51, %v1578_v14 }
0x1f5f   :  { %v5769_v6 = vpop.f32.mrf.mxu0 }
0x1f60   :  { %5782 = vmatpush3.xpose.msk.msra.mxu0 %vm286_vm2, %v3833_v4 }
0x1f61   :  { %5791 = vmatprep.subr.mxu0 %v7228_v23 }
0x1f63   :  { %5784 = vmatmul.mubr.msk.f32.vlgmr.msra.gmra.mxu0 %vm286_vm2, %v3752_v8 }
0x1f64   :  { %5792 = vmatpush3.msra.mxu0 %v6727_v30  ;;  %5799 = vmatprep.mubr.msk.f32.mxu0 %vm5954_vm1, %v7228_v23 }
0x1f65   :  { %5793 = vmatprep.subr.mxu0 %v7228_v23 }
0x1f66   :  { %5794 = vmatpush3.msra.mxu0 %v6734_v26 }
0x1f67   :  { %5795 = vmatprep.subr.mxu0 %v7228_v23 }
0x1f68   :  { %5796 = vmatpush3.msra.mxu0 %v6741_v37 }
0x1f69   :  { %5797 = vmatprep.subr.mxu0 %v7228_v23 }
0x1f6a   :  { %5798 = vmatpush3.msra.mxu0 %v6748_v38 }
0x1f6b   :  { %5800 = vmatmul.mubr.msk.f32.vlgmr.msra.gmra.mxu0 %vm46_vm0, %v7060_v13  ;;  %5813 = vmatprep.subr.mxu0 %v7228_v23 }
0x1f6c   :  { %5814 = vmatpush3.msra.mxu0 %v6811_v3  ;;  %5821 = vmatprep.mubr.msk.f32.mxu0 %vm5954_vm1, %v7228_v23 }
0x1f6d   :  { %5815 = vmatprep.subr.mxu0 %v7228_v23 }
0x1f6e   :  { %5816 = vmatpush3.msra.mxu0 %v6816_v60 }
0x1f6f   :  { %5817 = vmatprep.subr.mxu0 %v7228_v23 }
0x1f70   :  { %5818 = vmatpush3.msra.mxu0 %v6823_v5 }
0x1f71   :  { %5819 = vmatprep.subr.mxu0 %v7228_v23 }
0x1f72   :  { %5820 = vmatpush3.msra.mxu0 %v6830_v7 }
0x1f73   :  { %5822 = vmatmul.mubr.msk.f32.vlgmr.msra.gmra.mxu0 %vm46_vm0, %v7060_v13  ;;  %5834 = vmatprep.subr.mxu0 %v7228_v23 }
0x1f74   :  { %5835 = vmatpush3.msra.mxu0 %v6853_v41  ;;  %5838 = vmatprep.mubr.msk.f32.mxu0 %vm5954_vm1, %v7228_v23 }
0x1f75   :  { %5836 = vmatprep.subr.mxu0 %v7228_v23 }
0x1f76   :  { %5837 = vmatpush3.msra.mxu0 %v6880_v39 }
0x1f77   :  { %5848 = vmatprep.subr.mxu0 %v7228_v23 }
0x2023   :  { %v3989_v2 = vpop.f32.mrf.mxu0 }
0x2024   :  { %v3993_v44 = vmul.f32 0.25, %v3989_v2 }
0x2025   :  { %v5785_v30 = vpop.f32.mrf.mxu0 }
0x2026   :  { %v3998_v26 = vadd.f32 %v3997_v11, %v3993_v44 }
0x2028   :  { %v3999_v37 = vsel %vm1581_vm6, %v3998_v26, -inf }
0x2029   :  { %4000 = vmax.xlane.f32.xlu0 %v3999_v37 }
0x202b   :  { %v4165_v38 = vpop.f32.mrf.mxu0 }
0x202d   :  { %v5801_v3 = vpop.f32.mrf.mxu0 }
0x2033   :  { %v4327_v60 = vpop.f32.mrf.mxu0 }
0x2035   :  { %v5823_v5 = vpop.f32.mrf.mxu0 }
0x20b2   :  { %v4001_v7 = vpop.xlane.xlu0 %4000 }
0x20b3   :  { %v4002_v41 = vsub.f32 %v3998_v26, %v4001_v7 }
0x20b5   :  { %v4003_v39 = vmul.f32 1.442695, %v4002_v41 }
0x20b7   :  { %5919 = vpow2.f32 %v4003_v39 }
0x20c4   :  { %v5920_v29 = vpop.eup %5919 }
0x20c5   :  { %v4005_v27 = vsel %vm1581_vm6, %v5920_v29, 0.0 }
0x20c6   :  { %4006 = vadd.xlane.f32.xlu1 %v4005_v27 }
0x214f   :  { %v4007_v14 = vpop.xlane.xlu1 %4006 }
0x2150   :  { %5921 = vrcp.f32 %v4007_v14 }
0x215d   :  { %v5922_v51 = vpop.eup %5921 }
0x215e   :  { %v4009_v47 = vmul.f32 %v5922_v51, %v5920_v29 }
0x2160   :  { %5789 = vmatmul.mubr.msk.f32.vlgmr.msra.gmra.mxu1 %vm1593_vm7, %v4009_v47 }
0x2161   :  { %5803 = vmatpush3.msra.mxu1 %v6759_v20  ;;  %5810 = vmatprep.mubr.msk.f32.mxu1 %vm5954_vm1, %v7228_v23 }
0x2162   :  { %5804 = vmatprep.subr.mxu1 %v7228_v23 }
0x2163   :  { %5805 = vmatpush3.msra.mxu1 %v6765_v21 }
0x2164   :  { %5806 = vmatprep.subr.mxu1 %v7228_v23 }
0x2165   :  { %5807 = vmatpush3.msra.mxu1 %v6774_v32  ;;  %v4166_v32 = vadd.f32 %v6799_v36, %v4165_v38 }
0x2166   :  { %5808 = vmatprep.subr.mxu1 %v7228_v23 }
0x2167   :  { %5809 = vmatpush3.msra.mxu1 %v6781_v15  ;;  %v4328_v15 = vadd.f32 %v6846_v59, %v4327_v60 }
0x2168   :  { %5811 = vmatmul.mubr.msk.f32.vlgmr.msra.gmra.mxu1 %vm46_vm0, %v7060_v13  ;;  %5824 = vmatprep.subr.mxu1 %v7228_v23 }
0x2169   :  { %5826 = vmatprep.mubr.msk.f32.mxu1 %vm5954_vm1, %v7228_v23 }
0x2220   :  { %v4082_v20 = vpop.f32.mrf.mxu1 }
0x2222   :  { %v5790_v9 = vpop.f32.mrf.mxu1 }
0x2228   :  { %v4246_v52 = vpop.f32.mrf.mxu1 }
0x2229   :  { %v4247_v21 = vadd.f32 %v6794_v17, %v4246_v52 }
0x222a   :  { %v5812_v24 = vpop.f32.mrf.mxu1 }
0x222b   :  { %5825 = vmatpush3.xpose.msk.msra.mxu1 %vm286_vm2, %v4247_v21 }
0x222c   :  { %5829 = vmatprep.subr.mxu1 %v7228_v23 }
0x222e   :  { %5827 = vmatmul.mubr.msk.f32.vlgmr.msra.gmra.mxu1 %vm286_vm2, %v4166_v32 }
0x222f   :  { %5830 = vmatpush3.msk.msra.mxu1 %vm1597_vm5, %v4328_v15  ;;  %5831 = vmatprep.mubr.msk.f32.mxu1 %vm5954_vm1, %v7228_v23 }
0x2230   :  { %5841 = vmatprep.subr.mxu1 %v7228_v23 }
0x22ee   :  { %v4403_v18 = vpop.f32.mrf.mxu1 }
0x22ef   :  { %v4407_v17 = vmul.f32 0.25, %v4403_v18 }
0x22f0   :  { %v5828_v10 = vpop.f32.mrf.mxu1 }
0x22f1   :  { %v4408_v55 = vadd.f32 %v4407_v17, %v3997_v11 }
0x22f3   :  { %v4409_v49 = vsel %vm1581_vm6, %v4408_v55, -inf }
0x22f4   :  { %4410 = vmax.xlane.f32.xlu0 %v4409_v49 }
0x237d   :  { %v4411_v36 = vpop.xlane.xlu0 %4410 }
0x237e   :  { %v4412_v1 = vsub.f32 %v4408_v55, %v4411_v36 }
0x2380   :  { %v4413_v25 = vmul.f32 1.442695, %v4412_v1 }
0x2382   :  { %5923 = vpow2.f32 %v4413_v25 }
0x238f   :  { %v5924_v59 = vpop.eup %5923 }
0x2390   :  { %v4415_v33 = vsel %vm1581_vm6, %v5924_v59, 0.0 }
0x2391   :  { %4416 = vadd.xlane.f32.xlu1 %v4415_v33 }
0x241a   :  { %v4417_v57 = vpop.xlane.xlu1 %4416 }
0x241b   :  { %5925 = vrcp.f32 %v4417_v57 }
0x2428   :  { %v5926_v63 = vpop.eup %5925 }
0x2429   :  { %v4419_v58 = vmul.f32 %v5926_v63, %v5924_v59 }
0x242b   :  { %5832 = vmatmul.mubr.msk.f32.vlgmr.msra.gmra.mxu1 %vm1593_vm7, %v4419_v58 }
0x242c   :  { %5842 = vmatpush3.msra.mxu1 %v6860_v45  ;;  %5845 = vmatprep.mubr.msk.f32.mxu1 %vm5954_vm1, %v7228_v23 }
0x242d   :  { %5843 = vmatprep.subr.mxu1 %v7228_v23 }
0x242e   :  { %5844 = vmatpush3.msra.mxu1 %v6866_v35 }
0x242f   :  { %5846 = vmatmul.mubr.msk.f32.vlgmr.msra.gmra.mxu1 %vm286_vm2, %v4082_v20  ;;  %5859 = vmatprep.subr.mxu1 %v7228_v23 }
0x2430   :  { %5860 = vmatpush3.msra.mxu1 %v6932_v40  ;;  %5875 = vmatprep.mubr.msk.f32.mxu1 %vm5954_vm1, %v7228_v23 }
0x2431   :  { %5861 = vmatprep.subr.mxu1 %v7228_v23 }
0x2432   :  { %5862 = vmatpush3.msra.mxu1 %v6937_v19 }
0x2433   :  { %5863 = vmatprep.subr.mxu1 %v7228_v23 }
0x2434   :  { %5864 = vmatpush3.msra.mxu1 %v6944_v31 }
0x2435   :  { %5865 = vmatprep.subr.mxu1 %v7228_v23 }
0x2436   :  { %5866 = vmatpush3.msra.mxu1 %v6951_v62 }
0x2437   :  { %5867 = vmatprep.subr.mxu1 %v7228_v23 }
0x2438   :  { %5868 = vmatpush3.msra.mxu1 %v6958_v34 }
0x2439   :  { %5869 = vmatprep.subr.mxu1 %v7228_v23 }
0x243a   :  { %5870 = vmatpush3.msra.mxu1 %v6987_v53 }
0x243b   :  { %5871 = vmatprep.subr.mxu1 %v7228_v23 }
0x243c   :  { %5872 = vmatpush3.msra.mxu1 %v6994_v54 }
0x243d   :  { %5873 = vmatprep.subr.mxu1 %v7228_v23 }
0x243e   :  { %5874 = vmatpush3.msra.mxu1 %v7001_v12 }
0x24eb   :  { %v4492_v45 = vpop.f32.mrf.mxu1 }
0x24ec   :  { %5839 = vmatmul.mubr.msk.f32.vlgmr.msra.gmra.mxu0 %vm286_vm2, %v4492_v45 }
0x24ed   :  { %v5833_v35 = vpop.f32.mrf.mxu1  ;;  %5849 = vmatpush3.msra.mxu0 %v6904_v46  ;;  %5856 = vmatprep.mubr.msk.f32.mxu0 %vm5954_vm1, %v7228_v23 }
0x24ee   :  { %5850 = vmatprep.subr.mxu0 %v7228_v23 }
0x24ef   :  { %v4640_v40 = vpop.f32.mrf.mxu1  ;;  %5851 = vmatpush3.msra.mxu0 %v6911_v56 }
0x24f0   :  { %5852 = vmatprep.subr.mxu0 %v7228_v23 }
0x24f1   :  { %v5847_v19 = vpop.f32.mrf.mxu1  ;;  %5853 = vmatpush3.msra.mxu0 %v6918_v42 }
0x24f2   :  { %5854 = vmatprep.subr.mxu0 %v7228_v23 }
0x24f3   :  { %5855 = vmatpush3.msra.mxu0 %v6925_v43 }
0x25ac   :  { %v4567_v31 = vpop.f32.mrf.mxu0 }
0x25ad   :  { %v4641_v62 = vadd.f32 %v4640_v40, %v4567_v31 }
0x25ae   :  { %v5840_v46 = vpop.f32.mrf.mxu0 }
0x25af   :  { %v4649_v34 = vadd.f32 %v6890_v16, %v4641_v62 }
0x25b1   :  { %v4650_v53 = vadd.f32 %v4649_v34, %v7060_v13 }
0x25b3   :  { %v4653_v54 = vsel %vm2238_vm8, %v4650_v53, 0.0 }
0x25b4   :  { %4654 = vadd.xlane.f32.xlu0 %v4653_v54 }
0x263d   :  { %v4655_v56 = vpop.xlane.xlu0 %4654 }
0x263e   :  { %v4656_v12 = vmul.f32 0.03125, %v4655_v56 }
0x2640   :  { %v4657_v4 = vsub.f32 %v4650_v53, %v4656_v12 }
0x2642   :  { %v4658_v6 = vmul.f32 %v4657_v4, %v4657_v4 }
0x2644   :  { %v4659_v42 = vsel %vm2238_vm8, %v4658_v6, 0.0 }
0x2645   :  { %4660 = vadd.xlane.f32.xlu1 %v4659_v42 }
0x26ce   :  { %v4661_v23 = vpop.xlane.xlu1 %4660 }
0x26cf   :  { %v4662_v8 = vmul.f32 0.03125, %v4661_v23 }
0x26d1   :  { %v4663_v43 = vadd.f32 1e-05, %v4662_v8 }
0x26d3   :  { %5927 = vrsqrt.f32 %v4663_v43 }
0x26e0   :  { %v5928_v11 = vpop.eup %5927 }
0x26e1   :  { %v4665_v2 = vmul.f32 %v5928_v11, %v4657_v4 }
0x26e3   :  { %v4670_v16 = vmul.f32 %v6967_v28, %v4665_v2 }
0x26e5   :  { %v4675_v44 = vadd.f32 %v6972_v50, %v4670_v16 }
0x26e7   :  { %5857 = vmatmul.mubr.msk.f32.vlgmr.msra.gmra.mxu0 %vm46_vm0, %v4675_v44 }
0x27a7   :  { %v4756_v30 = vpop.f32.mrf.mxu0 }
0x27a8   :  { %v4757_v26 = vadd.f32 %v7008_v22, %v4756_v30 }
0x27a9   :  { %v5858_v37 = vpop.f32.mrf.mxu0 }
0x27aa   :  { %v4760_v38 = vmax.f32 %v4757_v26, 0.0 }
0x27ac   :  { %5876 = vmatmul.mubr.msk.f32.vlgmr.msra.gmra.mxu1 %vm1147_vm4, %v4760_v38 }
0x286c   :  { %v4843_v3 = vpop.f32.mrf.mxu1 }
0x286d   :  { %v4844_v60 = vadd.f32 %v7025_v48, %v4843_v3 }
0x286e   :  { %v5877_v5 = vpop.f32.mrf.mxu1 }
0x286f   :  { %v4847_v7 = vadd.f32 %v4844_v60, %v4675_v44 }
0x2871   :  { %v4850_v41 = vsel %vm2238_vm8, %v4847_v7, 0.0 }
0x2872   :  { %4851 = vadd.xlane.f32.xlu0 %v4850_v41 }
0x28fb   :  { %v4852_v28 = vpop.xlane.xlu0 %4851 }
0x28fc   :  { %v4853_v39 = vmul.f32 0.03125, %v4852_v28 }
0x28fe   :  { %v4854_v50 = vsub.f32 %v4847_v7, %v4853_v39 }
0x2900   :  { %v4855_v29 = vmul.f32 %v4854_v50, %v4854_v50 }
0x2902   :  { %v4856_v27 = vsel %vm2238_vm8, %v4855_v29, 0.0 }
0x2903   :  { %4857 = vadd.xlane.f32.xlu1 %v4856_v27 }
0x298c   :  { %v4858_v22 = vpop.xlane.xlu1 %4857 }
0x298d   :  { %v4859_v14 = vmul.f32 0.03125, %v4858_v22 }
0x298f   :  { %v4860_v51 = vadd.f32 1e-05, %v4859_v14 }
0x2991   :  { %5929 = vrsqrt.f32 %v4860_v51 }
0x299e   :  { %v5930_v47 = vpop.eup %5929 }
0x299f   :  { %v4862_v20 = vmul.f32 %v5930_v47, %v4854_v50 }
0x29a1   :  { %v4867_v48 = vmul.f32 %v7049_v61, %v4862_v20 }
0x29a3   :  { %v4872_v9 = vadd.f32 %v7054_v0, %v4867_v48 }
0x29a5   :  { %v4873_v52 = vadd.f32 %v4872_v9, %v7060_v13 }
0x29a7   :  { %4874 = vst.msk [vmem:[#allocation2] sm:$0xf] %vm2238_vm8, %v4873_v52 }
0x29ae   :  { %v4875_v21 = vld [vmem:[#allocation2] ss:$2 sm:$0x3]  ;;  %v4876_v24 = vld [vmem:[#allocation2 + $0x1] ss:$2 sm:$0x3] }
0x29af   :  { %v4877_v32 = vmax.f32 %v4875_v21, %v4876_v24 }
0x29b1   :  { %4879 = vst.msk [vmem:[#allocation3 + $0x2] sm:$0x3] %vm2464_vm9, %v4877_v32 }
0x29b2   :  { %5942 = shalt.err (!%p5939_p4)
}
0x29b3   :  { %s5956_s23 = smov 32   ;;  %s5957_s24 = smov 2  }
0x29b4   :  { %4891 = dma.vmem_to_hbm [thread:$0]  %s4886_s21, 64, %s7222_s9, [#allocation4], %s5956_s23, %s5956_s23, %s5957_s24  }
0x29b5   :  { %5951 = dma.done.wait [#allocation4], 64  }
0x29b6   :  { %5952 = vsyncadd [#allocation4], 4294967232 }
0x29b7   :  { %4895 = vsyncpa [#allocation4], 1 }

</bundles_post_ra>
